<compile_context>
chip_gen: v6e
topology: v6e:2x2x1
jax: 0.10.0
libtpu: 0.0.40
codegen_flags: <defaults>
</compile_context>

<pallas_src>
import functools

import jax
import jax.numpy as jnp
from jax.experimental import pallas as pl
from jax.experimental.pallas import tpu as pltpu


def _gl_attention_kernel(loc_ref, glob_ref,
                         wkv_ref, bkv_ref,
                         wq_ref, bq_ref,
                         wp_ref, bp_ref,
                         bias_ref,
                         out_ref,
                         o_scratch,
                         *, num_heads, scale, block_windows, tokens):
    """One grid step == Bw windows.

    loc_ref / glob_ref / out_ref : (Bw*N, C) VMEM tiles (windows flattened to rows)
    wkv_ref : (C, 2C) bf16, wq_ref/wp_ref : (C, C) bf16
    bkv_ref : (1, 2C) f32, bq_ref/bp_ref : (1, C) f32
    bias_ref : (H, N, N) f32 (resident, constant index_map)
    o_scratch : (Bw*N, C) f32 VMEM slab for the per-head attention outputs
    """
    Bw, N = block_windows, tokens
    C = out_ref.shape[-1]
    d = C // num_heads

    # Activations -> bf16 only at the MXU boundary; accumulate in f32.
    loc = loc_ref[...].astype(jnp.bfloat16)        # (Bw*N, C)
    glob = glob_ref[...].astype(jnp.bfloat16)      # (Bw*N, C)

    # Fused K|V projection: one (M, C) @ (C, 2C) matmul instead of two.
    kv = jnp.dot(loc, wkv_ref[...], preferred_element_type=jnp.float32) + bkv_ref[0]
    k3 = kv[:, :C].astype(jnp.bfloat16).reshape(Bw, N, C)
    v3 = kv[:, C:].astype(jnp.bfloat16).reshape(Bw, N, C)

    q = jnp.dot(glob, wq_ref[...], preferred_element_type=jnp.float32) + bq_ref[0]
    q3 = (q * scale).astype(jnp.bfloat16).reshape(Bw, N, C)

    # Per-head attention, batched over the Bw windows of this block.
    # Head h maps to the contiguous channel slice [h*d, (h+1)*d), matching the
    # torch reshape (B_, N, H, d) -> permute -> (B_, H, N, d).
    for h in range(num_heads):
        qh = q3[:, :, h * d:(h + 1) * d]           # (Bw, N, d) bf16
        kh = k3[:, :, h * d:(h + 1) * d]           # (Bw, N, d) bf16
        vh = v3[:, :, h * d:(h + 1) * d]           # (Bw, N, d) bf16

        # Scores: contract over d directly (no materialized kh^T).
        s = jnp.einsum("bnd,bmd->bnm", qh, kh,
                       preferred_element_type=jnp.float32)       # (Bw, N, N) f32
        s = s + bias_ref[h][None]                                # rel-pos bias (f32)

        # Numerically-stable softmax, all in f32 on VPU/XLU/EUP.
        s = s - jnp.max(s, axis=-1, keepdims=True)
        p = jnp.exp(s)
        p = p * pl.reciprocal(jnp.sum(p, axis=-1, keepdims=True), approx=True)

        oh = jnp.einsum("bnm,bmd->bnd", p.astype(jnp.bfloat16), vh,
                        preferred_element_type=jnp.float32)      # (Bw, N, d)

        # Write this head's output straight into its channel slice of the slab
        # (no lane-axis concatenate, bounds vreg live ranges).
        o_scratch[:, h * d:(h + 1) * d] = oh.reshape(Bw * N, d)

    # Output projection on the full slab.
    o = o_scratch[...].astype(jnp.bfloat16)                       # (Bw*N, C)
    y = jnp.dot(o, wp_ref[...], preferred_element_type=jnp.float32) + bp_ref[0]
    out_ref[...] = y.astype(out_ref.dtype)


def _choose_block_windows(B_, N):
    """Pick windows-per-step: ~256 rows per block (MXU pass granularity on
    v6e/v7x), but keep the grid length >= 2 so v7x's two TensorCores both
    get work."""
    bw = max(1, 256 // N)
    bw = min(bw, B_)
    while bw > 1 and -(-B_ // bw) < 2:
        bw //= 2
    return max(1, bw)


def gl_attention(local_features, global_features, params, *, num_heads, window_size,
                 qk_scale=None, block_windows=None):
    """Pallas implementation of GLAttention.forward (mask=None, dropout=0)."""
    B_, N, C = local_features.shape
    assert local_features.shape == global_features.shape
    assert C % num_heads == 0
    head_dim = C // num_heads
    scale = qk_scale if qk_scale is not None else head_dim ** (-0.5)
    assert N == window_size[0] * window_size[1]

    # ---- glue: gather the relative position bias into (H, N, N) ----
    Wh, Ww = window_size
    coords = jnp.stack(jnp.meshgrid(jnp.arange(Wh), jnp.arange(Ww), indexing="ij"))
    coords_flatten = coords.reshape(2, -1)                                # (2, N)
    rel = coords_flatten[:, :, None] - coords_flatten[:, None, :]         # (2, N, N)
    rel = rel.transpose(1, 2, 0)                                          # (N, N, 2)
    rel = rel.at[:, :, 0].add(Wh - 1)
    rel = rel.at[:, :, 1].add(Ww - 1)
    rel = rel.at[:, :, 0].multiply(2 * Ww - 1)
    relative_position_index = rel.sum(-1)                                 # (N, N)

    rel_bias = params["rel_pos_table"][relative_position_index.reshape(-1)]
    rel_bias = rel_bias.reshape(N, N, num_heads).transpose(2, 0, 1)       # (H, N, N)
    rel_bias = rel_bias.astype(jnp.float32)   # kept f32 (added inside f32 softmax)

    # ---- fused / pre-cast weights ----
    wkv = jnp.concatenate([params["wk"], params["wv"]], axis=1).astype(jnp.bfloat16)
    bkv = jnp.concatenate([params["bk"], params["bv"]]).reshape(1, 2 * C).astype(jnp.float32)
    wq = params["wq"].astype(jnp.bfloat16)
    bq = params["bq"].reshape(1, C).astype(jnp.float32)
    wp = params["wp"].astype(jnp.bfloat16)
    bp = params["bp"].reshape(1, C).astype(jnp.float32)

    # ---- window batching ----
    if block_windows is None:
        block_windows = _choose_block_windows(B_, N)
    Bw = block_windows
    num_blocks = -(-B_ // Bw)
    B_pad = num_blocks * Bw
    if B_pad != B_:
        pad = B_pad - B_
        local_features = jnp.pad(local_features, ((0, pad), (0, 0), (0, 0)))
        global_features = jnp.pad(global_features, ((0, pad), (0, 0), (0, 0)))

    # Flatten windows to rows: projections become large-M matmuls, blocks are 2D.
    loc2 = local_features.reshape(B_pad * N, C)
    glob2 = global_features.reshape(B_pad * N, C)
    rows = Bw * N

    kernel = functools.partial(_gl_attention_kernel, num_heads=num_heads,
                               scale=scale, block_windows=Bw, tokens=N)

    const2d = lambda i: (0, 0)
    const3d = lambda i: (0, 0, 0)
    per_block = lambda i: (i, 0)

    out2 = pl.pallas_call(
        kernel,
        out_shape=jax.ShapeDtypeStruct((B_pad * N, C), local_features.dtype),
        grid_spec=pltpu.PrefetchScalarGridSpec(
            num_scalar_prefetch=0,
            grid=(num_blocks,),
            in_specs=[
                pl.BlockSpec((rows, C), per_block),          # local (flattened)
                pl.BlockSpec((rows, C), per_block),          # global (flattened)
                pl.BlockSpec((C, 2 * C), const2d),           # fused Wk|Wv (bf16)
                pl.BlockSpec((1, 2 * C), const2d),           # fused bk|bv
                pl.BlockSpec((C, C), const2d),               # Wq (bf16)
                pl.BlockSpec((1, C), const2d),               # bq
                pl.BlockSpec((C, C), const2d),               # Wp (bf16)
                pl.BlockSpec((1, C), const2d),               # bp
                pl.BlockSpec((num_heads, N, N), const3d),    # relative position bias
            ],
            out_specs=pl.BlockSpec((rows, C), per_block),
            scratch_shapes=[pltpu.VMEM((rows, C), jnp.float32)],
        ),
        compiler_params=pltpu.CompilerParams(
            dimension_semantics=("parallel",),
            vmem_limit_bytes=32 * 1024 * 1024,
        ),
    )(loc2, glob2, wkv, bkv, wq, bq, wp, bp, rel_bias)

    return out2.reshape(B_pad, N, C)[:B_]


def _reference(local_features, global_features, params, *, num_heads, window_size):
    """Pure-JAX f32 reference (mirrors the PyTorch forward, mask=None, dropout=0)."""
    B_, N, C = local_features.shape
    d = C // num_heads
    scale = d ** (-0.5)
    Wh, Ww = window_size

    def heads(x):  # (B_, N, C) -> (B_, H, N, d)
        return x.reshape(B_, N, num_heads, d).transpose(0, 2, 1, 3)

    k = heads(local_features @ params["wk"] + params["bk"])
    q = heads(global_features @ params["wq"] + params["bq"]) * scale
    v = heads(local_features @ params["wv"] + params["bv"])

    attn = jnp.einsum("bhnd,bhmd->bhnm", q, k)

    coords = jnp.stack(jnp.meshgrid(jnp.arange(Wh), jnp.arange(Ww), indexing="ij"))
    cf = coords.reshape(2, -1)
    rel = (cf[:, :, None] - cf[:, None, :]).transpose(1, 2, 0)
    rel = rel.at[:, :, 0].add(Wh - 1)
    rel = rel.at[:, :, 1].add(Ww - 1)
    rel = rel.at[:, :, 0].multiply(2 * Ww - 1)
    idx = rel.sum(-1)
    bias = params["rel_pos_table"][idx.reshape(-1)].reshape(N, N, num_heads).transpose(2, 0, 1)

    attn = attn + bias[None]
    attn = jax.nn.softmax(attn, axis=-1)
    x = jnp.einsum("bhnm,bhmd->bhnd", attn, v)
    x = x.transpose(0, 2, 1, 3).reshape(B_, N, C)
    return x @ params["wp"] + params["bp"]


if __name__ == "__main__":
    # Window 4x4 -> N=16 tokens, dim=32 channels, 4 heads.
    # B_ = num_windows * batch = 8 windows * batch 2 = 16 rows of windows.
    dim = 32
    num_heads = 4
    window_size = (4, 4)
    N = window_size[0] * window_size[1]
    B_ = 16

    key = jax.random.PRNGKey(0)
    ks = jax.random.split(key, 12)

    params = {
        "wk": 0.1 * jax.random.normal(ks[0], (dim, dim), jnp.float32),
        "bk": 0.1 * jax.random.normal(ks[1], (dim,), jnp.float32),
        "wq": 0.1 * jax.random.normal(ks[2], (dim, dim), jnp.float32),
        "bq": 0.1 * jax.random.normal(ks[3], (dim,), jnp.float32),
        "wv": 0.1 * jax.random.normal(ks[4], (dim, dim), jnp.float32),
        "bv": 0.1 * jax.random.normal(ks[5], (dim,), jnp.float32),
        "wp": 0.1 * jax.random.normal(ks[6], (dim, dim), jnp.float32),
        "bp": 0.1 * jax.random.normal(ks[7], (dim,), jnp.float32),
        # trunc_normal(std=0.02) approximated with a plain normal * 0.02
        "rel_pos_table": 0.02 * jax.random.normal(
            ks[8], ((2 * window_size[0] - 1) * (2 * window_size[1] - 1), num_heads),
            jnp.float32),
    }

    local_features = jax.random.normal(ks[9], (B_, N, dim), jnp.float32)
    global_features = jax.random.normal(ks[10], (B_, N, dim), jnp.float32)

    out = gl_attention(local_features, global_features, params,
                       num_heads=num_heads, window_size=window_size)
    out = jax.block_until_ready(out)

    ref = _reference(local_features, global_features, params,
                     num_heads=num_heads, window_size=window_size)
    assert out.shape == (B_, N, dim)
    # Tolerance accounts for bf16 operands at the MXU boundaries (f32 accumulate).
    assert jnp.allclose(out, ref, atol=3e-2, rtol=3e-2), "mismatch vs JAX reference"

    print("KERNEL_OK")
</pallas_src>

<mosaic_0001>
module attributes {stable_mosaic.version = 11 : i64} {
  func.func @_gl_attention_kernel(%arg0: i32, %arg1: memref<128x32xf32, #tpu.memory_space<vmem>>, %arg2: memref<128x32xf32, #tpu.memory_space<vmem>>, %arg3: memref<32x64xbf16, #tpu.memory_space<vmem>>, %arg4: memref<1x64xf32, #tpu.memory_space<vmem>>, %arg5: memref<32x32xbf16, #tpu.memory_space<vmem>>, %arg6: memref<1x32xf32, #tpu.memory_space<vmem>>, %arg7: memref<32x32xbf16, #tpu.memory_space<vmem>>, %arg8: memref<1x32xf32, #tpu.memory_space<vmem>>, %arg9: memref<4x16x16xf32, #tpu.memory_space<vmem>>, %arg10: memref<128x32xf32, #tpu.memory_space<vmem>>, %arg11: memref<128x32xf32, #tpu.memory_space<vmem>>) attributes {dimension_semantics = [#tpu.dimension_semantics<parallel>], iteration_bounds = array<i64: 2>, scalar_prefetch = 0 : i64, scratch_operands = 1 : i64, tpu.core_type = #tpu.core_type<tc>, window_params = [{transform_indices = @transform_0, window_bounds = array<i64: 128, 32>}, {transform_indices = @transform_1, window_bounds = array<i64: 128, 32>}, {pipeline_mode = #tpu.pipeline_mode<synchronous>, transform_indices = @transform_2, window_bounds = array<i64: 32, 64>}, {pipeline_mode = #tpu.pipeline_mode<synchronous>, transform_indices = @transform_3, window_bounds = array<i64: 1, 64>}, {pipeline_mode = #tpu.pipeline_mode<synchronous>, transform_indices = @transform_4, window_bounds = array<i64: 32, 32>}, {pipeline_mode = #tpu.pipeline_mode<synchronous>, transform_indices = @transform_5, window_bounds = array<i64: 1, 32>}, {pipeline_mode = #tpu.pipeline_mode<synchronous>, transform_indices = @transform_6, window_bounds = array<i64: 32, 32>}, {pipeline_mode = #tpu.pipeline_mode<synchronous>, transform_indices = @transform_7, window_bounds = array<i64: 1, 32>}, {pipeline_mode = #tpu.pipeline_mode<synchronous>, transform_indices = @transform_8, window_bounds = array<i64: 4, 16, 16>}, {transform_indices = @transform_9, window_bounds = array<i64: 128, 32>}]} {
    %c0 = arith.constant 0 : index
    %c0_0 = arith.constant 0 : index
    %0 = vector.load %arg1[%c0, %c0_0] : memref<128x32xf32, #tpu.memory_space<vmem>>, vector<128x32xf32>
    %1 = arith.truncf %0 : vector<128x32xf32> to vector<128x32xbf16>
    %c0_1 = arith.constant 0 : index
    %c0_2 = arith.constant 0 : index
    %2 = vector.load %arg2[%c0_1, %c0_2] : memref<128x32xf32, #tpu.memory_space<vmem>>, vector<128x32xf32>
    %3 = arith.truncf %2 : vector<128x32xf32> to vector<128x32xbf16>
    %c0_3 = arith.constant 0 : index
    %c0_4 = arith.constant 0 : index
    %4 = vector.load %arg3[%c0_3, %c0_4] : memref<32x64xbf16, #tpu.memory_space<vmem>>, vector<32x64xbf16>
    %cst = arith.constant dense<0.000000e+00> : vector<128x64xf32>
    %5 = tpu.matmul %1, %4, %cst {dimension_numbers = #tpu.dot_dimension_numbers<[1], [0], [0], [1], [0, 0, 1, 1], [], []>} : vector<128x32xbf16>, vector<32x64xbf16>, vector<128x64xf32> -> vector<128x64xf32>
    %c0_5 = arith.constant 0 : index
    %c0_6 = arith.constant 0 : index
    %6 = vector.load %arg4[%c0_5, %c0_6] : memref<1x64xf32, #tpu.memory_space<vmem>>, vector<1x64xf32>
    %7 = vector.shape_cast %6 : vector<1x64xf32> to vector<64xf32>
    %8 = vector.shape_cast %7 : vector<64xf32> to vector<1x64xf32>
    %9 = vector.broadcast %8 : vector<1x64xf32> to vector<128x64xf32>
    %10 = arith.addf %5, %9 : vector<128x64xf32>
    %11 = vector.extract_strided_slice %10 {offsets = [0, 0], sizes = [128, 32], strides = [1, 1]} : vector<128x64xf32> to vector<128x32xf32>
    %12 = arith.truncf %11 : vector<128x32xf32> to vector<128x32xbf16>
    %13 = vector.shape_cast %12 : vector<128x32xbf16> to vector<8x16x32xbf16>
    %14 = vector.extract_strided_slice %10 {offsets = [0, 32], sizes = [128, 32], strides = [1, 1]} : vector<128x64xf32> to vector<128x32xf32>
    %15 = arith.truncf %14 : vector<128x32xf32> to vector<128x32xbf16>
    %16 = vector.shape_cast %15 : vector<128x32xbf16> to vector<8x16x32xbf16>
    %c0_7 = arith.constant 0 : index
    %c0_8 = arith.constant 0 : index
    %17 = vector.load %arg5[%c0_7, %c0_8] : memref<32x32xbf16, #tpu.memory_space<vmem>>, vector<32x32xbf16>
    %cst_9 = arith.constant dense<0.000000e+00> : vector<128x32xf32>
    %18 = tpu.matmul %3, %17, %cst_9 {dimension_numbers = #tpu.dot_dimension_numbers<[1], [0], [0], [1], [0, 0, 1, 1], [], []>} : vector<128x32xbf16>, vector<32x32xbf16>, vector<128x32xf32> -> vector<128x32xf32>
    %c0_10 = arith.constant 0 : index
    %c0_11 = arith.constant 0 : index
    %19 = vector.load %arg6[%c0_10, %c0_11] : memref<1x32xf32, #tpu.memory_space<vmem>>, vector<1x32xf32>
    %20 = vector.shape_cast %19 : vector<1x32xf32> to vector<32xf32>
    %21 = vector.shape_cast %20 : vector<32xf32> to vector<1x32xf32>
    %22 = vector.broadcast %21 : vector<1x32xf32> to vector<128x32xf32>
    %23 = arith.addf %18, %22 : vector<128x32xf32>
    %cst_12 = arith.constant 0.353553385 : f32
    %24 = vector.broadcast %cst_12 : f32 to vector<128x32xf32>
    %25 = arith.mulf %23, %24 : vector<128x32xf32>
    %26 = arith.truncf %25 : vector<128x32xf32> to vector<128x32xbf16>
    %27 = vector.shape_cast %26 : vector<128x32xbf16> to vector<8x16x32xbf16>
    %28 = vector.extract_strided_slice %27 {offsets = [0, 0, 0], sizes = [8, 16, 8], strides = [1, 1, 1]} : vector<8x16x32xbf16> to vector<8x16x8xbf16>
    %29 = vector.extract_strided_slice %13 {offsets = [0, 0, 0], sizes = [8, 16, 8], strides = [1, 1, 1]} : vector<8x16x32xbf16> to vector<8x16x8xbf16>
    %30 = vector.extract_strided_slice %16 {offsets = [0, 0, 0], sizes = [8, 16, 8], strides = [1, 1, 1]} : vector<8x16x32xbf16> to vector<8x16x8xbf16>
    "tpu.trace_start"() <{level = 10 : i32, message = "bnd,bmd->bnm"}> : () -> ()
    %cst_13 = arith.constant dense<0.000000e+00> : vector<8x16x16xf32>
    %31 = tpu.matmul %28, %29, %cst_13 {dimension_numbers = #tpu.dot_dimension_numbers<[2], [2], [1], [1], [0, 0, 0, 1, 1, 1], [0], [0]>} : vector<8x16x8xbf16>, vector<8x16x8xbf16>, vector<8x16x16xf32> -> vector<8x16x16xf32>
    "tpu.trace_stop"() : () -> ()
    %c0_14 = arith.constant 0 : index
    %c0_15 = arith.constant 0 : index
    %c0_16 = arith.constant 0 : index
    %32 = vector.load %arg9[%c0_14, %c0_15, %c0_16] : memref<4x16x16xf32, #tpu.memory_space<vmem>>, vector<1x16x16xf32>
    %33 = vector.shape_cast %32 : vector<1x16x16xf32> to vector<16x16xf32>
    %34 = vector.shape_cast %33 : vector<16x16xf32> to vector<1x16x16xf32>
    %35 = vector.broadcast %34 : vector<1x16x16xf32> to vector<8x16x16xf32>
    %36 = arith.addf %31, %35 : vector<8x16x16xf32>
    %cst_17 = arith.constant dense<0xFF800000> : vector<8x16xf32>
    %37 = vector.multi_reduction <maximumf>, %36, %cst_17 [2] : vector<8x16x16xf32> to vector<8x16xf32>
    %38 = vector.shape_cast %37 : vector<8x16xf32> to vector<8x16x1xf32>
    %39 = vector.broadcast %38 : vector<8x16x1xf32> to vector<8x16x16xf32>
    %40 = arith.subf %36, %39 : vector<8x16x16xf32>
    %41 = math.exp %40 : vector<8x16x16xf32>
    %cst_18 = arith.constant dense<0.000000e+00> : vector<8x16xf32>
    %42 = vector.multi_reduction <add>, %41, %cst_18 [2] : vector<8x16x16xf32> to vector<8x16xf32>
    %43 = vector.shape_cast %42 : vector<8x16xf32> to vector<8x16x1xf32>
    %44 = tpu.reciprocal %43 {approx = true} : vector<8x16x1xf32> -> vector<8x16x1xf32>
    %45 = vector.broadcast %44 : vector<8x16x1xf32> to vector<8x16x16xf32>
    %46 = arith.mulf %41, %45 : vector<8x16x16xf32>
    %47 = arith.truncf %46 : vector<8x16x16xf32> to vector<8x16x16xbf16>
    "tpu.trace_start"() <{level = 10 : i32, message = "bnm,bmd->bnd"}> : () -> ()
    %cst_19 = arith.constant dense<0.000000e+00> : vector<8x16x8xf32>
    %48 = tpu.matmul %47, %30, %cst_19 {dimension_numbers = #tpu.dot_dimension_numbers<[2], [1], [1], [2], [0, 0, 0, 1, 1, 2], [0], [0]>} : vector<8x16x16xbf16>, vector<8x16x8xbf16>, vector<8x16x8xf32> -> vector<8x16x8xf32>
    "tpu.trace_stop"() : () -> ()
    %49 = vector.shape_cast %48 : vector<8x16x8xf32> to vector<128x8xf32>
    %c0_20 = arith.constant 0 : index
    %c0_21 = arith.constant 0 : index
    %50 = vector.load %arg11[%c0_20, %c0_21] : memref<128x32xf32, #tpu.memory_space<vmem>>, vector<128x8xf32>
    tpu.vector_store %arg11[%c0_20, %c0_21], %49 {strides = array<i32>} : memref<128x32xf32, #tpu.memory_space<vmem>>, vector<128x8xf32>,
    %51 = vector.extract_strided_slice %27 {offsets = [0, 0, 8], sizes = [8, 16, 8], strides = [1, 1, 1]} : vector<8x16x32xbf16> to vector<8x16x8xbf16>
    %52 = vector.extract_strided_slice %13 {offsets = [0, 0, 8], sizes = [8, 16, 8], strides = [1, 1, 1]} : vector<8x16x32xbf16> to vector<8x16x8xbf16>
    %53 = vector.extract_strided_slice %16 {offsets = [0, 0, 8], sizes = [8, 16, 8], strides = [1, 1, 1]} : vector<8x16x32xbf16> to vector<8x16x8xbf16>
    "tpu.trace_start"() <{level = 10 : i32, message = "bnd,bmd->bnm"}> : () -> ()
    %cst_22 = arith.constant dense<0.000000e+00> : vector<8x16x16xf32>
    %54 = tpu.matmul %51, %52, %cst_22 {dimension_numbers = #tpu.dot_dimension_numbers<[2], [2], [1], [1], [0, 0, 0, 1, 1, 1], [0], [0]>} : vector<8x16x8xbf16>, vector<8x16x8xbf16>, vector<8x16x16xf32> -> vector<8x16x16xf32>
    "tpu.trace_stop"() : () -> ()
    %c1 = arith.constant 1 : index
    %c0_23 = arith.constant 0 : index
    %c0_24 = arith.constant 0 : index
    %55 = vector.load %arg9[%c1, %c0_23, %c0_24] : memref<4x16x16xf32, #tpu.memory_space<vmem>>, vector<1x16x16xf32>
    %56 = vector.shape_cast %55 : vector<1x16x16xf32> to vector<16x16xf32>
    %57 = vector.shape_cast %56 : vector<16x16xf32> to vector<1x16x16xf32>
    %58 = vector.broadcast %57 : vector<1x16x16xf32> to vector<8x16x16xf32>
    %59 = arith.addf %54, %58 : vector<8x16x16xf32>
    %cst_25 = arith.constant dense<0xFF800000> : vector<8x16xf32>
    %60 = vector.multi_reduction <maximumf>, %59, %cst_25 [2] : vector<8x16x16xf32> to vector<8x16xf32>
    %61 = vector.shape_cast %60 : vector<8x16xf32> to vector<8x16x1xf32>
    %62 = vector.broadcast %61 : vector<8x16x1xf32> to vector<8x16x16xf32>
    %63 = arith.subf %59, %62 : vector<8x16x16xf32>
    %64 = math.exp %63 : vector<8x16x16xf32>
    %cst_26 = arith.constant dense<0.000000e+00> : vector<8x16xf32>
    %65 = vector.multi_reduction <add>, %64, %cst_26 [2] : vector<8x16x16xf32> to vector<8x16xf32>
    %66 = vector.shape_cast %65 : vector<8x16xf32> to vector<8x16x1xf32>
    %67 = tpu.reciprocal %66 {approx = true} : vector<8x16x1xf32> -> vector<8x16x1xf32>
    %68 = vector.broadcast %67 : vector<8x16x1xf32> to vector<8x16x16xf32>
    %69 = arith.mulf %64, %68 : vector<8x16x16xf32>
    %70 = arith.truncf %69 : vector<8x16x16xf32> to vector<8x16x16xbf16>
    "tpu.trace_start"() <{level = 10 : i32, message = "bnm,bmd->bnd"}> : () -> ()
    %cst_27 = arith.constant dense<0.000000e+00> : vector<8x16x8xf32>
    %71 = tpu.matmul %70, %53, %cst_27 {dimension_numbers = #tpu.dot_dimension_numbers<[2], [1], [1], [2], [0, 0, 0, 1, 1, 2], [0], [0]>} : vector<8x16x16xbf16>, vector<8x16x8xbf16>, vector<8x16x8xf32> -> vector<8x16x8xf32>
    "tpu.trace_stop"() : () -> ()
    %72 = vector.shape_cast %71 : vector<8x16x8xf32> to vector<128x8xf32>
    %c0_28 = arith.constant 0 : index
    %c8 = arith.constant 8 : index
    %73 = vector.load %arg11[%c0_28, %c8] : memref<128x32xf32, #tpu.memory_space<vmem>>, vector<128x8xf32>
    tpu.vector_store %arg11[%c0_28, %c8], %72 {strides = array<i32>} : memref<128x32xf32, #tpu.memory_space<vmem>>, vector<128x8xf32>,
    %74 = vector.extract_strided_slice %27 {offsets = [0, 0, 16], sizes = [8, 16, 8], strides = [1, 1, 1]} : vector<8x16x32xbf16> to vector<8x16x8xbf16>
    %75 = vector.extract_strided_slice %13 {offsets = [0, 0, 16], sizes = [8, 16, 8], strides = [1, 1, 1]} : vector<8x16x32xbf16> to vector<8x16x8xbf16>
    %76 = vector.extract_strided_slice %16 {offsets = [0, 0, 16], sizes = [8, 16, 8], strides = [1, 1, 1]} : vector<8x16x32xbf16> to vector<8x16x8xbf16>
    "tpu.trace_start"() <{level = 10 : i32, message = "bnd,bmd->bnm"}> : () -> ()
    %cst_29 = arith.constant dense<0.000000e+00> : vector<8x16x16xf32>
    %77 = tpu.matmul %74, %75, %cst_29 {dimension_numbers = #tpu.dot_dimension_numbers<[2], [2], [1], [1], [0, 0, 0, 1, 1, 1], [0], [0]>} : vector<8x16x8xbf16>, vector<8x16x8xbf16>, vector<8x16x16xf32> -> vector<8x16x16xf32>
    "tpu.trace_stop"() : () -> ()
    %c2 = arith.constant 2 : index
    %c0_30 = arith.constant 0 : index
    %c0_31 = arith.constant 0 : index
    %78 = vector.load %arg9[%c2, %c0_30, %c0_31] : memref<4x16x16xf32, #tpu.memory_space<vmem>>, vector<1x16x16xf32>
    %79 = vector.shape_cast %78 : vector<1x16x16xf32> to vector<16x16xf32>
    %80 = vector.shape_cast %79 : vector<16x16xf32> to vector<1x16x16xf32>
    %81 = vector.broadcast %80 : vector<1x16x16xf32> to vector<8x16x16xf32>
    %82 = arith.addf %77, %81 : vector<8x16x16xf32>
    %cst_32 = arith.constant dense<0xFF800000> : vector<8x16xf32>
    %83 = vector.multi_reduction <maximumf>, %82, %cst_32 [2] : vector<8x16x16xf32> to vector<8x16xf32>
    %84 = vector.shape_cast %83 : vector<8x16xf32> to vector<8x16x1xf32>
    %85 = vector.broadcast %84 : vector<8x16x1xf32> to vector<8x16x16xf32>
    %86 = arith.subf %82, %85 : vector<8x16x16xf32>
    %87 = math.exp %86 : vector<8x16x16xf32>
    %cst_33 = arith.constant dense<0.000000e+00> : vector<8x16xf32>
    %88 = vector.multi_reduction <add>, %87, %cst_33 [2] : vector<8x16x16xf32> to vector<8x16xf32>
    %89 = vector.shape_cast %88 : vector<8x16xf32> to vector<8x16x1xf32>
    %90 = tpu.reciprocal %89 {approx = true} : vector<8x16x1xf32> -> vector<8x16x1xf32>
    %91 = vector.broadcast %90 : vector<8x16x1xf32> to vector<8x16x16xf32>
    %92 = arith.mulf %87, %91 : vector<8x16x16xf32>
    %93 = arith.truncf %92 : vector<8x16x16xf32> to vector<8x16x16xbf16>
    "tpu.trace_start"() <{level = 10 : i32, message = "bnm,bmd->bnd"}> : () -> ()
    %cst_34 = arith.constant dense<0.000000e+00> : vector<8x16x8xf32>
    %94 = tpu.matmul %93, %76, %cst_34 {dimension_numbers = #tpu.dot_dimension_numbers<[2], [1], [1], [2], [0, 0, 0, 1, 1, 2], [0], [0]>} : vector<8x16x16xbf16>, vector<8x16x8xbf16>, vector<8x16x8xf32> -> vector<8x16x8xf32>
    "tpu.trace_stop"() : () -> ()
    %95 = vector.shape_cast %94 : vector<8x16x8xf32> to vector<128x8xf32>
    %c0_35 = arith.constant 0 : index
    %c16 = arith.constant 16 : index
    %96 = vector.load %arg11[%c0_35, %c16] : memref<128x32xf32, #tpu.memory_space<vmem>>, vector<128x8xf32>
    tpu.vector_store %arg11[%c0_35, %c16], %95 {strides = array<i32>} : memref<128x32xf32, #tpu.memory_space<vmem>>, vector<128x8xf32>,
    %97 = vector.extract_strided_slice %27 {offsets = [0, 0, 24], sizes = [8, 16, 8], strides = [1, 1, 1]} : vector<8x16x32xbf16> to vector<8x16x8xbf16>
    %98 = vector.extract_strided_slice %13 {offsets = [0, 0, 24], sizes = [8, 16, 8], strides = [1, 1, 1]} : vector<8x16x32xbf16> to vector<8x16x8xbf16>
    %99 = vector.extract_strided_slice %16 {offsets = [0, 0, 24], sizes = [8, 16, 8], strides = [1, 1, 1]} : vector<8x16x32xbf16> to vector<8x16x8xbf16>
    "tpu.trace_start"() <{level = 10 : i32, message = "bnd,bmd->bnm"}> : () -> ()
    %cst_36 = arith.constant dense<0.000000e+00> : vector<8x16x16xf32>
    %100 = tpu.matmul %97, %98, %cst_36 {dimension_numbers = #tpu.dot_dimension_numbers<[2], [2], [1], [1], [0, 0, 0, 1, 1, 1], [0], [0]>} : vector<8x16x8xbf16>, vector<8x16x8xbf16>, vector<8x16x16xf32> -> vector<8x16x16xf32>
    "tpu.trace_stop"() : () -> ()
    %c3 = arith.constant 3 : index
    %c0_37 = arith.constant 0 : index
    %c0_38 = arith.constant 0 : index
    %101 = vector.load %arg9[%c3, %c0_37, %c0_38] : memref<4x16x16xf32, #tpu.memory_space<vmem>>, vector<1x16x16xf32>
    %102 = vector.shape_cast %101 : vector<1x16x16xf32> to vector<16x16xf32>
    %103 = vector.shape_cast %102 : vector<16x16xf32> to vector<1x16x16xf32>
    %104 = vector.broadcast %103 : vector<1x16x16xf32> to vector<8x16x16xf32>
    %105 = arith.addf %100, %104 : vector<8x16x16xf32>
    %cst_39 = arith.constant dense<0xFF800000> : vector<8x16xf32>
    %106 = vector.multi_reduction <maximumf>, %105, %cst_39 [2] : vector<8x16x16xf32> to vector<8x16xf32>
    %107 = vector.shape_cast %106 : vector<8x16xf32> to vector<8x16x1xf32>
    %108 = vector.broadcast %107 : vector<8x16x1xf32> to vector<8x16x16xf32>
    %109 = arith.subf %105, %108 : vector<8x16x16xf32>
    %110 = math.exp %109 : vector<8x16x16xf32>
    %cst_40 = arith.constant dense<0.000000e+00> : vector<8x16xf32>
    %111 = vector.multi_reduction <add>, %110, %cst_40 [2] : vector<8x16x16xf32> to vector<8x16xf32>
    %112 = vector.shape_cast %111 : vector<8x16xf32> to vector<8x16x1xf32>
    %113 = tpu.reciprocal %112 {approx = true} : vector<8x16x1xf32> -> vector<8x16x1xf32>
    %114 = vector.broadcast %113 : vector<8x16x1xf32> to vector<8x16x16xf32>
    %115 = arith.mulf %110, %114 : vector<8x16x16xf32>
    %116 = arith.truncf %115 : vector<8x16x16xf32> to vector<8x16x16xbf16>
    "tpu.trace_start"() <{level = 10 : i32, message = "bnm,bmd->bnd"}> : () -> ()
    %cst_41 = arith.constant dense<0.000000e+00> : vector<8x16x8xf32>
    %117 = tpu.matmul %116, %99, %cst_41 {dimension_numbers = #tpu.dot_dimension_numbers<[2], [1], [1], [2], [0, 0, 0, 1, 1, 2], [0], [0]>} : vector<8x16x16xbf16>, vector<8x16x8xbf16>, vector<8x16x8xf32> -> vector<8x16x8xf32>
    "tpu.trace_stop"() : () -> ()
    %118 = vector.shape_cast %117 : vector<8x16x8xf32> to vector<128x8xf32>
    %c0_42 = arith.constant 0 : index
    %c24 = arith.constant 24 : index
    %119 = vector.load %arg11[%c0_42, %c24] : memref<128x32xf32, #tpu.memory_space<vmem>>, vector<128x8xf32>
    tpu.vector_store %arg11[%c0_42, %c24], %118 {strides = array<i32>} : memref<128x32xf32, #tpu.memory_space<vmem>>, vector<128x8xf32>,
    %c0_43 = arith.constant 0 : index
    %c0_44 = arith.constant 0 : index
    %120 = vector.load %arg11[%c0_43, %c0_44] : memref<128x32xf32, #tpu.memory_space<vmem>>, vector<128x32xf32>
    %121 = arith.truncf %120 : vector<128x32xf32> to vector<128x32xbf16>
    %c0_45 = arith.constant 0 : index
    %c0_46 = arith.constant 0 : index
    %122 = vector.load %arg7[%c0_45, %c0_46] : memref<32x32xbf16, #tpu.memory_space<vmem>>, vector<32x32xbf16>
    %cst_47 = arith.constant dense<0.000000e+00> : vector<128x32xf32>
    %123 = tpu.matmul %121, %122, %cst_47 {dimension_numbers = #tpu.dot_dimension_numbers<[1], [0], [0], [1], [0, 0, 1, 1], [], []>} : vector<128x32xbf16>, vector<32x32xbf16>, vector<128x32xf32> -> vector<128x32xf32>
    %c0_48 = arith.constant 0 : index
    %c0_49 = arith.constant 0 : index
    %124 = vector.load %arg8[%c0_48, %c0_49] : memref<1x32xf32, #tpu.memory_space<vmem>>, vector<1x32xf32>
    %125 = vector.shape_cast %124 : vector<1x32xf32> to vector<32xf32>
    %126 = vector.shape_cast %125 : vector<32xf32> to vector<1x32xf32>
    %127 = vector.broadcast %126 : vector<1x32xf32> to vector<128x32xf32>
    %128 = arith.addf %123, %127 : vector<128x32xf32>
    %c0_50 = arith.constant 0 : index
    %c0_51 = arith.constant 0 : index
    %129 = vector.load %arg10[%c0_50, %c0_51] : memref<128x32xf32, #tpu.memory_space<vmem>>, vector<128x32xf32>
    tpu.vector_store %arg10[%c0_50, %c0_51], %128 {strides = array<i32>} : memref<128x32xf32, #tpu.memory_space<vmem>>, vector<128x32xf32>,
    return
  }
  func.func @transform_0(%arg0: i32) -> (i32, i32) {
    %c0_i32 = arith.constant 0 : i32
    %c0_i32_0 = arith.constant 0 : i32
    return %arg0, %c0_i32 : i32, i32
  }
  func.func @transform_1(%arg0: i32) -> (i32, i32) {
    %c0_i32 = arith.constant 0 : i32
    %c0_i32_0 = arith.constant 0 : i32
    return %arg0, %c0_i32 : i32, i32
  }
  func.func @transform_2(%arg0: i32) -> (i32, i32) {
    %c0_i32 = arith.constant 0 : i32
    %c0_i32_0 = arith.constant 0 : i32
    %c0_i32_1 = arith.constant 0 : i32
    return %c0_i32, %c0_i32_0 : i32, i32
  }
  func.func @transform_3(%arg0: i32) -> (i32, i32) {
    %c0_i32 = arith.constant 0 : i32
    %c0_i32_0 = arith.constant 0 : i32
    %c0_i32_1 = arith.constant 0 : i32
    return %c0_i32, %c0_i32_0 : i32, i32
  }
  func.func @transform_4(%arg0: i32) -> (i32, i32) {
    %c0_i32 = arith.constant 0 : i32
    %c0_i32_0 = arith.constant 0 : i32
    %c0_i32_1 = arith.constant 0 : i32
    return %c0_i32, %c0_i32_0 : i32, i32
  }
  func.func @transform_5(%arg0: i32) -> (i32, i32) {
    %c0_i32 = arith.constant 0 : i32
    %c0_i32_0 = arith.constant 0 : i32
    %c0_i32_1 = arith.constant 0 : i32
    return %c0_i32, %c0_i32_0 : i32, i32
  }
  func.func @transform_6(%arg0: i32) -> (i32, i32) {
    %c0_i32 = arith.constant 0 : i32
    %c0_i32_0 = arith.constant 0 : i32
    %c0_i32_1 = arith.constant 0 : i32
    return %c0_i32, %c0_i32_0 : i32, i32
  }
  func.func @transform_7(%arg0: i32) -> (i32, i32) {
    %c0_i32 = arith.constant 0 : i32
    %c0_i32_0 = arith.constant 0 : i32
    %c0_i32_1 = arith.constant 0 : i32
    return %c0_i32, %c0_i32_0 : i32, i32
  }
  func.func @transform_8(%arg0: i32) -> (i32, i32, i32) {
    %c0_i32 = arith.constant 0 : i32
    %c0_i32_0 = arith.constant 0 : i32
    %c0_i32_1 = arith.constant 0 : i32
    %c0_i32_2 = arith.constant 0 : i32
    return %c0_i32, %c0_i32_0, %c0_i32_1 : i32, i32, i32
  }
  func.func @transform_9(%arg0: i32) -> (i32, i32) {
    %c0_i32 = arith.constant 0 : i32
    %c0_i32_0 = arith.constant 0 : i32
    return %arg0, %c0_i32 : i32, i32
  }
}

</mosaic_0001>

<bundles_post_ra>
// kernel: tpu_custom_call.1
= control target key start
LH: loop header
LB: loop body
LE: loop exit
PB: predicated region body
PF: predicated region fallthrough
CT: control target
= control target key end

     0   :  { %s6182_s30 = smov 0   ;;  %s7854_s0 = inlined_call_operand.vmem [shape: f32[256,32], index: 0, kind: input, shape index: {}]   ;;  %s7855_s1 = inlined_call_operand.vmem [shape: f32[256,32], index: 1, kind: input, shape index: {}]   ;;  %s7856_s2 = inlined_call_operand.vmem [shape: bf16[32,64], index: 2, kind: input, shape index: {}]   ;;  %s7857_s3 = inlined_call_operand.vmem [shape: f32[1,64], index: 3, kind: input, shape index: {}]   ;;  %s7858_s4 = inlined_call_operand.vmem [shape: bf16[32,32], index: 4, kind: input, shape index: {}]   ;;  %s7859_s5 = inlined_call_operand.vmem [shape: f32[1,32], index: 5, kind: input, shape index: {}]   ;;  %s7860_s6 = inlined_call_operand.vmem [shape: bf16[32,32], index: 6, kind: input, shape index: {}]   ;;  %s7861_s7 = inlined_call_operand.vmem [shape: f32[1,32], index: 7, kind: input, shape index: {}]   ;;  %s7862_s8 = inlined_call_operand.vmem [shape: f32[4,16,16], index: 8, kind: input, shape index: {}]   ;;  %s7863_s9 = inlined_call_operand.vmem [shape: f32[256,32], index: 9, kind: output, shape index: {}]  }
   0x1 LB: > { %s5108_s10 = sadd.s32 4294967295, %s6118_s30   ;;  %p5112_p0 = scmp.ge.s32.totalorder %s6118_s30, 1  ;;  %s6118_s30 = sphi %s6182_s30, %s19_s30  }
   0x2   : > { %p299_p1 = scmp.lt.s32.totalorder %s6118_s30, 3 }
   0x4   : > { %p300_p2 = pnand %p5112_p0, %p299_p1 }
   0x6   : > { %303 = sbr.rel (%p300_p2) target bundleno = 3185 (0xc71), region = 56 }
   0xb   : > { %v5850_v0 = vld [vmem:[%s7856_s2 + $0x8] sm:$0xff]   ;;  %s5113_s13 = sshll.u32 %s5108_s10, 4  ;;  %v5851_v1 = vld [vmem:[%s7856_s2] sm:$0xff]   ;;  %vm430_vm0 = vcmask 261120   ;;  %v7864_v52 = vmov 0.0   ;;  %vm6121_vm1 = vmmov 0  }
   0xc   : > { %p341_p3 = scmp.lt.s32.totalorder %s5113_s13, 31  ;;  %5382 = vmatprep.subr.bf16.mxu0 %v5850_v0  ;;  %5826 = vmatprep.subr.bf16.mxu1 %v5850_v0  ;;  %v5852_v2 = vld [vmem:[%s7858_s4 + $0x8] sm:$0xff]   ;;  %v5853_v17 = vld [vmem:[%s7858_s4] sm:$0xff]   ;;  %vm730_vm2 = vcmask 64512   ;;  %vm1107_vm3 = vcmask 130048   ;;  %s6122_s15 = smov 96  }
   0xd   : > { %5383 = vmatpush3.bf16.msra.mxu0 %v5850_v0  ;;  %5828 = vmatpush3.bf16.msra.mxu1 %v5850_v0  ;;  %v6273_v55 = vld [vmem:[%s7857_s3] ss:$0 sm:$0xff]  ;;  %s6123_s16 = smov 120   ;;  %s6124_s22 = smov 88   ;;  %vm2735_vm4 = vcmask 130112   ;;  %vm3787_vm5 = vcmask 195712  }
   0xe   : > { %s7872_s13 = smov (!%p341_p3, %s5113_s13), 31  ;;  %5384 = vmatprep.subr.bf16.mxu0 %v5851_v1  ;;  %5827 = vmatprep.subr.bf16.mxu1 %v5851_v1  ;;  %s6125_s23 = smov 112   ;;  %vm4839_vm6 = vcmask 261312  }
   0xf   : > { %s6199_s18 = sshll.u32 %s7872_s13, 3  ;;  %s6126_s28 = smov 80  }
  0x10   : > { %s6205_s21 = scalar_lea.vmem %s7854_s0, %s6199_s18  ;;  %s6225_s26 = scalar_lea.vmem %s7855_s1, %s6199_s18 }
  0x11   : > { %5385 = vmatpush3.bf16.msra.mxu0 %v5851_v1  ;;  %5829 = vmatpush3.bf16.msra.mxu1 %v5851_v1  ;;  %v359_v3 = vld [vmem:[%s6205_s21] sm:$0xff]  ;;  %v360_v4 = vld [vmem:[%s6205_s21 + $0x8] sm:$0xff]  ;;  %v361_v8 = vld [vmem:[%s6205_s21 + $0x10] sm:$0xff]  ;;  %s6127_s29 = smov 104   ;;  %s6128_s14 = smov 72  }
  0x12   : > { %v367_v5 = vld [vmem:[%s6205_s21 + $0x40] sm:$0xff]  ;;  %v375_v6 = vpack.c.bf16 %v360_v4, %v359_v3  ;;  %v368_v7 = vld [vmem:[%s6205_s21 + $0x48] sm:$0xff]  ;;  %v362_v9 = vld [vmem:[%s6205_s21 + $0x18] sm:$0xff]  ;;  %5402 = vmatprep.subr.bf16.mxu1 %v5852_v2  ;;  %5422 = vmatprep.subr.bf16.mxu0 %v7864_v52  ;;  %s6131_s20 = smov 24   ;;  %s7817_s27 = scalar_lea.vmem %s7863_s9, %s6199_s18 }
  0x13   : > { %v379_v10 = vpack.c.bf16 %v368_v7, %v367_v5  ;;  %v376_v11 = vpack.c.bf16 %v362_v9, %v361_v8  ;;  %v369_v12 = vld [vmem:[%s6205_s21 + $0x50] sm:$0xff]  ;;  %v370_v13 = vld [vmem:[%s6205_s21 + $0x58] sm:$0xff]  ;;  %v371_v14 = vld [vmem:[%s6205_s21 + $0x60] sm:$0xff] }
  0x14   : > { %5386 = vmatprep.mubr.msk.bf16.mxu0 %vm430_vm0, %v375_v6  ;;  %v380_v15 = vpack.c.bf16 %v370_v13, %v369_v12  ;;  %v372_v16 = vld [vmem:[%s6205_s21 + $0x68] sm:$0xff]  ;;  %v363_v19 = vld [vmem:[%s6205_s21 + $0x20] sm:$0xff]  ;;  %v373_v20 = vld [vmem:[%s6205_s21 + $0x70] sm:$0xff] }
  0x15   : > { %5394 = vmatprep.mubr.msk.bf16.mxu1 %vm430_vm0, %v379_v10  ;;  %5387 = vmatmul.mubr.msk.bf16.vlgmr.msra.gmra.mxu0 %vm430_vm0, %v376_v11  ;;  %v381_v18 = vpack.c.bf16 %v372_v16, %v371_v14  ;;  %v364_v21 = vld [vmem:[%s6205_s21 + $0x28] sm:$0xff]  ;;  %v374_v22 = vld [vmem:[%s6205_s21 + $0x78] sm:$0xff]  ;;  %v365_v24 = vld [vmem:[%s6205_s21 + $0x30] sm:$0xff] }
  0x16   : > { %5395 = vmatmul.mubr.msk.bf16.vlgmr.msra.gmra.mxu1 %vm430_vm0, %v380_v15  ;;  %v377_v23 = vpack.c.bf16 %v364_v21, %v363_v19  ;;  %v366_v25 = vld [vmem:[%s6205_s21 + $0x38] sm:$0xff]  ;;  %v383_v26 = vld [vmem:[%s6225_s26] sm:$0xff]  ;;  %v384_v27 = vld [vmem:[%s6225_s26 + $0x8] sm:$0xff]  ;;  %v382_v29 = vpack.c.bf16 %v374_v22, %v373_v20 }
  0x17   : > { %5398 = vmatprep.mubr.msk.bf16.mxu1 %vm430_vm0, %v381_v18  ;;  %5403 = vmatpush3.bf16.msra.mxu1 %v5852_v2  ;;  %v378_v28 = vpack.c.bf16 %v366_v25, %v365_v24  ;;  %v399_v30 = vpack.c.bf16 %v384_v27, %v383_v26  ;;  %v385_v31 = vld [vmem:[%s6225_s26 + $0x10] sm:$0xff]  ;;  %v386_v32 = vld [vmem:[%s6225_s26 + $0x18] sm:$0xff]  ;;  %v387_v33 = vld [vmem:[%s6225_s26 + $0x20] sm:$0xff] }
  0x18   : > { %5404 = vmatprep.subr.bf16.mxu1 %v5853_v17  ;;  %5390 = vmatprep.mubr.msk.bf16.mxu0 %vm430_vm0, %v377_v23  ;;  %v388_v34 = vld [vmem:[%s6225_s26 + $0x28] sm:$0xff]  ;;  %v400_v35 = vpack.c.bf16 %v386_v32, %v385_v31  ;;  %v389_v37 = vld [vmem:[%s6225_s26 + $0x30] sm:$0xff]  ;;  %v390_v38 = vld [vmem:[%s6225_s26 + $0x38] sm:$0xff] }
  0x19   : > { %v401_v36 = vpack.c.bf16 %v388_v34, %v387_v33  ;;  %v391_v39 = vld [vmem:[%s6225_s26 + $0x40] sm:$0xff]  ;;  %v392_v40 = vld [vmem:[%s6225_s26 + $0x48] sm:$0xff]  ;;  %v402_v41 = vpack.c.bf16 %v390_v38, %v389_v37  ;;  %v393_v43 = vld [vmem:[%s6225_s26 + $0x50] sm:$0xff] }
  0x1a   : > { %v403_v42 = vpack.c.bf16 %v392_v40, %v391_v39  ;;  %v394_v44 = vld [vmem:[%s6225_s26 + $0x58] sm:$0xff]  ;;  %v395_v45 = vld [vmem:[%s6225_s26 + $0x60] sm:$0xff]  ;;  %v396_v46 = vld [vmem:[%s6225_s26 + $0x68] sm:$0xff] }
  0x1b   : > { %5405 = vmatpush3.bf16.msra.mxu1 %v5853_v17  ;;  %v404_v47 = vpack.c.bf16 %v394_v44, %v393_v43  ;;  %v405_v48 = vpack.c.bf16 %v396_v46, %v395_v45  ;;  %v397_v49 = vld [vmem:[%s6225_s26 + $0x70] sm:$0xff]  ;;  %v398_v50 = vld [vmem:[%s6225_s26 + $0x78] sm:$0xff]  ;;  %v6296_v14 = vld [vmem:[%s7859_s5] ss:$0 sm:$0xff] }
  0x1c   : > { %v406_v51 = vpack.c.bf16 %v398_v50, %v397_v49  ;;  %5428 = vmatprep.subr.bf16.mxu1 %v7864_v52 }
  0x1d   : > { %5391 = vmatmul.mubr.msk.bf16.gmra.mxu0 %vm430_vm0, %v378_v28 }
  0x1e   : > { %5399 = vmatmul.mubr.msk.bf16.gmra.mxu1 %vm430_vm0, %v382_v29  ;;  %5424 = vmatprep.mubr.msk.bf16.mxu0 %vm6121_vm1, %v7864_v52 }
  0x1f   : > { %5406 = vmatprep.mubr.msk.bf16.mxu1 %vm430_vm0, %v399_v30 }
  0x26   : > { %5407 = vmatmul.mubr.msk.bf16.vlgmr.msra.gmra.mxu1 %vm430_vm0, %v400_v35 }
  0x27   : > { %5410 = vmatprep.mubr.msk.bf16.mxu1 %vm430_vm0, %v401_v36 }
  0x2e   : > { %5411 = vmatmul.mubr.msk.bf16.gmra.mxu1 %vm430_vm0, %v402_v41 }
  0x2f   : > { %5414 = vmatprep.mubr.msk.bf16.mxu1 %vm430_vm0, %v403_v42 }
  0x36   : > { %5415 = vmatmul.mubr.msk.bf16.gmra.mxu1 %vm430_vm0, %v404_v47 }
  0x37   : > { %5418 = vmatprep.mubr.msk.bf16.mxu1 %vm430_vm0, %v405_v48 }
  0x3e   : > { %5419 = vmatmul.mubr.msk.bf16.gmra.mxu1 %vm430_vm0, %v406_v51 }
  0x3f   : > { %5430 = vmatprep.mubr.msk.bf16.mxu1 %vm6121_vm1, %v7864_v52 }
  0xd5   : > { %v5388_v53 = vpop.f32.mrf.mxu0 }
  0xd6   : > { %v5396_v54 = vpop.f32.mrf.mxu1  ;;  %v498_v57 = vadd.f32 %v5388_v53, %v6273_v55 }
  0xd7   : > { %v489_v56 = vpop.f32.mrf.mxu0  ;;  %v530_v40 = vadd.f32 %v5396_v54, %v6273_v55 }
  0xd8   : > { %v521_v58 = vpop.f32.mrf.mxu1  ;;  %v490_v60 = vadd.f32 %v6273_v55, %v489_v56 }
  0xd9   : > { %v5389_v59 = vpop.f32.mrf.mxu0  ;;  %v522_v46 = vadd.f32 %v6273_v55, %v521_v58 }
  0xda   : > { %v501_v61 = vadd.f32 %v5389_v59, %v6273_v55  ;;  %v5397_v62 = vpop.f32.mrf.mxu1 }
  0xdb   : > { %v492_v63 = vpop.f32.mrf.mxu0  ;;  %v533_v36 = vadd.f32 %v5397_v62, %v6273_v55 }
  0xdc   : > { %v6278_v0 = vpack.c.bf16 %v501_v61, %v498_v57  ;;  %v493_v1 = vadd.f32 %v6273_v55, %v492_v63  ;;  %v524_v2 = vpop.f32.mrf.mxu1 }
  0xdd   : > { %v5392_v3 = vpop.f32.mrf.mxu0  ;;  %v525_v42 = vadd.f32 %v6273_v55, %v524_v2  ;;  %v6334_v48 = vpack.c.bf16 %v533_v36, %v530_v40 }
  0xde   : > { %v6281_v4 = vpack.c.bf16 %v493_v1, %v490_v60  ;;  %v6283_v5 = vpop.f32.mrf.mxu1  ;;  %v782_v6 = vsel %vm730_vm2, %v6278_v0, 0  ;;  %v514_v18 = vadd.f32 %v5392_v3, %v6273_v55 }
  0xdf   : > { %5429 = vmatpush3.bf16.xpose.msra.mxu1 %v782_v6  ;;  %v505_v9 = vpop.f32.mrf.mxu0  ;;  %v6338_v54 = vpack.c.bf16 %v525_v42, %v522_v46  ;;  %v970_v63 = vsel %vm730_vm2, %v6334_v48, 0  ;;  %v546_v3 = vadd.f32 %v6283_v5, %v6273_v55 }
  0xe0   : > { %v6287_v7 = vpop.f32.mrf.mxu1  ;;  %v735_v8 = vsel %vm730_vm2, %v6281_v4, 0  ;;  %5440 = vmatprep.subr.bf16.mxu1 %v7864_v52  ;;  %v506_v22 = vadd.f32 %v6273_v55, %v505_v9 }
  0xe1   : > { %5423 = vmatpush3.bf16.xpose.msra.mxu0 %v735_v8  ;;  %v5393_v12 = vpop.f32.mrf.mxu0  ;;  %v923_v9 = vsel %vm730_vm2, %v6338_v54, 0 }
  0xe2   : > { %v5401_v10 = vpop.f32.mrf.mxu1  ;;  %5434 = vmatprep.subr.bf16.mxu0 %v7864_v52  ;;  %v517_v19 = vadd.f32 %v5393_v12, %v6273_v55 }
  0xe3   : > { %v508_v16 = vpop.f32.mrf.mxu0  ;;  %v549_v60 = vadd.f32 %v5401_v10, %v6273_v55  ;;  %v538_v10 = vadd.f32 %v6273_v55, %v6287_v7 }
  0xe4   : > { %v540_v11 = vpop.f32.mrf.mxu1  ;;  %v509_v24 = vadd.f32 %v6273_v55, %v508_v16  ;;  %v6305_v28 = vpack.c.bf16 %v517_v19, %v514_v18 }
  0xe5   : > { %v541_v1 = vadd.f32 %v6273_v55, %v540_v11  ;;  %v6366_v5 = vpack.c.bf16 %v549_v60, %v546_v3 }
  0xe6   : > { %v5408_v13 = vpop.f32.mrf.mxu1  ;;  %v6310_v34 = vpack.c.bf16 %v509_v24, %v506_v22  ;;  %v876_v39 = vsel %vm730_vm2, %v6305_v28, 0 }
  0xe7   : > { %v650_v17 = vadd.f32 %v5408_v13, %v6296_v14  ;;  %v6370_v16 = vpack.c.bf16 %v541_v1, %v538_v10  ;;  %v1064_v22 = vsel %vm730_vm2, %v6366_v5, 0 }
  0xe8   : > { %v641_v15 = vpop.f32.mrf.mxu1  ;;  %v829_v45 = vsel %vm730_vm2, %v6310_v34, 0 }
  0xe9   : > { %v642_v21 = vadd.f32 %v6296_v14, %v641_v15  ;;  %v706_v26 = vmul.f32 0.35355338, %v650_v17 }
  0xea   : > { %v5409_v20 = vpop.f32.mrf.mxu1 }
  0xeb   : > { %v653_v23 = vadd.f32 %v5409_v20, %v6296_v14  ;;  %v704_v31 = vmul.f32 0.35355338, %v642_v21 }
  0xec   : > { %v644_v25 = vpop.f32.mrf.mxu1 }
  0xed   : > { %v707_v27 = vmul.f32 0.35355338, %v653_v23  ;;  %v645_v29 = vadd.f32 %v6296_v14, %v644_v25 }
  0xee   : > { %v5412_v30 = vpop.f32.mrf.mxu1 }
  0xef   : > { %v6308_v32 = vpack.c.bf16 %v707_v27, %v706_v26  ;;  %v705_v33 = vmul.f32 0.35355338, %v645_v29  ;;  %v666_v38 = vadd.f32 %v5412_v30, %v6296_v14  ;;  %v1017_v26 = vsel %vm730_vm2, %v6370_v16, 0 }
  0xf0   : > { %v657_v35 = vpop.f32.mrf.mxu1 }
  0xf1   : > { %v6313_v37 = vpack.c.bf16 %v705_v33, %v704_v31  ;;  %5431 = vmatmul.mubr.msk.bf16.vlgmr.msra.gmra.mxu1 %vm730_vm2, %v6308_v32  ;;  %v658_v43 = vadd.f32 %v6296_v14, %v657_v35  ;;  %v710_v49 = vmul.f32 0.35355338, %v666_v38 }
  0xf2   : > { %5441 = vmatpush3.bf16.xpose.msra.mxu1 %v876_v39  ;;  %v5413_v41 = vpop.f32.mrf.mxu1  ;;  %5442 = vmatprep.mubr.msk.bf16.mxu1 %vm6121_vm1, %v7864_v52 }
  0xf3   : > { %v669_v44 = vadd.f32 %v5413_v41, %v6296_v14  ;;  %5425 = vmatmul.mubr.msk.bf16.vlgmr.msra.gmra.mxu0 %vm730_vm2, %v6313_v37  ;;  %5452 = vmatprep.subr.bf16.mxu1 %v7864_v52  ;;  %v708_v56 = vmul.f32 0.35355338, %v658_v43  ;;  %v6417_v43 = vld [vmem:[%s7862_s8 + $0x8] sm:$0xff] }
  0xf4   : > { %5435 = vmatpush3.bf16.xpose.msra.mxu0 %v829_v45  ;;  %v660_v47 = vpop.f32.mrf.mxu1  ;;  %5436 = vmatprep.mubr.msk.bf16.mxu0 %vm6121_vm1, %v7864_v52 }
  0xf5   : > { %v711_v50 = vmul.f32 0.35355338, %v669_v44  ;;  %v661_v51 = vadd.f32 %v6296_v14, %v660_v47  ;;  %5446 = vmatprep.subr.bf16.mxu0 %v7864_v52 }
  0xf6   : > { %v5416_v53 = vpop.f32.mrf.mxu1 }
  0xf7   : > { %v6340_v57 = vpack.c.bf16 %v711_v50, %v710_v49  ;;  %v709_v58 = vmul.f32 0.35355338, %v661_v51  ;;  %v682_v62 = vadd.f32 %v5416_v53, %v6296_v14 }
  0xf8   : > { %v673_v59 = vpop.f32.mrf.mxu1 }
  0xf9   : > { %v6343_v61 = vpack.c.bf16 %v709_v58, %v708_v56  ;;  %5443 = vmatmul.mubr.msk.bf16.vlgmr.msra.gmra.mxu1 %vm730_vm2, %v6340_v57  ;;  %v674_v6 = vadd.f32 %v6296_v14, %v673_v59  ;;  %v714_v12 = vmul.f32 0.35355338, %v682_v62 }
  0xfa   : > { %5453 = vmatpush3.bf16.xpose.msra.mxu1 %v970_v63  ;;  %v5417_v2 = vpop.f32.mrf.mxu1  ;;  %5454 = vmatprep.mubr.msk.bf16.mxu1 %vm6121_vm1, %v7864_v52 }
  0xfb   : > { %v685_v8 = vadd.f32 %v5417_v2, %v6296_v14  ;;  %5437 = vmatmul.mubr.msk.bf16.vlgmr.msra.gmra.mxu0 %vm730_vm2, %v6343_v61  ;;  %5464 = vmatprep.subr.bf16.mxu1 %v7864_v52  ;;  %v712_v18 = vmul.f32 0.35355338, %v674_v6 }
  0xfc   : > { %5447 = vmatpush3.bf16.xpose.msra.mxu0 %v923_v9  ;;  %v676_v11 = vpop.f32.mrf.mxu1  ;;  %5448 = vmatprep.mubr.msk.bf16.mxu0 %vm6121_vm1, %v7864_v52 }
  0xfd   : > { %v715_v13 = vmul.f32 0.35355338, %v685_v8  ;;  %v677_v15 = vadd.f32 %v6296_v14, %v676_v11  ;;  %5458 = vmatprep.subr.bf16.mxu0 %v7864_v52 }
  0xfe   : > { %v5420_v17 = vpop.f32.mrf.mxu1 }
  0xff   : > { %v6372_v19 = vpack.c.bf16 %v715_v13, %v714_v12  ;;  %v713_v55 = vmul.f32 0.35355338, %v677_v15  ;;  %v698_v7 = vadd.f32 %v5420_v17, %v6296_v14 }
 0x100   : > { %v689_v20 = vpop.f32.mrf.mxu1 }
 0x101   : > { %v6375_v21 = vpack.c.bf16 %v713_v55, %v712_v18  ;;  %5455 = vmatmul.mubr.msk.bf16.vlgmr.msra.gmra.mxu1 %vm730_vm2, %v6372_v19  ;;  %v690_v23 = vadd.f32 %v6296_v14, %v689_v20  ;;  %v718_v25 = vmul.f32 0.35355338, %v698_v7 }
 0x102   : > { %5465 = vmatpush3.bf16.xpose.msra.mxu1 %v1064_v22  ;;  %v5421_v24 = vpop.f32.mrf.mxu1  ;;  %5466 = vmatprep.mubr.msk.bf16.mxu1 %vm6121_vm1, %v7864_v52 }
 0x103   : > { %5449 = vmatmul.mubr.msk.bf16.vlgmr.msra.gmra.mxu0 %vm730_vm2, %v6375_v21  ;;  %v701_v27 = vadd.f32 %v5421_v24, %v6296_v14  ;;  %5476 = vmatprep.subr.bf16.mxu1 %v7864_v52  ;;  %v716_v30 = vmul.f32 0.35355338, %v690_v23 }
 0x104   : > { %5459 = vmatpush3.bf16.xpose.msra.mxu0 %v1017_v26  ;;  %v692_v29 = vpop.f32.mrf.mxu1  ;;  %5460 = vmatprep.mubr.msk.bf16.mxu0 %vm6121_vm1, %v7864_v52 }
 0x105   : > { %v719_v31 = vmul.f32 0.35355338, %v701_v27  ;;  %v693_v33 = vadd.f32 %v6296_v14, %v692_v29  ;;  %5470 = vmatprep.subr.bf16.mxu0 %v7864_v52  ;;  %v6409_v14 = vld [vmem:[%s7862_s8] sm:$0xff] }
 0x107   : > { %v6394_v35 = vpack.c.bf16 %v719_v31, %v718_v25  ;;  %v717_v36 = vmul.f32 0.35355338, %v693_v33 }
 0x109   : > { %v6396_v38 = vpack.c.bf16 %v717_v36, %v716_v30  ;;  %5467 = vmatmul.mubr.msk.bf16.vlgmr.msra.gmra.mxu1 %vm730_vm2, %v6394_v35 }
 0x10a   : > { %5478 = vmatprep.mubr.msk.bf16.mxu1 %vm6121_vm1, %v7864_v52 }
 0x10b   : > { %5461 = vmatmul.mubr.msk.bf16.vlgmr.msra.gmra.mxu0 %vm730_vm2, %v6396_v38 }
 0x10c   : > { %5472 = vmatprep.mubr.msk.bf16.mxu0 %vm6121_vm1, %v7864_v52 }
 0x1b1   : > { %v818_v39 = vpop.f32.mrf.mxu1 }
 0x1b2   : > { %v6412_v40 = vadd.f32 %v818_v39, %v6409_v14 }
 0x1b3   : > { %v771_v41 = vpop.f32.mrf.mxu0  ;;  %v5432_v42 = vpop.f32.mrf.mxu1 }
 0x1b4   : > { %v6420_v44 = vadd.f32 %v771_v41, %v6409_v14  ;;  %v1114_v45 = vsel %vm1107_vm3, %v6412_v40, -inf }
 0x1b5   : > { %1115 = vmax.xlane.f32.xlu1 %v1114_v45  ;;  %v5426_v46 = vpop.f32.mrf.mxu0  ;;  %v821_v47 = vpop.f32.mrf.mxu1 }
 0x1b6   : > { %v6425_v49 = vadd.f32 %v821_v47, %v6417_v43  ;;  %v1108_v50 = vsel %vm1107_vm3, %v6420_v44, -inf }
 0x1b7   : > { %v5433_v51 = vpop.f32.mrf.mxu1  ;;  %1109 = vmax.xlane.f32.xlu0 %v1108_v50  ;;  %v774_v53 = vpop.f32.mrf.mxu0 }
 0x1b8   : > { %v6430_v56 = vadd.f32 %v774_v53, %v6417_v43  ;;  %v1117_v58 = vsel %vm1107_vm3, %v6425_v49, -inf }
 0x1b9   : > { %1118 = vmax.xlane.f32.xlu1 %v1117_v58  ;;  %v912_v59 = vpop.f32.mrf.mxu1  ;;  %v5427_v60 = vpop.f32.mrf.mxu0 }
 0x1ba   : > { %v6435_v62 = vadd.f32 %v912_v59, %v6409_v14  ;;  %v1111_v63 = vsel %vm1107_vm3, %v6430_v56, -inf }
 0x1bb   : > { %v5444_v1 = vpop.f32.mrf.mxu1  ;;  %1112 = vmax.xlane.f32.xlu0 %v1111_v63  ;;  %v865_v2 = vpop.f32.mrf.mxu0 }
 0x1bc   : > { %v6440_v8 = vadd.f32 %v865_v2, %v6409_v14  ;;  %v1126_v10 = vsel %vm1107_vm3, %v6435_v62, -inf }
 0x1bd   : > { %v915_v3 = vpop.f32.mrf.mxu1  ;;  %v5438_v6 = vpop.f32.mrf.mxu0 }
 0x1be   : > { %v6443_v9 = vadd.f32 %v915_v3, %v6417_v43  ;;  %v1120_v7 = vsel %vm1107_vm3, %v6440_v8, -inf }
 0x1bf   : > { %v5445_v11 = vpop.f32.mrf.mxu1  ;;  %1127 = vmax.xlane.f32.xlu0 %v1126_v10  ;;  %v868_v12 = vpop.f32.mrf.mxu0 }
 0x1c0   : > { %v1129_v13 = vsel %vm1107_vm3, %v6443_v9, -inf  ;;  %v6450_v15 = vadd.f32 %v868_v12, %v6417_v43 }
 0x1c1   : > { %1130 = vmax.xlane.f32.xlu1 %v1129_v13  ;;  %v1006_v17 = vpop.f32.mrf.mxu1  ;;  %v5439_v18 = vpop.f32.mrf.mxu0 }
 0x1c2   : > { %v6453_v55 = vadd.f32 %v1006_v17, %v6409_v14  ;;  %v1123_v23 = vsel %vm1107_vm3, %v6450_v15, -inf }
 0x1c3   : > { %v5456_v20 = vpop.f32.mrf.mxu1  ;;  %1121 = vmax.xlane.f32.xlu0 %v1120_v7  ;;  %v959_v22 = vpop.f32.mrf.mxu0 }
 0x1c4   : > { %v6463_v27 = vadd.f32 %v959_v22, %v6409_v14  ;;  %v1138_v29 = vsel %vm1107_vm3, %v6453_v55, -inf }
 0x1c5   : > { %v1009_v24 = vpop.f32.mrf.mxu1  ;;  %1124 = vmax.xlane.f32.xlu1 %v1123_v23  ;;  %v5450_v25 = vpop.f32.mrf.mxu0 }
 0x1c6   : > { %v6460_v26 = vadd.f32 %v1009_v24, %v6417_v43  ;;  %v1132_v45 = vsel %vm1107_vm3, %v6463_v27, -inf }
 0x1c7   : > { %1139 = vmax.xlane.f32.xlu0 %v1138_v29  ;;  %v5457_v30 = vpop.f32.mrf.mxu1  ;;  %v962_v31 = vpop.f32.mrf.mxu0 }
 0x1c8   : > { %v1141_v33 = vsel %vm1107_vm3, %v6460_v26, -inf  ;;  %v6470_v36 = vadd.f32 %v962_v31, %v6417_v43 }
 0x1c9   : > { %1142 = vmax.xlane.f32.xlu1 %v1141_v33  ;;  %v1100_v39 = vpop.f32.mrf.mxu1  ;;  %v5451_v41 = vpop.f32.mrf.mxu0 }
 0x1ca   : > { %v6473_v42 = vadd.f32 %v1100_v39, %v6409_v14  ;;  %v1135_v50 = vsel %vm1107_vm3, %v6470_v36, -inf }
 0x1cb   : > { %1133 = vmax.xlane.f32.xlu0 %v1132_v45  ;;  %v1053_v46 = vpop.f32.mrf.mxu0  ;;  %v5468_v47 = vpop.f32.mrf.mxu1 }
 0x1cc   : > { %v1150_v51 = vsel %vm1107_vm3, %v6473_v42, -inf  ;;  %v6482_v53 = vadd.f32 %v1053_v46, %v6409_v14 }
 0x1cd   : > { %1136 = vmax.xlane.f32.xlu1 %v1135_v50  ;;  %v1103_v58 = vpop.f32.mrf.mxu1  ;;  %v5462_v59 = vpop.f32.mrf.mxu0 }
 0x1ce   : > { %v1144_v1 = vsel %vm1107_vm3, %v6482_v53, -inf  ;;  %v6494_v14 = vadd.f32 %v1103_v58, %v6417_v43 }
 0x1cf   : > { %1151 = vmax.xlane.f32.xlu0 %v1150_v51  ;;  %v1056_v60 = vpop.f32.mrf.mxu0  ;;  %v5469_v63 = vpop.f32.mrf.mxu1 }
 0x1d0   : > { %v1153_v3 = vsel %vm1107_vm3, %v6494_v14, -inf  ;;  %v6499_v6 = vadd.f32 %v1056_v60, %v6417_v43 }
 0x1d1   : > { %v5463_v2 = vpop.f32.mrf.mxu0 }
 0x1d2   : > { %v1147_v10 = vsel %vm1107_vm3, %v6499_v6, -inf }
 0x1d3   : > { %1145 = vmax.xlane.f32.xlu0 %v1144_v1 }
 0x1de   : > { %1341 = vrot.lane.b32.xlu1 %v6278_v0, %s6122_s15 }
 0x1e2   : > { %1389 = vrot.lane.b32.xlu1 %v6310_v34, %s6122_s15 }
 0x1e6   : > { %1437 = vrot.lane.b32.xlu1 %v6305_v28, %s6122_s15 }
 0x1e9   : > { %1293 = vrot.lane.b32.xlu0 %v6281_v4, %s6122_s15 }
 0x1ea   : > { %1533 = vrot.lane.b32.xlu1 %v6334_v48, %s6122_s15 }
 0x1ed   : > { %1485 = vrot.lane.b32.xlu0 %v6338_v54, %s6122_s15 }
 0x1f1   : > { %1581 = vrot.lane.b32.xlu0 %v6370_v16, %s6122_s15 }
 0x20e   : > { %1154 = vmax.xlane.f32.xlu1 %v1153_v3 }
 0x212   : > { %1148 = vmax.xlane.f32.xlu1 %v1147_v10 }
 0x223   : > { %1629 = vrot.lane.b32.xlu1 %v6366_v5, %s6122_s15  ;;  %s6129_s15 = smov 8  }
 0x23e   : > { %v1116_v11 = vpop.xlane.xlu1 %1115 }
 0x23f   : > { %v1158_v12 = vsub.f32 %v6412_v40, %v1116_v11 }
 0x240   : > { %v1110_v13 = vpop.xlane.xlu0 %1109 }
 0x241   : > { %v1176_v17 = vmul.f32 1.442695, %v1158_v12  ;;  %v1156_v18 = vsub.f32 %v6420_v44, %v1110_v13 }
 0x242   : > { %v1119_v7 = vpop.xlane.xlu1 %1118 }
 0x243   : > { %5856 = vpow2.f32 %v1176_v17  ;;  %v1172_v20 = vmul.f32 1.442695, %v1156_v18  ;;  %v1159_v43 = vsub.f32 %v6425_v49, %v1119_v7 }
 0x244   : > { %v1113_v22 = vpop.xlane.xlu0 %1112 }
 0x245   : > { %5858 = vpow2.f32 %v1172_v20  ;;  %v1178_v23 = vmul.f32 1.442695, %v1159_v43  ;;  %v1157_v24 = vsub.f32 %v6430_v56, %v1113_v22 }
 0x247   : > { %5860 = vpow2.f32 %v1178_v23  ;;  %v1174_v25 = vmul.f32 1.442695, %v1157_v24 }
 0x248   : > { %v1128_v29 = vpop.xlane.xlu0 %1127 }
 0x249   : > { %5862 = vpow2.f32 %v1174_v25  ;;  %v1162_v40 = vsub.f32 %v6435_v62, %v1128_v29 }
 0x24a   : > { %v1131_v30 = vpop.xlane.xlu1 %1130 }
 0x24b   : > { %v1184_v31 = vmul.f32 1.442695, %v1162_v40  ;;  %v1163_v44 = vsub.f32 %v6443_v9, %v1131_v30 }
 0x24c   : > { %v1122_v33 = vpop.xlane.xlu0 %1121 }
 0x24d   : > { %5864 = vpow2.f32 %v1184_v31  ;;  %v1186_v39 = vmul.f32 1.442695, %v1163_v44  ;;  %v1160_v49 = vsub.f32 %v6440_v8, %v1122_v33 }
 0x24e   : > { %v1125_v41 = vpop.xlane.xlu1 %1124 }
 0x24f   : > { %5866 = vpow2.f32 %v1186_v39  ;;  %v1180_v45 = vmul.f32 1.442695, %v1160_v49  ;;  %v1161_v56 = vsub.f32 %v6450_v15, %v1125_v41 }
 0x250   : > { %v6512_v46 = vpop.eup %5856  ;;  %v1140_v47 = vpop.xlane.xlu0 %1139 }
 0x251   : > { %5868 = vpow2.f32 %v1180_v45  ;;  %v1182_v50 = vmul.f32 1.442695, %v1161_v56  ;;  %v1166_v62 = vsub.f32 %v6453_v55, %v1140_v47  ;;  %v1210_v9 = vsel %vm1107_vm3, %v6512_v46, 0.0 }
 0x252   : > { %v6517_v51 = vpop.eup %5858  ;;  %v1143_v58 = vpop.xlane.xlu1 %1142  ;;  %1211 = vadd.xlane.f32.xlu0 %v1210_v9 }
 0x253   : > { %5870 = vpow2.f32 %v1182_v50  ;;  %v1192_v8 = vmul.f32 1.442695, %v1166_v62  ;;  %v1167_v59 = vsub.f32 %v6460_v26, %v1143_v58  ;;  %v1204_v63 = vsel %vm1107_vm3, %v6517_v51, 0.0 }
 0x254   : > { %v6520_v60 = vpop.eup %5860  ;;  %v1134_v15 = vpop.xlane.xlu0 %1133 }
 0x255   : > { %5872 = vpow2.f32 %v1192_v8  ;;  %v1194_v1 = vmul.f32 1.442695, %v1167_v59  ;;  %v1164_v55 = vsub.f32 %v6463_v27, %v1134_v15  ;;  %v1213_v2 = vsel %vm1107_vm3, %v6520_v60, 0.0 }
 0x256   : > { %v6527_v3 = vpop.eup %5862  ;;  %v1137_v10 = vpop.xlane.xlu1 %1136  ;;  %1205 = vadd.xlane.f32.xlu0 %v1204_v63  ;;  %1214 = vadd.xlane.f32.xlu1 %v1213_v2 }
 0x257   : > { %5874 = vpow2.f32 %v1194_v1  ;;  %v1188_v26 = vmul.f32 1.442695, %v1164_v55  ;;  %v1165_v11 = vsub.f32 %v6470_v36, %v1137_v10  ;;  %v1207_v27 = vsel %vm1107_vm3, %v6527_v3, 0.0 }
 0x258   : > { %v1152_v12 = vpop.xlane.xlu0 %1151 }
 0x259   : > { %5876 = vpow2.f32 %v1188_v26  ;;  %v1190_v13 = vmul.f32 1.442695, %v1165_v11  ;;  %v1170_v17 = vsub.f32 %v6473_v42, %v1152_v12 }
 0x25a   : > { %v6533_v18 = vpop.eup %5864  ;;  %v1342_v7 = vpop.permute.xlu1 %1341  ;;  %1208 = vadd.xlane.f32.xlu1 %v1207_v27 }
 0x25b   : > { %5878 = vpow2.f32 %v1190_v13  ;;  %v1200_v20 = vmul.f32 1.442695, %v1170_v17  ;;  %5477 = vmatpush3.bf16.msra.mxu1 %v1342_v7  ;;  %v1222_v43 = vsel %vm1107_vm3, %v6533_v18, 0.0 }
 0x25c   : > { %v6537_v22 = vpop.eup %5866  ;;  %1223 = vadd.xlane.f32.xlu0 %v1222_v43  ;;  %v1146_v36 = vpop.xlane.xlu0 %1145  ;;  %5488 = vmatprep.subr.bf16.mxu1 %v7864_v52 }
 0x25d   : > { %5880 = vpow2.f32 %v1200_v20  ;;  %v1168_v42 = vsub.f32 %v6482_v53, %v1146_v36  ;;  %v1225_v23 = vsel %vm1107_vm3, %v6537_v22, 0.0 }
 0x25e   : > { %v6543_v24 = vpop.eup %5868  ;;  %1226 = vadd.xlane.f32.xlu1 %v1225_v23  ;;  %v6580_v58 = vpop.permute.xlu1 %1389 }
 0x25f   : > { %v1196_v25 = vmul.f32 1.442695, %v1168_v42  ;;  %v1216_v29 = vsel %vm1107_vm3, %v6543_v24, 0.0 }
 0x260   : > { %v6547_v40 = vpop.eup %5870  ;;  %1217 = vadd.xlane.f32.xlu0 %v1216_v29  ;;  %v1294_v30 = vpop.permute.xlu0 %1293 }
 0x261   : > { %5882 = vpow2.f32 %v1196_v25  ;;  %5471 = vmatpush3.bf16.msra.mxu0 %v1294_v30  ;;  %v1219_v31 = vsel %vm1107_vm3, %v6547_v40, 0.0 }
 0x262   : > { %v6551_v53 = vpop.eup %5872  ;;  %1220 = vadd.xlane.f32.xlu1 %v1219_v31  ;;  %5482 = vmatprep.subr.bf16.mxu0 %v7864_v52  ;;  %v6584_v8 = vpop.permute.xlu1 %1437 }
 0x263   : > { %v1234_v44 = vsel %vm1107_vm3, %v6551_v53, 0.0 }
 0x264   : > { %v6556_v33 = vpop.eup %5874  ;;  %1235 = vadd.xlane.f32.xlu0 %v1234_v44 }
 0x265   : > { %v1237_v39 = vsel %vm1107_vm3, %v6556_v33, 0.0 }
 0x266   : > { %v6560_v49 = vpop.eup %5876  ;;  %1238 = vadd.xlane.f32.xlu1 %v1237_v39  ;;  %v6590_v59 = vpop.permute.xlu1 %1533 }
 0x267   : > { %v1228_v41 = vsel %vm1107_vm3, %v6560_v49, 0.0 }
 0x268   : > { %v6564_v45 = vpop.eup %5878  ;;  %1229 = vadd.xlane.f32.xlu0 %v1228_v41 }
 0x269   : > { %v1231_v56 = vsel %vm1107_vm3, %v6564_v45, 0.0 }
 0x26a   : > { %v6568_v47 = vpop.eup %5880  ;;  %1232 = vadd.xlane.f32.xlu1 %v1231_v56 }
 0x26b   : > { %v1246_v50 = vsel %vm1107_vm3, %v6568_v47, 0.0 }
 0x26c   : > { %1247 = vadd.xlane.f32.xlu0 %v1246_v50 }
 0x26e   : > { %v6572_v62 = vpop.eup %5882 }
 0x26f   : > { %v1240_v9 = vsel %vm1107_vm3, %v6572_v62, 0.0 }
 0x270   : > { %1241 = vadd.xlane.f32.xlu0 %v1240_v9 }
 0x27b   : > { %1750 = vrot.lane.b32.xlu1 %v6278_v0, %s6123_s16 }
 0x286   : > { %1698 = vrot.lane.b32.xlu0 %v6281_v4, %s6123_s16 }
 0x28a   : > { %1696 = vrot.lane.b32.xlu0 %v6313_v37, %s6123_s16 }
 0x28e   : > { %1748 = vrot.lane.b32.xlu0 %v6308_v32, %s6123_s16 }
 0x292   : > { %1800 = vrot.lane.b32.xlu0 %v6343_v61, %s6123_s16 }
 0x296   : > { %1852 = vrot.lane.b32.xlu0 %v6340_v57, %s6123_s16 }
 0x297   : > { %v1155_v15 = vpop.xlane.xlu1 %1154 }
 0x298   : > { %v1171_v63 = vsub.f32 %v6494_v14, %v1155_v15 }
 0x29a   : > { %v1202_v1 = vmul.f32 1.442695, %v1171_v63  ;;  %1904 = vrot.lane.b32.xlu0 %v6375_v21, %s6123_s16 }
 0x29b   : > { %v1149_v55 = vpop.xlane.xlu1 %1148 }
 0x29c   : > { %5884 = vpow2.f32 %v1202_v1  ;;  %v1169_v2 = vsub.f32 %v6499_v6, %v1149_v55  ;;  %v6620_v6 = vpop.permute.xlu0 %1485 }
 0x29e   : > { %v1198_v10 = vmul.f32 1.442695, %v1169_v2  ;;  %1956 = vrot.lane.b32.xlu0 %v6372_v19, %s6123_s16 }
 0x29f   : > { %v6628_v17 = vpop.permute.xlu1 %1629 }
 0x2a0   : > { %5886 = vpow2.f32 %v1198_v10  ;;  %v6624_v13 = vpop.permute.xlu0 %1581 }
 0x2a2   : > { %2008 = vrot.lane.b32.xlu0 %v6396_v38, %s6123_s16 }
 0x2a9   : > { %v6602_v26 = vpop.eup %5884 }
 0x2aa   : > { %v1249_v14 = vsel %vm1107_vm3, %v6602_v26, 0.0 }
 0x2ab   : > { %1250 = vadd.xlane.f32.xlu1 %v1249_v14 }
 0x2ad   : > { %v6606_v11 = vpop.eup %5886 }
 0x2ae   : > { %v1243_v12 = vsel %vm1107_vm3, %v6606_v11, 0.0 }
 0x2af   : > { %1244 = vadd.xlane.f32.xlu1 %v1243_v12 }
 0x2c0   : > { %1802 = vrot.lane.b32.xlu1 %v6310_v34, %s6123_s16 }
 0x2c4   : > { %1854 = vrot.lane.b32.xlu1 %v6305_v28, %s6123_s16 }
 0x2c8   : > { %1906 = vrot.lane.b32.xlu1 %v6338_v54, %s6123_s16 }
 0x2cc   : > { %1958 = vrot.lane.b32.xlu1 %v6334_v48, %s6123_s16 }
 0x2d0   : > { %2010 = vrot.lane.b32.xlu1 %v6370_v16, %s6123_s16 }
 0x2d4   : > { %2062 = vrot.lane.b32.xlu1 %v6366_v5, %s6123_s16 }
 0x2d8   : > { %2060 = vrot.lane.b32.xlu1 %v6394_v35, %s6123_s16  ;;  %s6130_s16 = smov 16  }
 0x2db   : > { %v1212_v27 = vpop.xlane.xlu0 %1211 }
 0x2dc   : > { %5888 = vrcp.f32 %v1212_v27 }
 0x2df   : > { %v1206_v7 = vpop.xlane.xlu0 %1205  ;;  %v1215_v20 = vpop.xlane.xlu1 %1214 }
 0x2e0   : > { %5890 = vrcp.f32 %v1215_v20 }
 0x2e1   : > { %5892 = vrcp.f32 %v1206_v7 }
 0x2e3   : > { %v1209_v43 = vpop.xlane.xlu1 %1208 }
 0x2e4   : > { %5894 = vrcp.f32 %v1209_v43 }
 0x2e5   : > { %v1224_v36 = vpop.xlane.xlu0 %1223 }
 0x2e6   : > { %5896 = vrcp.f32 %v1224_v36 }
 0x2e7   : > { %v1227_v42 = vpop.xlane.xlu1 %1226 }
 0x2e8   : > { %5898 = vrcp.f32 %v1227_v42 }
 0x2e9   : > { %v1218_v23 = vpop.xlane.xlu0 %1217  ;;  %v5889_v29 = vpop.eup %5888 }
 0x2ea   : > { %5900 = vrcp.f32 %v1218_v23  ;;  %v1270_v41 = vmul.f32 %v5889_v29, %v6512_v46 }
 0x2eb   : > { %v1221_v25 = vpop.xlane.xlu1 %1220 }
 0x2ec   : > { %5902 = vrcp.f32 %v1221_v25 }
 0x2ed   : > { %v1236_v30 = vpop.xlane.xlu0 %1235  ;;  %v5891_v31 = vpop.eup %5890 }
 0x2ee   : > { %5904 = vrcp.f32 %v1236_v30  ;;  %v5893_v44 = vpop.eup %5892  ;;  %v1271_v56 = vmul.f32 %v5891_v31, %v6520_v60 }
 0x2ef   : > { %v1239_v39 = vpop.xlane.xlu1 %1238  ;;  %v1268_v63 = vmul.f32 %v5893_v44, %v6517_v51 }
 0x2f0   : > { %5906 = vrcp.f32 %v1239_v39  ;;  %v1285_v15 = vpack.c.bf16 %v1271_v56, %v1270_v41 }
 0x2f1   : > { %v5895_v50 = vpop.eup %5894  ;;  %v1230_v9 = vpop.xlane.xlu0 %1229 }
 0x2f2   : > { %5908 = vrcp.f32 %v1230_v9  ;;  %v1269_v1 = vmul.f32 %v5895_v50, %v6527_v3  ;;  %5479 = vmatmul.mubr.msk.bf16.vlgmr.msra.gmra.mxu1 %vm1107_vm3, %v1285_v15 }
 0x2f3   : > { %v5897_v55 = vpop.eup %5896  ;;  %v1233_v2 = vpop.xlane.xlu1 %1232  ;;  %5489 = vmatpush3.bf16.msra.mxu1 %v6584_v8  ;;  %5490 = vmatprep.mubr.msk.bf16.mxu1 %vm6121_vm1, %v7864_v52 }
 0x2f4   : > { %5910 = vrcp.f32 %v1233_v2  ;;  %v1284_v10 = vpack.c.bf16 %v1269_v1, %v1268_v63  ;;  %5500 = vmatprep.subr.bf16.mxu1 %v7864_v52  ;;  %v1274_v51 = vmul.f32 %v5897_v55, %v6533_v18 }
 0x2f5   : > { %v5899_v46 = vpop.eup %5898 }
 0x2f6   : > { %5473 = vmatmul.mubr.msk.bf16.vlgmr.msra.gmra.mxu0 %vm1107_vm3, %v1284_v10  ;;  %v1275_v60 = vmul.f32 %v5899_v46, %v6537_v22 }
 0x2f7   : > { %v5901_v3 = vpop.eup %5900  ;;  %5483 = vmatpush3.bf16.msra.mxu0 %v6580_v58  ;;  %5484 = vmatprep.mubr.msk.bf16.mxu0 %vm6121_vm1, %v7864_v52 }
 0x2f8   : > { %v1287_v8 = vpack.c.bf16 %v1275_v60, %v1274_v51  ;;  %5494 = vmatprep.subr.bf16.mxu0 %v7864_v52  ;;  %v1272_v12 = vmul.f32 %v5901_v3, %v6543_v24 }
 0x2f9   : > { %v5903_v14 = vpop.eup %5902 }
 0x2fa   : > { %v1273_v27 = vmul.f32 %v5903_v14, %v6547_v40  ;;  %5491 = vmatmul.mubr.msk.bf16.vlgmr.msra.gmra.mxu1 %vm1107_vm3, %v1287_v8 }
 0x2fb   : > { %v5905_v7 = vpop.eup %5904  ;;  %5501 = vmatpush3.bf16.msra.mxu1 %v6590_v59  ;;  %5502 = vmatprep.mubr.msk.bf16.mxu1 %vm6121_vm1, %v7864_v52 }
 0x2fc   : > { %v1286_v18 = vpack.c.bf16 %v1273_v27, %v1272_v12  ;;  %5512 = vmatprep.subr.bf16.mxu1 %v7864_v52  ;;  %v1278_v58 = vmul.f32 %v5905_v7, %v6551_v53 }
 0x2fd   : > { %v5907_v22 = vpop.eup %5906 }
 0x2fe   : > { %5485 = vmatmul.mubr.msk.bf16.vlgmr.msra.gmra.mxu0 %vm1107_vm3, %v1286_v18  ;;  %v1279_v24 = vmul.f32 %v5907_v22, %v6556_v33  ;;  %v1248_v33 = vpop.xlane.xlu0 %1247 }
 0x2ff   : > { %v5909_v20 = vpop.eup %5908  ;;  %5495 = vmatpush3.bf16.msra.mxu0 %v6620_v6  ;;  %5496 = vmatprep.mubr.msk.bf16.mxu0 %vm6121_vm1, %v7864_v52  ;;  %5912 = vrcp.f32 %v1248_v33 }
 0x300   : > { %v1289_v40 = vpack.c.bf16 %v1279_v24, %v1278_v58  ;;  %5506 = vmatprep.subr.bf16.mxu0 %v7864_v52  ;;  %v1276_v43 = vmul.f32 %v5909_v20, %v6560_v49  ;;  %v1751_v49 = vpop.permute.xlu1 %1750 }
 0x301   : > { %v5911_v59 = vpop.eup %5910  ;;  %v1756_v9 = vsel %vm730_vm2, %v1751_v49, 0 }
 0x302   : > { %v1277_v36 = vmul.f32 %v5911_v59, %v6564_v45  ;;  %5503 = vmatmul.mubr.msk.bf16.vlgmr.msra.gmra.mxu1 %vm1107_vm3, %v1289_v40  ;;  %v1242_v45 = vpop.xlane.xlu0 %1241 }
 0x303   : > { %5513 = vmatpush3.bf16.msra.mxu1 %v6628_v17  ;;  %5514 = vmatprep.mubr.msk.bf16.mxu1 %vm6121_vm1, %v7864_v52 }
 0x304   : > { %v1288_v53 = vpack.c.bf16 %v1277_v36, %v1276_v43  ;;  %5524 = vmatprep.subr.bf16.mxu1 %v7864_v52 }
 0x306   : > { %5497 = vmatmul.mubr.msk.bf16.vlgmr.msra.gmra.mxu0 %vm1107_vm3, %v1288_v53  ;;  %v1699_v42 = vpop.permute.xlu0 %1698 }
 0x307   : > { %5507 = vmatpush3.bf16.msra.mxu0 %v6624_v13  ;;  %5508 = vmatprep.mubr.msk.bf16.mxu0 %vm6121_vm1, %v7864_v52  ;;  %v1704_v1 = vsel %vm730_vm2, %v1699_v42, 0 }
 0x308   : > { %5518 = vmatprep.subr.bf16.mxu0 %v7864_v52 }
 0x30a   : > { %v1697_v29 = vpop.permute.xlu0 %1696 }
 0x30c   : > { %v5913_v25 = vpop.eup %5912 }
 0x30d   : > { %v1282_v13 = vmul.f32 %v5913_v25, %v6568_v47 }
 0x30e   : > { %v1749_v50 = vpop.permute.xlu0 %1748 }
 0x312   : > { %v1801_v55 = vpop.permute.xlu0 %1800 }
 0x316   : > { %v1853_v2 = vpop.permute.xlu0 %1852 }
 0x31a   : > { %v1905_v60 = vpop.permute.xlu0 %1904 }
 0x31e   : > { %v1957_v14 = vpop.permute.xlu0 %1956 }
 0x322   : > { %v2009_v18 = vpop.permute.xlu0 %2008 }
 0x334   : > { %v1251_v6 = vpop.xlane.xlu1 %1250 }
 0x335   : > { %5914 = vrcp.f32 %v1251_v6 }
 0x336   : > { %5916 = vrcp.f32 %v1242_v45 }
 0x338   : > { %v1245_v17 = vpop.xlane.xlu1 %1244 }
 0x339   : > { %5918 = vrcp.f32 %v1245_v17 }
 0x33c   : > { %v1803_v23 = vpop.permute.xlu1 %1802 }
 0x33d   : > { %v1808_v10 = vsel %vm730_vm2, %v1803_v23, 0 }
 0x340   : > { %v1855_v39 = vpop.permute.xlu1 %1854 }
 0x342   : > { %v5915_v30 = vpop.eup %5914 }
 0x343   : > { %v1283_v31 = vmul.f32 %v5915_v30, %v6602_v26  ;;  %v5917_v44 = vpop.eup %5916 }
 0x344   : > { %v1280_v15 = vmul.f32 %v5917_v44, %v6572_v62  ;;  %v1907_v26 = vpop.permute.xlu1 %1906  ;;  %v1860_v62 = vsel %vm730_vm2, %v1855_v39, 0 }
 0x345   : > { %v1291_v41 = vpack.c.bf16 %v1283_v31, %v1282_v13  ;;  %v1912_v3 = vsel %vm730_vm2, %v1907_v26, 0  ;;  %v6740_v26 = vld [vmem:[%s7862_s8 + $0x10] sm:$0xff] }
 0x346   : > { %v5919_v56 = vpop.eup %5918 }
 0x347   : > { %5515 = vmatmul.mubr.msk.bf16.vlgmr.msra.gmra.mxu1 %vm1107_vm3, %v1291_v41  ;;  %v1281_v63 = vmul.f32 %v5919_v56, %v6606_v11 }
 0x348   : > { %5525 = vmatpush3.bf16.xpose.msra.mxu1 %v1756_v9  ;;  %5526 = vmatprep.mubr.msk.bf16.mxu1 %vm6121_vm1, %v7864_v52  ;;  %v1959_v11 = vpop.permute.xlu1 %1958 }
 0x349   : > { %v1290_v47 = vpack.c.bf16 %v1281_v63, %v1280_v15  ;;  %5536 = vmatprep.subr.bf16.mxu1 %v7864_v52  ;;  %v1964_v51 = vsel %vm730_vm2, %v1959_v11, 0 }
 0x34b   : > { %5509 = vmatmul.mubr.msk.bf16.vlgmr.msra.gmra.mxu0 %vm1107_vm3, %v1290_v47 }
 0x34c   : > { %5519 = vmatpush3.bf16.xpose.msra.mxu0 %v1704_v1  ;;  %5520 = vmatprep.mubr.msk.bf16.mxu0 %vm6121_vm1, %v7864_v52  ;;  %v2011_v46 = vpop.permute.xlu1 %2010 }
 0x34d   : > { %5530 = vmatprep.subr.bf16.mxu0 %v7864_v52  ;;  %v2016_v27 = vsel %vm730_vm2, %v2011_v46, 0 }
 0x34f   : > { %5527 = vmatmul.mubr.msk.bf16.vlgmr.msra.gmra.mxu1 %vm730_vm2, %v1749_v50 }
 0x350   : > { %5537 = vmatpush3.bf16.xpose.msra.mxu1 %v1860_v62  ;;  %5538 = vmatprep.mubr.msk.bf16.mxu1 %vm6121_vm1, %v7864_v52  ;;  %v2063_v8 = vpop.permute.xlu1 %2062 }
 0x351   : > { %5548 = vmatprep.subr.bf16.mxu1 %v7864_v52  ;;  %v2068_v12 = vsel %vm730_vm2, %v2063_v8, 0 }
 0x353   : > { %5521 = vmatmul.mubr.msk.bf16.vlgmr.msra.gmra.mxu0 %vm730_vm2, %v1697_v29 }
 0x354   : > { %5531 = vmatpush3.bf16.xpose.msra.mxu0 %v1808_v10  ;;  %5532 = vmatprep.mubr.msk.bf16.mxu0 %vm6121_vm1, %v7864_v52  ;;  %v2061_v7 = vpop.permute.xlu1 %2060 }
 0x355   : > { %5542 = vmatprep.subr.bf16.mxu0 %v7864_v52 }
 0x357   : > { %5539 = vmatmul.mubr.msk.bf16.vlgmr.msra.gmra.mxu1 %vm730_vm2, %v1853_v2 }
 0x358   : > { %5549 = vmatpush3.bf16.xpose.msra.mxu1 %v1964_v51  ;;  %5550 = vmatprep.mubr.msk.bf16.mxu1 %vm6121_vm1, %v7864_v52  ;;  %v6751_v51 = vld [vmem:[%s7862_s8 + $0x18] sm:$0xff] }
 0x359   : > { %5560 = vmatprep.subr.bf16.mxu1 %v7864_v52 }
 0x35b   : > { %5533 = vmatmul.mubr.msk.bf16.vlgmr.msra.gmra.mxu0 %vm730_vm2, %v1801_v55 }
 0x35c   : > { %5543 = vmatpush3.bf16.xpose.msra.mxu0 %v1912_v3  ;;  %5544 = vmatprep.mubr.msk.bf16.mxu0 %vm6121_vm1, %v7864_v52 }
 0x35d   : > { %5554 = vmatprep.subr.bf16.mxu0 %v7864_v52 }
 0x35f   : > { %5551 = vmatmul.mubr.msk.bf16.vlgmr.msra.gmra.mxu1 %vm730_vm2, %v1957_v14 }
 0x360   : > { %5561 = vmatpush3.bf16.xpose.msra.mxu1 %v2068_v12  ;;  %5562 = vmatprep.mubr.msk.bf16.mxu1 %vm6121_vm1, %v7864_v52 }
 0x361   : > { %5572 = vmatprep.subr.bf16.mxu1 %v7864_v52 }
 0x363   : > { %5545 = vmatmul.mubr.msk.bf16.vlgmr.msra.gmra.mxu0 %vm730_vm2, %v1905_v60 }
 0x364   : > { %5555 = vmatpush3.bf16.xpose.msra.mxu0 %v2016_v27  ;;  %5556 = vmatprep.mubr.msk.bf16.mxu0 %vm6121_vm1, %v7864_v52 }
 0x365   : > { %5566 = vmatprep.subr.bf16.mxu0 %v7864_v52 }
 0x367   : > { %5563 = vmatmul.mubr.msk.bf16.vlgmr.msra.gmra.mxu1 %vm730_vm2, %v2061_v7 }
 0x368   : > { %5574 = vmatprep.mubr.msk.bf16.mxu1 %vm6121_vm1, %v7864_v52 }
 0x36b   : > { %5557 = vmatmul.mubr.msk.bf16.vlgmr.msra.gmra.mxu0 %vm730_vm2, %v2009_v18 }
 0x36c   : > { %5568 = vmatprep.mubr.msk.bf16.mxu0 %vm6121_vm1, %v7864_v52 }
 0x3b2   : > { %v1381_v22 = vpop.f32.mrf.mxu1 }
 0x3b3   : > { %1678 = vst.msk [vmem:[#allocation2 + $0x10] sm:$0xff] %vm730_vm2, %v1381_v22 }
 0x3b4   : > { %v5480_v58 = vpop.f32.mrf.mxu1 }
 0x3b6   : > { %v1333_v24 = vpop.f32.mrf.mxu0  ;;  %v1384_v20 = vpop.f32.mrf.mxu1 }
 0x3b7   : > { %1676 = vst.msk [vmem:[#allocation2] sm:$0xff] %vm730_vm2, %v1333_v24  ;;  %1679 = vst.msk [vmem:[#allocation2 + $0x18] sm:$0xff] %vm730_vm2, %v1384_v20 }
 0x3b8   : > { %v5474_v40 = vpop.f32.mrf.mxu0  ;;  %v5481_v59 = vpop.f32.mrf.mxu1 }
 0x3ba   : > { %v1336_v43 = vpop.f32.mrf.mxu0  ;;  %v1477_v36 = vpop.f32.mrf.mxu1 }
 0x3bb   : > { %1677 = vst.msk [vmem:[#allocation2 + $0x8] sm:$0xff] %vm730_vm2, %v1336_v43  ;;  %1682 = vst.msk [vmem:[#allocation2 + $0x30] sm:$0xff] %vm730_vm2, %v1477_v36 }
 0x3bc   : > { %v5475_v53 = vpop.f32.mrf.mxu0  ;;  %v5492_v33 = vpop.f32.mrf.mxu1 }
 0x3be   : > { %v1429_v49 = vpop.f32.mrf.mxu0  ;;  %v1480_v45 = vpop.f32.mrf.mxu1 }
 0x3bf   : > { %1680 = vst.msk [vmem:[#allocation2 + $0x20] sm:$0xff] %vm730_vm2, %v1429_v49  ;;  %1683 = vst.msk [vmem:[#allocation2 + $0x38] sm:$0xff] %vm730_vm2, %v1480_v45 }
 0x3c0   : > { %v5486_v6 = vpop.f32.mrf.mxu0  ;;  %v5493_v17 = vpop.f32.mrf.mxu1 }
 0x3c2   : > { %v1432_v42 = vpop.f32.mrf.mxu0  ;;  %v1573_v23 = vpop.f32.mrf.mxu1 }
 0x3c3   : > { %1681 = vst.msk [vmem:[#allocation2 + $0x28] sm:$0xff] %vm730_vm2, %v1432_v42  ;;  %1686 = vst.msk [vmem:[#allocation2 + $0x50] sm:$0xff] %vm730_vm2, %v1573_v23 }
 0x3c4   : > { %v5487_v25 = vpop.f32.mrf.mxu0  ;;  %v5504_v29 = vpop.f32.mrf.mxu1 }
 0x3c6   : > { %v1525_v30 = vpop.f32.mrf.mxu0  ;;  %v1576_v13 = vpop.f32.mrf.mxu1 }
 0x3c7   : > { %1684 = vst.msk [vmem:[#allocation2 + $0x40] sm:$0xff] %vm730_vm2, %v1525_v30  ;;  %1687 = vst.msk [vmem:[#allocation2 + $0x58] sm:$0xff] %vm730_vm2, %v1576_v13 }
 0x3c8   : > { %v5498_v31 = vpop.f32.mrf.mxu0  ;;  %v5505_v44 = vpop.f32.mrf.mxu1 }
 0x3ca   : > { %v1528_v39 = vpop.f32.mrf.mxu0 }
 0x3cb   : > { %1685 = vst.msk [vmem:[#allocation2 + $0x48] sm:$0xff] %vm730_vm2, %v1528_v39 }
 0x3cc   : > { %v5499_v41 = vpop.f32.mrf.mxu0 }
 0x407   : > { %v1669_v56 = vpop.f32.mrf.mxu1 }
 0x408   : > { %1690 = vst.msk [vmem:[#allocation2 + $0x70] sm:$0xff] %vm730_vm2, %v1669_v56 }
 0x409   : > { %v5516_v50 = vpop.f32.mrf.mxu1 }
 0x40b   : > { %v1621_v9 = vpop.f32.mrf.mxu0  ;;  %v1672_v15 = vpop.f32.mrf.mxu1 }
 0x40c   : > { %1688 = vst.msk [vmem:[#allocation2 + $0x60] sm:$0xff] %vm730_vm2, %v1621_v9  ;;  %1691 = vst.msk [vmem:[#allocation2 + $0x78] sm:$0xff] %vm730_vm2, %v1672_v15 }
 0x40d   : > { %v5510_v63 = vpop.f32.mrf.mxu0  ;;  %v5517_v47 = vpop.f32.mrf.mxu1 }
 0x40f   : > { %v1624_v1 = vpop.f32.mrf.mxu0  ;;  %v1792_v55 = vpop.f32.mrf.mxu1 }
 0x410   : > { %1689 = vst.msk [vmem:[#allocation2 + $0x68] sm:$0xff] %vm730_vm2, %v1624_v1  ;;  %v6744_v62 = vadd.f32 %v6740_v26, %v1792_v55 }
 0x411   : > { %v5511_v11 = vpop.f32.mrf.mxu0  ;;  %v5528_v2 = vpop.f32.mrf.mxu1 }
 0x412   : > { %v2117_v10 = vsel %vm1107_vm3, %v6744_v62, -inf }
 0x413   : > { %2118 = vmax.xlane.f32.xlu0 %v2117_v10  ;;  %v1740_v46 = vpop.f32.mrf.mxu0  ;;  %v1795_v60 = vpop.f32.mrf.mxu1 }
 0x414   : > { %v6754_v3 = vadd.f32 %v6740_v26, %v1740_v46  ;;  %v6757_v12 = vadd.f32 %v6751_v51, %v1795_v60 }
 0x415   : > { %v5522_v8 = vpop.f32.mrf.mxu0  ;;  %v5529_v14 = vpop.f32.mrf.mxu1 }
 0x416   : > { %v2111_v27 = vsel %vm1107_vm3, %v6754_v3, -inf  ;;  %v2120_v40 = vsel %vm1107_vm3, %v6757_v12, -inf }
 0x417   : > { %v1896_v7 = vpop.f32.mrf.mxu1  ;;  %2112 = vmax.xlane.f32.xlu0 %v2111_v27  ;;  %v1743_v18 = vpop.f32.mrf.mxu0 }
 0x418   : > { %v6762_v22 = vadd.f32 %v6751_v51, %v1743_v18  ;;  %v6765_v20 = vadd.f32 %v6740_v26, %v1896_v7 }
 0x419   : > { %v5523_v58 = vpop.f32.mrf.mxu0  ;;  %v5540_v24 = vpop.f32.mrf.mxu1 }
 0x41a   : > { %v2114_v59 = vsel %vm1107_vm3, %v6762_v22, -inf  ;;  %v2129_v6 = vsel %vm1107_vm3, %v6765_v20, -inf }
 0x41b   : > { %v1899_v43 = vpop.f32.mrf.mxu1  ;;  %2121 = vmax.xlane.f32.xlu0 %v2120_v40  ;;  %2115 = vmax.xlane.f32.xlu1 %v2114_v59  ;;  %v1844_v36 = vpop.f32.mrf.mxu0 }
 0x41c   : > { %v6772_v53 = vadd.f32 %v6751_v51, %v1899_v43  ;;  %v6775_v45 = vadd.f32 %v6740_v26, %v1844_v36 }
 0x41d   : > { %v5534_v33 = vpop.f32.mrf.mxu0  ;;  %v5541_v49 = vpop.f32.mrf.mxu1 }
 0x41e   : > { %v2132_v17 = vsel %vm1107_vm3, %v6772_v53, -inf  ;;  %v2123_v31 = vsel %vm1107_vm3, %v6775_v45, -inf }
 0x41f   : > { %v2000_v42 = vpop.f32.mrf.mxu1  ;;  %2130 = vmax.xlane.f32.xlu0 %v2129_v6  ;;  %2133 = vmax.xlane.f32.xlu1 %v2132_v17  ;;  %v1847_v23 = vpop.f32.mrf.mxu0 }
 0x420   : > { %v6782_v25 = vadd.f32 %v6751_v51, %v1847_v23  ;;  %v6785_v13 = vadd.f32 %v6740_v26, %v2000_v42 }
 0x421   : > { %v5535_v29 = vpop.f32.mrf.mxu0  ;;  %v5552_v30 = vpop.f32.mrf.mxu1 }
 0x422   : > { %v2126_v44 = vsel %vm1107_vm3, %v6782_v25, -inf  ;;  %v2141_v63 = vsel %vm1107_vm3, %v6785_v13, -inf }
 0x423   : > { %v2003_v39 = vpop.f32.mrf.mxu1  ;;  %2124 = vmax.xlane.f32.xlu0 %v2123_v31  ;;  %2127 = vmax.xlane.f32.xlu1 %v2126_v44  ;;  %v1948_v41 = vpop.f32.mrf.mxu0 }
 0x424   : > { %v6792_v56 = vadd.f32 %v6751_v51, %v2003_v39  ;;  %v6795_v15 = vadd.f32 %v6740_v26, %v1948_v41 }
 0x425   : > { %v5546_v50 = vpop.f32.mrf.mxu0  ;;  %v5553_v9 = vpop.f32.mrf.mxu1 }
 0x426   : > { %v2144_v47 = vsel %vm1107_vm3, %v6792_v56, -inf  ;;  %v2135_v60 = vsel %vm1107_vm3, %v6795_v15, -inf }
 0x427   : > { %v2104_v1 = vpop.f32.mrf.mxu1  ;;  %2142 = vmax.xlane.f32.xlu0 %v2141_v63  ;;  %2145 = vmax.xlane.f32.xlu1 %v2144_v47  ;;  %v1951_v55 = vpop.f32.mrf.mxu0 }
 0x428   : > { %v6802_v11 = vadd.f32 %v6751_v51, %v1951_v55  ;;  %v6805_v46 = vadd.f32 %v6740_v26, %v2104_v1 }
 0x429   : > { %v5547_v2 = vpop.f32.mrf.mxu0  ;;  %v5564_v10 = vpop.f32.mrf.mxu1 }
 0x42a   : > { %v2138_v8 = vsel %vm1107_vm3, %v6802_v11, -inf  ;;  %v2153_v24 = vsel %vm1107_vm3, %v6805_v46, -inf }
 0x42b   : > { %v2107_v14 = vpop.f32.mrf.mxu1  ;;  %2136 = vmax.xlane.f32.xlu0 %v2135_v60  ;;  %2139 = vmax.xlane.f32.xlu1 %v2138_v8  ;;  %v2052_v27 = vpop.f32.mrf.mxu0 }
 0x42c   : > { %v6812_v58 = vadd.f32 %v6740_v26, %v2052_v27  ;;  %v6826_v26 = vadd.f32 %v6751_v51, %v2107_v14 }
 0x42d   : > { %v5558_v7 = vpop.f32.mrf.mxu0  ;;  %v5565_v18 = vpop.f32.mrf.mxu1 }
 0x42e   : > { %v2147_v43 = vsel %vm1107_vm3, %v6812_v58, -inf  ;;  %v2156_v33 = vsel %vm1107_vm3, %v6826_v26, -inf }
 0x42f   : > { %2154 = vmax.xlane.f32.xlu0 %v2153_v24  ;;  %v2055_v40 = vpop.f32.mrf.mxu0 }
 0x430   : > { %v6829_v36 = vadd.f32 %v6751_v51, %v2055_v40 }
 0x431   : > { %v5559_v59 = vpop.f32.mrf.mxu0 }
 0x432   : > { %v2150_v49 = vsel %vm1107_vm3, %v6829_v36, -inf }
 0x433   : > { %2148 = vmax.xlane.f32.xlu0 %v2147_v43 }
 0x43c   : > { %2342 = vrot.lane.b32.xlu1 %v6278_v0, %s6124_s22 }
 0x440   : > { %2389 = vrot.lane.b32.xlu1 %v6310_v34, %s6124_s22 }
 0x444   : > { %2436 = vrot.lane.b32.xlu1 %v6305_v28, %s6124_s22 }
 0x448   : > { %2530 = vrot.lane.b32.xlu1 %v6334_v48, %s6124_s22 }
 0x449   : > { %2295 = vrot.lane.b32.xlu0 %v6281_v4, %s6124_s22 }
 0x44d   : > { %2483 = vrot.lane.b32.xlu0 %v6338_v54, %s6124_s22 }
 0x451   : > { %2577 = vrot.lane.b32.xlu0 %v6370_v16, %s6124_s22 }
 0x46c   : > { %2157 = vmax.xlane.f32.xlu1 %v2156_v33 }
 0x470   : > { %2151 = vmax.xlane.f32.xlu1 %v2150_v49 }
 0x481   : > { %2624 = vrot.lane.b32.xlu1 %v6366_v5, %s6124_s22 }
 0x49c   : > { %v2119_v6 = vpop.xlane.xlu0 %2118 }
 0x49d   : > { %v2161_v17 = vsub.f32 %v6744_v62, %v2119_v6 }
 0x49f   : > { %v2179_v42 = vmul.f32 1.442695, %v2161_v17 }
 0x4a0   : > { %v2113_v23 = vpop.xlane.xlu0 %2112 }
 0x4a1   : > { %5920 = vpow2.f32 %v2179_v42  ;;  %v2159_v29 = vsub.f32 %v6754_v3, %v2113_v23 }
 0x4a3   : > { %v2175_v51 = vmul.f32 1.442695, %v2159_v29 }
 0x4a4   : > { %v2122_v30 = vpop.xlane.xlu0 %2121  ;;  %v2116_v31 = vpop.xlane.xlu1 %2115 }
 0x4a5   : > { %5922 = vpow2.f32 %v2175_v51  ;;  %v2162_v44 = vsub.f32 %v6757_v12, %v2122_v30  ;;  %v2160_v39 = vsub.f32 %v6762_v22, %v2116_v31 }
 0x4a7   : > { %v2181_v41 = vmul.f32 1.442695, %v2162_v44  ;;  %v2177_v50 = vmul.f32 1.442695, %v2160_v39 }
 0x4a8   : > { %v2131_v9 = vpop.xlane.xlu0 %2130  ;;  %v2134_v63 = vpop.xlane.xlu1 %2133 }
 0x4a9   : > { %5924 = vpow2.f32 %v2181_v41  ;;  %v2165_v62 = vsub.f32 %v6765_v20, %v2131_v9  ;;  %v2166_v47 = vsub.f32 %v6772_v53, %v2134_v63 }
 0x4aa   : > { %5926 = vpow2.f32 %v2177_v50 }
 0x4ab   : > { %v2187_v1 = vmul.f32 1.442695, %v2165_v62  ;;  %v2189_v3 = vmul.f32 1.442695, %v2166_v47 }
 0x4ac   : > { %v2125_v55 = vpop.xlane.xlu0 %2124  ;;  %v2128_v2 = vpop.xlane.xlu1 %2127 }
 0x4ad   : > { %5928 = vpow2.f32 %v2187_v1  ;;  %v2163_v10 = vsub.f32 %v6775_v45, %v2125_v55  ;;  %v2164_v12 = vsub.f32 %v6782_v25, %v2128_v2 }
 0x4ae   : > { %v6844_v22 = vpop.eup %5920  ;;  %5930 = vpow2.f32 %v2189_v3 }
 0x4af   : > { %v2183_v60 = vmul.f32 1.442695, %v2163_v10  ;;  %v2185_v8 = vmul.f32 1.442695, %v2164_v12  ;;  %v2213_v20 = vsel %vm1107_vm3, %v6844_v22, 0.0 }
 0x4b0   : > { %v2143_v14 = vpop.xlane.xlu0 %2142  ;;  %v2146_v53 = vpop.xlane.xlu1 %2145  ;;  %2214 = vadd.xlane.f32.xlu0 %v2213_v20 }
 0x4b1   : > { %5932 = vpow2.f32 %v2183_v60  ;;  %v2169_v27 = vsub.f32 %v6785_v13, %v2143_v14  ;;  %v2170_v7 = vsub.f32 %v6792_v56, %v2146_v53 }
 0x4b2   : > { %v6850_v18 = vpop.eup %5922  ;;  %5934 = vpow2.f32 %v2185_v8 }
 0x4b3   : > { %v2195_v45 = vmul.f32 1.442695, %v2169_v27  ;;  %v2197_v25 = vmul.f32 1.442695, %v2170_v7  ;;  %v2207_v24 = vsel %vm1107_vm3, %v6850_v18, 0.0 }
 0x4b4   : > { %v2137_v40 = vpop.xlane.xlu0 %2136  ;;  %v2140_v59 = vpop.xlane.xlu1 %2139  ;;  %2208 = vadd.xlane.f32.xlu0 %v2207_v24 }
 0x4b5   : > { %5936 = vpow2.f32 %v2195_v45  ;;  %v2167_v43 = vsub.f32 %v6795_v15, %v2137_v40  ;;  %v2168_v33 = vsub.f32 %v6802_v11, %v2140_v59 }
 0x4b6   : > { %v6856_v49 = vpop.eup %5924  ;;  %5938 = vpow2.f32 %v2197_v25 }
 0x4b7   : > { %v2191_v13 = vmul.f32 1.442695, %v2167_v43  ;;  %v2193_v56 = vmul.f32 1.442695, %v2168_v33  ;;  %v2216_v6 = vsel %vm1107_vm3, %v6856_v49, 0.0  ;;  %v6860_v17 = vpop.eup %5926 }
 0x4b8   : > { %v2155_v42 = vpop.xlane.xlu0 %2154  ;;  %v2343_v23 = vpop.permute.xlu1 %2342  ;;  %2217 = vadd.xlane.f32.xlu1 %v2216_v6  ;;  %v2210_v30 = vsel %vm1107_vm3, %v6860_v17, 0.0 }
 0x4b9   : > { %5940 = vpow2.f32 %v2191_v13  ;;  %v2173_v29 = vsub.f32 %v6805_v46, %v2155_v42  ;;  %5573 = vmatpush3.bf16.msra.mxu1 %v2343_v23 }
 0x4ba   : > { %v6863_v15 = vpop.eup %5928  ;;  %5584 = vmatprep.subr.bf16.mxu1 %v7864_v52  ;;  %5942 = vpow2.f32 %v2193_v56 }
 0x4bb   : > { %v2203_v11 = vmul.f32 1.442695, %v2173_v29  ;;  %v2225_v51 = vsel %vm1107_vm3, %v6863_v15, 0.0  ;;  %v6870_v31 = vpop.eup %5930 }
 0x4bc   : > { %2226 = vadd.xlane.f32.xlu0 %v2225_v51  ;;  %v2149_v44 = vpop.xlane.xlu0 %2148  ;;  %2211 = vadd.xlane.f32.xlu1 %v2210_v30  ;;  %v2228_v9 = vsel %vm1107_vm3, %v6870_v31, 0.0  ;;  %v6910_v27 = vpop.permute.xlu1 %2389 }
 0x4bd   : > { %5944 = vpow2.f32 %v2203_v11  ;;  %v2171_v46 = vsub.f32 %v6812_v58, %v2149_v44 }
 0x4be   : > { %v6873_v39 = vpop.eup %5932 }
 0x4bf   : > { %v2199_v41 = vmul.f32 1.442695, %v2171_v46  ;;  %v2219_v50 = vsel %vm1107_vm3, %v6873_v39, 0.0  ;;  %v6879_v63 = vpop.eup %5934 }
 0x4c0   : > { %2220 = vadd.xlane.f32.xlu0 %v2219_v50  ;;  %v2296_v62 = vpop.permute.xlu0 %2295  ;;  %2229 = vadd.xlane.f32.xlu1 %v2228_v9  ;;  %v2222_v1 = vsel %vm1107_vm3, %v6879_v63, 0.0  ;;  %v2437_v7 = vpop.permute.xlu1 %2436 }
 0x4c1   : > { %5946 = vpow2.f32 %v2199_v41  ;;  %5567 = vmatpush3.bf16.msra.mxu0 %v2296_v62 }
 0x4c2   : > { %v6881_v47 = vpop.eup %5936  ;;  %5578 = vmatprep.subr.bf16.mxu0 %v7864_v52 }
 0x4c3   : > { %v2237_v58 = vsel %vm1107_vm3, %v6881_v47, 0.0  ;;  %v6888_v3 = vpop.eup %5938 }
 0x4c4   : > { %2238 = vadd.xlane.f32.xlu0 %v2237_v58  ;;  %2223 = vadd.xlane.f32.xlu1 %v2222_v1  ;;  %v2240_v10 = vsel %vm1107_vm3, %v6888_v3, 0.0  ;;  %v6918_v45 = vpop.permute.xlu1 %2530  ;;  %v6950_v6 = vpop.permute.xlu0 %2483 }
 0x4c6   : > { %v6890_v55 = vpop.eup %5940 }
 0x4c7   : > { %v2231_v2 = vsel %vm1107_vm3, %v6890_v55, 0.0  ;;  %v6896_v12 = vpop.eup %5942 }
 0x4c8   : > { %2232 = vadd.xlane.f32.xlu0 %v2231_v2  ;;  %2241 = vadd.xlane.f32.xlu1 %v2240_v10  ;;  %v2234_v20 = vsel %vm1107_vm3, %v6896_v12, 0.0  ;;  %v6956_v42 = vpop.permute.xlu0 %2577 }
 0x4ca   : > { %v6898_v60 = vpop.eup %5944 }
 0x4cb   : > { %v2249_v8 = vsel %vm1107_vm3, %v6898_v60, 0.0 }
 0x4cc   : > { %2250 = vadd.xlane.f32.xlu0 %v2249_v8  ;;  %2235 = vadd.xlane.f32.xlu1 %v2234_v20 }
 0x4ce   : > { %v6904_v14 = vpop.eup %5946 }
 0x4cf   : > { %v2243_v53 = vsel %vm1107_vm3, %v6904_v14, 0.0 }
 0x4d0   : > { %2244 = vadd.xlane.f32.xlu0 %v2243_v53 }
 0x4dd   : > { %2808 = vrot.lane.b32.xlu1 %v6278_v0, %s6125_s23 }
 0x4e6   : > { %2757 = vrot.lane.b32.xlu0 %v6281_v4, %s6125_s23 }
 0x4ea   : > { %2755 = vrot.lane.b32.xlu0 %v6313_v37, %s6125_s23 }
 0x4ee   : > { %2806 = vrot.lane.b32.xlu0 %v6308_v32, %s6125_s23 }
 0x4f2   : > { %2857 = vrot.lane.b32.xlu0 %v6343_v61, %s6125_s23 }
 0x4f5   : > { %v2158_v25 = vpop.xlane.xlu1 %2157 }
 0x4f6   : > { %v2174_v24 = vsub.f32 %v6826_v26, %v2158_v25  ;;  %2908 = vrot.lane.b32.xlu0 %v6340_v57, %s6125_s23 }
 0x4f8   : > { %v2205_v40 = vmul.f32 1.442695, %v2174_v24 }
 0x4f9   : > { %v2152_v59 = vpop.xlane.xlu1 %2151 }
 0x4fa   : > { %5948 = vpow2.f32 %v2205_v40  ;;  %v2172_v43 = vsub.f32 %v6829_v36, %v2152_v59  ;;  %2959 = vrot.lane.b32.xlu0 %v6375_v21, %s6125_s23 }
 0x4fc   : > { %v2201_v33 = vmul.f32 1.442695, %v2172_v43 }
 0x4fd   : > { %v6958_v29 = vpop.permute.xlu1 %2624 }
 0x4fe   : > { %5950 = vpow2.f32 %v2201_v33  ;;  %3010 = vrot.lane.b32.xlu0 %v6372_v19, %s6125_s23 }
 0x502   : > { %3061 = vrot.lane.b32.xlu0 %v6396_v38, %s6125_s23 }
 0x507   : > { %v6932_v26 = vpop.eup %5948 }
 0x508   : > { %v2252_v13 = vsel %vm1107_vm3, %v6932_v26, 0.0 }
 0x509   : > { %2253 = vadd.xlane.f32.xlu1 %v2252_v13 }
 0x50b   : > { %v6936_v56 = vpop.eup %5950 }
 0x50c   : > { %v2246_v36 = vsel %vm1107_vm3, %v6936_v56, 0.0 }
 0x50d   : > { %2247 = vadd.xlane.f32.xlu1 %v2246_v36 }
 0x51e   : > { %2859 = vrot.lane.b32.xlu1 %v6310_v34, %s6125_s23 }
 0x522   : > { %2910 = vrot.lane.b32.xlu1 %v6305_v28, %s6125_s23 }
 0x526   : > { %2961 = vrot.lane.b32.xlu1 %v6338_v54, %s6125_s23 }
 0x52a   : > { %3012 = vrot.lane.b32.xlu1 %v6334_v48, %s6125_s23 }
 0x52e   : > { %3063 = vrot.lane.b32.xlu1 %v6370_v16, %s6125_s23 }
 0x532   : > { %3114 = vrot.lane.b32.xlu1 %v6366_v5, %s6125_s23 }
 0x536   : > { %3112 = vrot.lane.b32.xlu1 %v6394_v35, %s6125_s23 }
 0x539   : > { %v2215_v23 = vpop.xlane.xlu0 %2214 }
 0x53a   : > { %5952 = vrcp.f32 %v2215_v23 }
 0x53d   : > { %v2209_v11 = vpop.xlane.xlu0 %2208 }
 0x541   : > { %v2218_v51 = vpop.xlane.xlu1 %2217 }
 0x542   : > { %5954 = vrcp.f32 %v2218_v51 }
 0x543   : > { %5956 = vrcp.f32 %v2209_v11 }
 0x545   : > { %v2227_v30 = vpop.xlane.xlu0 %2226  ;;  %v2212_v44 = vpop.xlane.xlu1 %2211 }
 0x546   : > { %5958 = vrcp.f32 %v2212_v44 }
 0x547   : > { %5960 = vrcp.f32 %v2227_v30  ;;  %v5953_v50 = vpop.eup %5952 }
 0x548   : > { %v2273_v1 = vmul.f32 %v5953_v50, %v6844_v22 }
 0x549   : > { %v2221_v46 = vpop.xlane.xlu0 %2220  ;;  %v2230_v41 = vpop.xlane.xlu1 %2229 }
 0x54a   : > { %5962 = vrcp.f32 %v2230_v41 }
 0x54b   : > { %5964 = vrcp.f32 %v2221_v46 }
 0x54d   : > { %v2239_v9 = vpop.xlane.xlu0 %2238  ;;  %v2224_v62 = vpop.xlane.xlu1 %2223 }
 0x54e   : > { %5966 = vrcp.f32 %v2224_v62 }
 0x54f   : > { %v5955_v58 = vpop.eup %5954  ;;  %5968 = vrcp.f32 %v2239_v9 }
 0x550   : > { %v2274_v2 = vmul.f32 %v5955_v58, %v6856_v49  ;;  %v5957_v8 = vpop.eup %5956 }
 0x551   : > { %v2242_v10 = vpop.xlane.xlu1 %2241  ;;  %v2233_v20 = vpop.xlane.xlu0 %2232  ;;  %v2271_v40 = vmul.f32 %v5957_v8, %v6850_v18 }
 0x552   : > { %v2288_v53 = vpack.c.bf16 %v2274_v2, %v2273_v1  ;;  %5970 = vrcp.f32 %v2242_v10 }
 0x553   : > { %v5959_v25 = vpop.eup %5958  ;;  %5972 = vrcp.f32 %v2233_v20 }
 0x554   : > { %5575 = vmatmul.mubr.msk.bf16.vlgmr.msra.gmra.mxu1 %vm1107_vm3, %v2288_v53  ;;  %v2272_v59 = vmul.f32 %v5959_v25, %v6860_v17  ;;  %v5961_v22 = vpop.eup %5960 }
 0x555   : > { %5585 = vmatpush3.bf16.msra.mxu1 %v2437_v7  ;;  %v2236_v24 = vpop.xlane.xlu1 %2235  ;;  %5586 = vmatprep.mubr.msk.bf16.mxu1 %vm6121_vm1, %v7864_v52  ;;  %v2277_v33 = vmul.f32 %v5961_v22, %v6863_v15 }
 0x556   : > { %5596 = vmatprep.subr.bf16.mxu1 %v7864_v52  ;;  %5974 = vrcp.f32 %v2236_v24  ;;  %v2287_v49 = vpack.c.bf16 %v2272_v59, %v2271_v40 }
 0x557   : > { %v5963_v43 = vpop.eup %5962 }
 0x558   : > { %5569 = vmatmul.mubr.msk.bf16.vlgmr.msra.gmra.mxu0 %vm1107_vm3, %v2287_v49  ;;  %v2278_v7 = vmul.f32 %v5963_v43, %v6870_v31  ;;  %v5965_v13 = vpop.eup %5964 }
 0x559   : > { %5579 = vmatpush3.bf16.msra.mxu0 %v6910_v27  ;;  %5580 = vmatprep.mubr.msk.bf16.mxu0 %vm6121_vm1, %v7864_v52  ;;  %v2275_v36 = vmul.f32 %v5965_v13, %v6873_v39 }
 0x55a   : > { %v2290_v18 = vpack.c.bf16 %v2278_v7, %v2277_v33  ;;  %5590 = vmatprep.subr.bf16.mxu0 %v7864_v52 }
 0x55b   : > { %v5967_v17 = vpop.eup %5966 }
 0x55c   : > { %5587 = vmatmul.mubr.msk.bf16.vlgmr.msra.gmra.mxu1 %vm1107_vm3, %v2290_v18  ;;  %v2276_v23 = vmul.f32 %v5967_v17, %v6879_v63  ;;  %v5969_v11 = vpop.eup %5968 }
 0x55d   : > { %5597 = vmatpush3.bf16.msra.mxu1 %v6918_v45  ;;  %5598 = vmatprep.mubr.msk.bf16.mxu1 %vm6121_vm1, %v7864_v52  ;;  %v2281_v27 = vmul.f32 %v5969_v11, %v6881_v47 }
 0x55e   : > { %v2289_v15 = vpack.c.bf16 %v2276_v23, %v2275_v36  ;;  %5608 = vmatprep.subr.bf16.mxu1 %v7864_v52 }
 0x55f   : > { %v5971_v31 = vpop.eup %5970 }
 0x560   : > { %5581 = vmatmul.mubr.msk.bf16.vlgmr.msra.gmra.mxu0 %vm1107_vm3, %v2289_v15  ;;  %v2282_v51 = vmul.f32 %v5971_v31, %v6888_v3  ;;  %v5973_v30 = vpop.eup %5972  ;;  %v2251_v3 = vpop.xlane.xlu0 %2250 }
 0x561   : > { %5591 = vmatpush3.bf16.msra.mxu0 %v6950_v6  ;;  %5592 = vmatprep.mubr.msk.bf16.mxu0 %vm6121_vm1, %v7864_v52  ;;  %v2279_v45 = vmul.f32 %v5973_v30, %v6890_v55  ;;  %v2809_v55 = vpop.permute.xlu1 %2808  ;;  %5976 = vrcp.f32 %v2251_v3 }
 0x562   : > { %v2292_v39 = vpack.c.bf16 %v2282_v51, %v2281_v27  ;;  %5602 = vmatprep.subr.bf16.mxu0 %v7864_v52  ;;  %v2814_v53 = vsel %vm730_vm2, %v2809_v55, 0 }
 0x563   : > { %v5975_v63 = vpop.eup %5974 }
 0x564   : > { %5599 = vmatmul.mubr.msk.bf16.vlgmr.msra.gmra.mxu1 %vm1107_vm3, %v2292_v39  ;;  %v2280_v44 = vmul.f32 %v5975_v63, %v6896_v12  ;;  %v2245_v12 = vpop.xlane.xlu0 %2244 }
 0x565   : > { %5609 = vmatpush3.bf16.msra.mxu1 %v6958_v29  ;;  %5610 = vmatprep.mubr.msk.bf16.mxu1 %vm6121_vm1, %v7864_v52 }
 0x566   : > { %v2291_v47 = vpack.c.bf16 %v2280_v44, %v2279_v45  ;;  %5620 = vmatprep.subr.bf16.mxu1 %v7864_v52 }
 0x568   : > { %5593 = vmatmul.mubr.msk.bf16.vlgmr.msra.gmra.mxu0 %vm1107_vm3, %v2291_v47  ;;  %v2758_v46 = vpop.permute.xlu0 %2757 }
 0x569   : > { %5603 = vmatpush3.bf16.msra.mxu0 %v6956_v42  ;;  %5604 = vmatprep.mubr.msk.bf16.mxu0 %vm6121_vm1, %v7864_v52  ;;  %v2763_v40 = vsel %vm730_vm2, %v2758_v46, 0 }
 0x56a   : > { %5614 = vmatprep.subr.bf16.mxu0 %v7864_v52 }
 0x56c   : > { %v2756_v9 = vpop.permute.xlu0 %2755 }
 0x56e   : > { %v5977_v50 = vpop.eup %5976 }
 0x56f   : > { %v2285_v42 = vmul.f32 %v5977_v50, %v6898_v60 }
 0x570   : > { %v2807_v20 = vpop.permute.xlu0 %2806 }
 0x574   : > { %v2858_v59 = vpop.permute.xlu0 %2857 }
 0x578   : > { %v2909_v22 = vpop.permute.xlu0 %2908 }
 0x57c   : > { %v2960_v7 = vpop.permute.xlu0 %2959 }
 0x580   : > { %v3011_v17 = vpop.permute.xlu0 %3010 }
 0x584   : > { %v3062_v15 = vpop.permute.xlu0 %3061 }
 0x592   : > { %v2254_v6 = vpop.xlane.xlu1 %2253 }
 0x593   : > { %5978 = vrcp.f32 %v2254_v6 }
 0x594   : > { %5980 = vrcp.f32 %v2245_v12 }
 0x596   : > { %v2248_v29 = vpop.xlane.xlu1 %2247 }
 0x597   : > { %5982 = vrcp.f32 %v2248_v29 }
 0x59a   : > { %v2860_v41 = vpop.permute.xlu1 %2859 }
 0x59b   : > { %v2865_v49 = vsel %vm730_vm2, %v2860_v41, 0 }
 0x59e   : > { %v2911_v2 = vpop.permute.xlu1 %2910 }
 0x5a0   : > { %v5979_v62 = vpop.eup %5978 }
 0x5a1   : > { %v2286_v58 = vmul.f32 %v5979_v62, %v6932_v26  ;;  %v5981_v1 = vpop.eup %5980 }
 0x5a2   : > { %v2283_v25 = vmul.f32 %v5981_v1, %v6904_v14  ;;  %v2962_v26 = vpop.permute.xlu1 %2961  ;;  %v2916_v14 = vsel %vm730_vm2, %v2911_v2, 0 }
 0x5a3   : > { %v2294_v10 = vpack.c.bf16 %v2286_v58, %v2285_v42  ;;  %v2967_v13 = vsel %vm730_vm2, %v2962_v26, 0  ;;  %v7084_v26 = vld [vmem:[%s7862_s8 + $0x20] sm:$0xff] }
 0x5a4   : > { %v5983_v8 = vpop.eup %5982 }
 0x5a5   : > { %5611 = vmatmul.mubr.msk.bf16.vlgmr.msra.gmra.mxu1 %vm1107_vm3, %v2294_v10  ;;  %v2284_v24 = vmul.f32 %v5983_v8, %v6936_v56 }
 0x5a6   : > { %5621 = vmatpush3.bf16.xpose.msra.mxu1 %v2814_v53  ;;  %5622 = vmatprep.mubr.msk.bf16.mxu1 %vm6121_vm1, %v7864_v52  ;;  %v3013_v56 = vpop.permute.xlu1 %3012 }
 0x5a7   : > { %v2293_v60 = vpack.c.bf16 %v2284_v24, %v2283_v25  ;;  %5632 = vmatprep.subr.bf16.mxu1 %v7864_v52  ;;  %v3018_v33 = vsel %vm730_vm2, %v3013_v56, 0 }
 0x5a9   : > { %5605 = vmatmul.mubr.msk.bf16.vlgmr.msra.gmra.mxu0 %vm1107_vm3, %v2293_v60 }
 0x5aa   : > { %5615 = vmatpush3.bf16.xpose.msra.mxu0 %v2763_v40  ;;  %5616 = vmatprep.mubr.msk.bf16.mxu0 %vm6121_vm1, %v7864_v52  ;;  %v3064_v43 = vpop.permute.xlu1 %3063 }
 0x5ab   : > { %5626 = vmatprep.subr.bf16.mxu0 %v7864_v52  ;;  %v3069_v23 = vsel %vm730_vm2, %v3064_v43, 0 }
 0x5ad   : > { %5623 = vmatmul.mubr.msk.bf16.vlgmr.msra.gmra.mxu1 %vm730_vm2, %v2807_v20 }
 0x5ae   : > { %5633 = vmatpush3.bf16.xpose.msra.mxu1 %v2916_v14  ;;  %5634 = vmatprep.mubr.msk.bf16.mxu1 %vm6121_vm1, %v7864_v52  ;;  %v3115_v18 = vpop.permute.xlu1 %3114 }
 0x5af   : > { %5644 = vmatprep.subr.bf16.mxu1 %v7864_v52  ;;  %v3120_v36 = vsel %vm730_vm2, %v3115_v18, 0 }
 0x5b1   : > { %5617 = vmatmul.mubr.msk.bf16.vlgmr.msra.gmra.mxu0 %vm730_vm2, %v2756_v9 }
 0x5b2   : > { %5627 = vmatpush3.bf16.xpose.msra.mxu0 %v2865_v49  ;;  %5628 = vmatprep.mubr.msk.bf16.mxu0 %vm6121_vm1, %v7864_v52  ;;  %v3113_v11 = vpop.permute.xlu1 %3112 }
 0x5b3   : > { %5638 = vmatprep.subr.bf16.mxu0 %v7864_v52 }
 0x5b5   : > { %5635 = vmatmul.mubr.msk.bf16.vlgmr.msra.gmra.mxu1 %vm730_vm2, %v2909_v22 }
 0x5b6   : > { %5645 = vmatpush3.bf16.xpose.msra.mxu1 %v3018_v33  ;;  %5646 = vmatprep.mubr.msk.bf16.mxu1 %vm6121_vm1, %v7864_v52  ;;  %v7096_v33 = vld [vmem:[%s7862_s8 + $0x28] sm:$0xff] }
 0x5b7   : > { %5656 = vmatprep.subr.bf16.mxu1 %v7864_v52 }
 0x5b9   : > { %5629 = vmatmul.mubr.msk.bf16.vlgmr.msra.gmra.mxu0 %vm730_vm2, %v2858_v59 }
 0x5ba   : > { %5639 = vmatpush3.bf16.xpose.msra.mxu0 %v2967_v13  ;;  %5640 = vmatprep.mubr.msk.bf16.mxu0 %vm6121_vm1, %v7864_v52 }
 0x5bb   : > { %5650 = vmatprep.subr.bf16.mxu0 %v7864_v52 }
 0x5bd   : > { %5647 = vmatmul.mubr.msk.bf16.vlgmr.msra.gmra.mxu1 %vm730_vm2, %v3011_v17 }
 0x5be   : > { %5657 = vmatpush3.bf16.xpose.msra.mxu1 %v3120_v36  ;;  %5658 = vmatprep.mubr.msk.bf16.mxu1 %vm6121_vm1, %v7864_v52 }
 0x5bf   : > { %5668 = vmatprep.subr.bf16.mxu1 %v7864_v52 }
 0x5c1   : > { %5641 = vmatmul.mubr.msk.bf16.vlgmr.msra.gmra.mxu0 %vm730_vm2, %v2960_v7 }
 0x5c2   : > { %5651 = vmatpush3.bf16.xpose.msra.mxu0 %v3069_v23  ;;  %5652 = vmatprep.mubr.msk.bf16.mxu0 %vm6121_vm1, %v7864_v52 }
 0x5c3   : > { %5662 = vmatprep.subr.bf16.mxu0 %v7864_v52 }
 0x5c5   : > { %5659 = vmatmul.mubr.msk.bf16.vlgmr.msra.gmra.mxu1 %vm730_vm2, %v3113_v11 }
 0x5c6   : > { %5670 = vmatprep.mubr.msk.bf16.mxu1 %vm6121_vm1, %v7864_v52 }
 0x5c9   : > { %5653 = vmatmul.mubr.msk.bf16.vlgmr.msra.gmra.mxu0 %vm730_vm2, %v3062_v15 }
 0x5ca   : > { %5664 = vmatprep.mubr.msk.bf16.mxu0 %vm6121_vm1, %v7864_v52 }
 0x614   : > { %v7051_v31 = vpop.f32.mrf.mxu1 }
 0x616   : > { %v5576_v27 = vpop.f32.mrf.mxu1 }
 0x618   : > { %v7053_v51 = vpop.f32.mrf.mxu1  ;;  %v7055_v30 = vpop.f32.mrf.mxu0 }
 0x61a   : > { %v5577_v39 = vpop.f32.mrf.mxu1  ;;  %v5570_v63 = vpop.f32.mrf.mxu0 }
 0x61c   : > { %v7057_v45 = vpop.f32.mrf.mxu0  ;;  %v7059_v44 = vpop.f32.mrf.mxu1 }
 0x61e   : > { %v5571_v47 = vpop.f32.mrf.mxu0  ;;  %v5588_v3 = vpop.f32.mrf.mxu1 }
 0x620   : > { %v7061_v55 = vpop.f32.mrf.mxu0  ;;  %v7063_v12 = vpop.f32.mrf.mxu1 }
 0x622   : > { %v5582_v6 = vpop.f32.mrf.mxu0  ;;  %v5589_v29 = vpop.f32.mrf.mxu1 }
 0x624   : > { %v7065_v46 = vpop.f32.mrf.mxu0  ;;  %v7067_v41 = vpop.f32.mrf.mxu1 }
 0x626   : > { %v5583_v50 = vpop.f32.mrf.mxu0  ;;  %v5600_v9 = vpop.f32.mrf.mxu1 }
 0x628   : > { %v7069_v62 = vpop.f32.mrf.mxu0  ;;  %v7071_v42 = vpop.f32.mrf.mxu1 }
 0x62a   : > { %v5594_v58 = vpop.f32.mrf.mxu0  ;;  %v5601_v1 = vpop.f32.mrf.mxu1 }
 0x62c   : > { %v7073_v2 = vpop.f32.mrf.mxu0 }
 0x62e   : > { %v5595_v10 = vpop.f32.mrf.mxu0 }
 0x665   : > { %v7075_v8 = vpop.f32.mrf.mxu1 }
 0x667   : > { %v5612_v20 = vpop.f32.mrf.mxu1 }
 0x669   : > { %v7077_v53 = vpop.f32.mrf.mxu0  ;;  %v7079_v25 = vpop.f32.mrf.mxu1 }
 0x66b   : > { %v5606_v24 = vpop.f32.mrf.mxu0  ;;  %v5613_v60 = vpop.f32.mrf.mxu1 }
 0x66d   : > { %v7086_v40 = vpop.f32.mrf.mxu0  ;;  %v2850_v59 = vpop.f32.mrf.mxu1 }
 0x66e   : > { %v7089_v14 = vadd.f32 %v7084_v26, %v2850_v59 }
 0x66f   : > { %v5607_v56 = vpop.f32.mrf.mxu0  ;;  %v5624_v22 = vpop.f32.mrf.mxu1 }
 0x670   : > { %v3169_v49 = vsel %vm1107_vm3, %v7089_v14, -inf }
 0x671   : > { %3170 = vmax.xlane.f32.xlu0 %v3169_v49  ;;  %v2799_v43 = vpop.f32.mrf.mxu0  ;;  %v2853_v7 = vpop.f32.mrf.mxu1 }
 0x672   : > { %v7099_v13 = vadd.f32 %v7084_v26, %v2799_v43  ;;  %v7102_v36 = vadd.f32 %v7096_v33, %v2853_v7 }
 0x673   : > { %v5618_v18 = vpop.f32.mrf.mxu0  ;;  %v5625_v17 = vpop.f32.mrf.mxu1 }
 0x674   : > { %v3163_v23 = vsel %vm1107_vm3, %v7099_v13, -inf  ;;  %v3172_v3 = vsel %vm1107_vm3, %v7102_v36, -inf }
 0x675   : > { %v2952_v11 = vpop.f32.mrf.mxu1  ;;  %3164 = vmax.xlane.f32.xlu0 %v3163_v23  ;;  %v2802_v15 = vpop.f32.mrf.mxu0 }
 0x676   : > { %v7107_v27 = vadd.f32 %v7096_v33, %v2802_v15  ;;  %v7110_v47 = vadd.f32 %v7084_v26, %v2952_v11 }
 0x677   : > { %v5619_v39 = vpop.f32.mrf.mxu0  ;;  %v5636_v63 = vpop.f32.mrf.mxu1 }
 0x678   : > { %v3166_v6 = vsel %vm1107_vm3, %v7107_v27, -inf  ;;  %v3181_v20 = vsel %vm1107_vm3, %v7110_v47, -inf }
 0x679   : > { %v2955_v29 = vpop.f32.mrf.mxu1  ;;  %3173 = vmax.xlane.f32.xlu0 %v3172_v3  ;;  %3167 = vmax.xlane.f32.xlu1 %v3166_v6  ;;  %v2901_v50 = vpop.f32.mrf.mxu0 }
 0x67a   : > { %v7117_v9 = vadd.f32 %v7096_v33, %v2955_v29  ;;  %v7120_v10 = vadd.f32 %v7084_v26, %v2901_v50 }
 0x67b   : > { %v5630_v58 = vpop.f32.mrf.mxu0  ;;  %v5637_v1 = vpop.f32.mrf.mxu1 }
 0x67c   : > { %v3184_v24 = vsel %vm1107_vm3, %v7117_v9, -inf  ;;  %v3175_v7 = vsel %vm1107_vm3, %v7120_v10, -inf }
 0x67d   : > { %v3054_v60 = vpop.f32.mrf.mxu1  ;;  %3182 = vmax.xlane.f32.xlu0 %v3181_v20  ;;  %3185 = vmax.xlane.f32.xlu1 %v3184_v24  ;;  %v2904_v59 = vpop.f32.mrf.mxu0 }
 0x67e   : > { %v7127_v56 = vadd.f32 %v7096_v33, %v2904_v59  ;;  %v7130_v43 = vadd.f32 %v7084_v26, %v3054_v60 }
 0x67f   : > { %v5631_v22 = vpop.f32.mrf.mxu0  ;;  %v5648_v49 = vpop.f32.mrf.mxu1 }
 0x680   : > { %v3178_v18 = vsel %vm1107_vm3, %v7127_v56, -inf  ;;  %v3193_v3 = vsel %vm1107_vm3, %v7130_v43, -inf }
 0x681   : > { %v3057_v17 = vpop.f32.mrf.mxu1  ;;  %3176 = vmax.xlane.f32.xlu0 %v3175_v7  ;;  %3179 = vmax.xlane.f32.xlu1 %v3178_v18  ;;  %v3003_v23 = vpop.f32.mrf.mxu0 }
 0x682   : > { %v7137_v11 = vadd.f32 %v7096_v33, %v3057_v17  ;;  %v7140_v63 = vadd.f32 %v7084_v26, %v3003_v23 }
 0x683   : > { %v5642_v15 = vpop.f32.mrf.mxu0  ;;  %v5649_v39 = vpop.f32.mrf.mxu1 }
 0x684   : > { %v3196_v6 = vsel %vm1107_vm3, %v7137_v11, -inf  ;;  %v3187_v60 = vsel %vm1107_vm3, %v7140_v63, -inf }
 0x685   : > { %v3156_v29 = vpop.f32.mrf.mxu1  ;;  %3194 = vmax.xlane.f32.xlu0 %v3193_v3  ;;  %3197 = vmax.xlane.f32.xlu1 %v3196_v6  ;;  %v3006_v50 = vpop.f32.mrf.mxu0 }
 0x686   : > { %v7147_v58 = vadd.f32 %v7096_v33, %v3006_v50  ;;  %v7150_v24 = vadd.f32 %v7084_v26, %v3156_v29 }
 0x687   : > { %v5643_v1 = vpop.f32.mrf.mxu0  ;;  %v5660_v20 = vpop.f32.mrf.mxu1 }
 0x688   : > { %v3190_v59 = vsel %vm1107_vm3, %v7147_v58, -inf  ;;  %v3205_v23 = vsel %vm1107_vm3, %v7150_v24, -inf }
 0x689   : > { %v3159_v22 = vpop.f32.mrf.mxu1  ;;  %3188 = vmax.xlane.f32.xlu0 %v3187_v60  ;;  %3191 = vmax.xlane.f32.xlu1 %v3190_v59  ;;  %v3105_v49 = vpop.f32.mrf.mxu0 }
 0x68a   : > { %v7157_v17 = vadd.f32 %v7084_v26, %v3105_v49  ;;  %v7171_v26 = vadd.f32 %v7096_v33, %v3159_v22 }
 0x68b   : > { %v5654_v7 = vpop.f32.mrf.mxu0  ;;  %v5661_v18 = vpop.f32.mrf.mxu1 }
 0x68c   : > { %v3199_v3 = vsel %vm1107_vm3, %v7157_v17, -inf  ;;  %v3208_v29 = vsel %vm1107_vm3, %v7171_v26, -inf }
 0x68d   : > { %3206 = vmax.xlane.f32.xlu0 %v3205_v23  ;;  %v3108_v15 = vpop.f32.mrf.mxu0 }
 0x68e   : > { %v7174_v6 = vadd.f32 %v7096_v33, %v3108_v15 }
 0x68f   : > { %v5655_v39 = vpop.f32.mrf.mxu0 }
 0x690   : > { %v3202_v50 = vsel %vm1107_vm3, %v7174_v6, -inf }
 0x691   : > { %3200 = vmax.xlane.f32.xlu0 %v3199_v3 }
 0x69a   : > { %3394 = vrot.lane.b32.xlu1 %v6278_v0, %s6126_s28 }
 0x69e   : > { %3441 = vrot.lane.b32.xlu1 %v6310_v34, %s6126_s28 }
 0x6a2   : > { %3488 = vrot.lane.b32.xlu1 %v6305_v28, %s6126_s28 }
 0x6a6   : > { %3582 = vrot.lane.b32.xlu1 %v6334_v48, %s6126_s28 }
 0x6a7   : > { %3347 = vrot.lane.b32.xlu0 %v6281_v4, %s6126_s28 }
 0x6ab   : > { %3535 = vrot.lane.b32.xlu0 %v6338_v54, %s6126_s28 }
 0x6af   : > { %3629 = vrot.lane.b32.xlu0 %v6370_v16, %s6126_s28 }
 0x6ca   : > { %3209 = vmax.xlane.f32.xlu1 %v3208_v29 }
 0x6ce   : > { %3203 = vmax.xlane.f32.xlu1 %v3202_v50 }
 0x6df   : > { %3676 = vrot.lane.b32.xlu1 %v6366_v5, %s6126_s28 }
 0x6fa   : > { %v3171_v1 = vpop.xlane.xlu0 %3170 }
 0x6fb   : > { %v3213_v20 = vsub.f32 %v7089_v14, %v3171_v1 }
 0x6fd   : > { %v3231_v60 = vmul.f32 1.442695, %v3213_v20 }
 0x6fe   : > { %v3165_v59 = vpop.xlane.xlu0 %3164 }
 0x6ff   : > { %5984 = vpow2.f32 %v3231_v60  ;;  %v3211_v22 = vsub.f32 %v7099_v13, %v3165_v59 }
 0x701   : > { %v3227_v33 = vmul.f32 1.442695, %v3211_v22 }
 0x702   : > { %v3174_v49 = vpop.xlane.xlu0 %3173  ;;  %v3168_v7 = vpop.xlane.xlu1 %3167 }
 0x703   : > { %5986 = vpow2.f32 %v3227_v33  ;;  %v3214_v18 = vsub.f32 %v7102_v36, %v3174_v49  ;;  %v3212_v23 = vsub.f32 %v7107_v27, %v3168_v7 }
 0x705   : > { %v3233_v15 = vmul.f32 1.442695, %v3214_v18  ;;  %v3229_v39 = vmul.f32 1.442695, %v3212_v23 }
 0x706   : > { %v3183_v3 = vpop.xlane.xlu0 %3182  ;;  %v3186_v29 = vpop.xlane.xlu1 %3185 }
 0x707   : > { %5988 = vpow2.f32 %v3233_v15  ;;  %v3217_v14 = vsub.f32 %v7110_v47, %v3183_v3  ;;  %v3218_v50 = vsub.f32 %v7117_v9, %v3186_v29 }
 0x708   : > { %5990 = vpow2.f32 %v3229_v39 }
 0x709   : > { %v3239_v1 = vmul.f32 1.442695, %v3217_v14  ;;  %v3241_v13 = vmul.f32 1.442695, %v3218_v50 }
 0x70a   : > { %v3177_v20 = vpop.xlane.xlu0 %3176  ;;  %v3180_v60 = vpop.xlane.xlu1 %3179 }
 0x70b   : > { %5992 = vpow2.f32 %v3239_v1  ;;  %v3215_v59 = vsub.f32 %v7120_v10, %v3177_v20  ;;  %v3216_v36 = vsub.f32 %v7127_v56, %v3180_v60 }
 0x70c   : > { %v7189_v27 = vpop.eup %5984  ;;  %5994 = vpow2.f32 %v3241_v13 }
 0x70d   : > { %v3235_v22 = vmul.f32 1.442695, %v3215_v59  ;;  %v3237_v33 = vmul.f32 1.442695, %v3216_v36  ;;  %v3265_v47 = vsel %vm1107_vm3, %v7189_v27, 0.0 }
 0x70e   : > { %v3195_v49 = vpop.xlane.xlu0 %3194  ;;  %v3198_v9 = vpop.xlane.xlu1 %3197  ;;  %3266 = vadd.xlane.f32.xlu0 %v3265_v47 }
 0x70f   : > { %5996 = vpow2.f32 %v3235_v22  ;;  %v3221_v7 = vsub.f32 %v7130_v43, %v3195_v49  ;;  %v3222_v18 = vsub.f32 %v7137_v11, %v3198_v9 }
 0x710   : > { %v7195_v23 = vpop.eup %5986  ;;  %5998 = vpow2.f32 %v3237_v33 }
 0x711   : > { %v3247_v10 = vmul.f32 1.442695, %v3221_v7  ;;  %v3249_v56 = vmul.f32 1.442695, %v3222_v18  ;;  %v3259_v15 = vsel %vm1107_vm3, %v7195_v23, 0.0 }
 0x712   : > { %v3189_v39 = vpop.xlane.xlu0 %3188  ;;  %v3192_v3 = vpop.xlane.xlu1 %3191  ;;  %3260 = vadd.xlane.f32.xlu0 %v3259_v15 }
 0x713   : > { %6000 = vpow2.f32 %v3247_v10  ;;  %v3219_v29 = vsub.f32 %v7140_v63, %v3189_v39  ;;  %v3220_v14 = vsub.f32 %v7147_v58, %v3192_v3 }
 0x714   : > { %v7201_v50 = vpop.eup %5988  ;;  %6002 = vpow2.f32 %v3249_v56 }
 0x715   : > { %v3243_v43 = vmul.f32 1.442695, %v3219_v29  ;;  %v3245_v11 = vmul.f32 1.442695, %v3220_v14  ;;  %v3268_v1 = vsel %vm1107_vm3, %v7201_v50, 0.0  ;;  %v7205_v13 = vpop.eup %5990 }
 0x716   : > { %v3207_v20 = vpop.xlane.xlu0 %3206  ;;  %v3395_v60 = vpop.permute.xlu1 %3394  ;;  %3269 = vadd.xlane.f32.xlu1 %v3268_v1  ;;  %v3262_v22 = vsel %vm1107_vm3, %v7205_v13, 0.0 }
 0x717   : > { %6004 = vpow2.f32 %v3243_v43  ;;  %v3225_v59 = vsub.f32 %v7150_v24, %v3207_v20  ;;  %5669 = vmatpush3.bf16.msra.mxu1 %v3395_v60 }
 0x718   : > { %v7208_v63 = vpop.eup %5992  ;;  %5680 = vmatprep.subr.bf16.mxu1 %v7864_v52  ;;  %6006 = vpow2.f32 %v3245_v11 }
 0x719   : > { %v3255_v58 = vmul.f32 1.442695, %v3225_v59  ;;  %v3277_v36 = vsel %vm1107_vm3, %v7208_v63, 0.0  ;;  %v7215_v33 = vpop.eup %5994 }
 0x71a   : > { %3278 = vadd.xlane.f32.xlu0 %v3277_v36  ;;  %v3201_v47 = vpop.xlane.xlu0 %3200  ;;  %3263 = vadd.xlane.f32.xlu1 %v3262_v22  ;;  %v3280_v18 = vsel %vm1107_vm3, %v7215_v33, 0.0  ;;  %v7255_v36 = vpop.permute.xlu1 %3441 }
 0x71b   : > { %6008 = vpow2.f32 %v3255_v58  ;;  %v3223_v24 = vsub.f32 %v7157_v17, %v3201_v47 }
 0x71c   : > { %v7218_v49 = vpop.eup %5996 }
 0x71d   : > { %v3251_v9 = vmul.f32 1.442695, %v3223_v24  ;;  %v3271_v7 = vsel %vm1107_vm3, %v7218_v49, 0.0  ;;  %v7224_v10 = vpop.eup %5998 }
 0x71e   : > { %3272 = vadd.xlane.f32.xlu0 %v3271_v7  ;;  %v3348_v56 = vpop.permute.xlu0 %3347  ;;  %3281 = vadd.xlane.f32.xlu1 %v3280_v18  ;;  %v3274_v39 = vsel %vm1107_vm3, %v7224_v10, 0.0  ;;  %v3489_v22 = vpop.permute.xlu1 %3488 }
 0x71f   : > { %6010 = vpow2.f32 %v3251_v9  ;;  %5663 = vmatpush3.bf16.msra.mxu0 %v3348_v56 }
 0x720   : > { %v7226_v15 = vpop.eup %6000  ;;  %5674 = vmatprep.subr.bf16.mxu0 %v7864_v52 }
 0x721   : > { %v3289_v17 = vsel %vm1107_vm3, %v7226_v15, 0.0  ;;  %v7233_v3 = vpop.eup %6002 }
 0x722   : > { %3290 = vadd.xlane.f32.xlu0 %v3289_v17  ;;  %3275 = vadd.xlane.f32.xlu1 %v3274_v39  ;;  %v3292_v43 = vsel %vm1107_vm3, %v7233_v3, 0.0  ;;  %v7263_v47 = vpop.permute.xlu1 %3582 }
 0x724   : > { %v7235_v29 = vpop.eup %6004 }
 0x725   : > { %v3283_v14 = vsel %vm1107_vm3, %v7235_v29, 0.0  ;;  %v7241_v11 = vpop.eup %6006 }
 0x726   : > { %3284 = vadd.xlane.f32.xlu0 %v3283_v14  ;;  %3293 = vadd.xlane.f32.xlu1 %v3292_v43  ;;  %v3286_v60 = vsel %vm1107_vm3, %v7241_v11, 0.0 }
 0x728   : > { %v7243_v1 = vpop.eup %6008 }
 0x729   : > { %v3301_v20 = vsel %vm1107_vm3, %v7243_v1, 0.0 }
 0x72a   : > { %3302 = vadd.xlane.f32.xlu0 %v3301_v20  ;;  %3287 = vadd.xlane.f32.xlu1 %v3286_v60 }
 0x72c   : > { %v7249_v59 = vpop.eup %6010 }
 0x72d   : > { %v3295_v58 = vsel %vm1107_vm3, %v7249_v59, 0.0 }
 0x72e   : > { %3296 = vadd.xlane.f32.xlu0 %v3295_v58 }
 0x73b   : > { %3860 = vrot.lane.b32.xlu1 %v6278_v0, %s6127_s29 }
 0x744   : > { %3809 = vrot.lane.b32.xlu0 %v6281_v4, %s6127_s29 }
 0x748   : > { %3807 = vrot.lane.b32.xlu0 %v6313_v37, %s6127_s29 }
 0x74c   : > { %3858 = vrot.lane.b32.xlu0 %v6308_v32, %s6127_s29 }
 0x750   : > { %3909 = vrot.lane.b32.xlu0 %v6343_v61, %s6127_s29 }
 0x753   : > { %v3210_v24 = vpop.xlane.xlu1 %3209 }
 0x754   : > { %v3226_v9 = vsub.f32 %v7171_v26, %v3210_v24  ;;  %3960 = vrot.lane.b32.xlu0 %v6340_v57, %s6127_s29 }
 0x756   : > { %v3257_v7 = vmul.f32 1.442695, %v3226_v9 }
 0x757   : > { %v3204_v18 = vpop.xlane.xlu1 %3203 }
 0x758   : > { %6012 = vpow2.f32 %v3257_v7  ;;  %v3224_v37 = vsub.f32 %v7174_v6, %v3204_v18  ;;  %4011 = vrot.lane.b32.xlu0 %v6375_v21, %s6127_s29 }
 0x75a   : > { %v3253_v32 = vmul.f32 1.442695, %v3224_v37 }
 0x75b   : > { %v7303_v56 = vpop.permute.xlu1 %3676 }
 0x75c   : > { %6014 = vpow2.f32 %v3253_v32  ;;  %4062 = vrot.lane.b32.xlu0 %v6372_v19, %s6127_s29  ;;  %v7295_v19 = vpop.permute.xlu0 %3535 }
 0x760   : > { %4113 = vrot.lane.b32.xlu0 %v6396_v38, %s6127_s29  ;;  %v7301_v21 = vpop.permute.xlu0 %3629 }
 0x765   : > { %v7277_v61 = vpop.eup %6012 }
 0x766   : > { %v3304_v57 = vsel %vm1107_vm3, %v7277_v61, 0.0 }
 0x767   : > { %3305 = vadd.xlane.f32.xlu1 %v3304_v57 }
 0x769   : > { %v7281_v26 = vpop.eup %6014 }
 0x76a   : > { %v3298_v6 = vsel %vm1107_vm3, %v7281_v26, 0.0 }
 0x76b   : > { %3299 = vadd.xlane.f32.xlu1 %v3298_v6 }
 0x77c   : > { %3911 = vrot.lane.b32.xlu1 %v6310_v34, %s6127_s29 }
 0x780   : > { %3962 = vrot.lane.b32.xlu1 %v6305_v28, %s6127_s29 }
 0x784   : > { %4013 = vrot.lane.b32.xlu1 %v6338_v54, %s6127_s29 }
 0x788   : > { %4064 = vrot.lane.b32.xlu1 %v6334_v48, %s6127_s29 }
 0x78c   : > { %4115 = vrot.lane.b32.xlu1 %v6370_v16, %s6127_s29 }
 0x790   : > { %4166 = vrot.lane.b32.xlu1 %v6366_v5, %s6127_s29 }
 0x794   : > { %4164 = vrot.lane.b32.xlu1 %v6394_v35, %s6127_s29 }
 0x797   : > { %v3267_v38 = vpop.xlane.xlu0 %3266 }
 0x798   : > { %6016 = vrcp.f32 %v3267_v38 }
 0x79b   : > { %v3261_v17 = vpop.xlane.xlu0 %3260 }
 0x79f   : > { %v3270_v39 = vpop.xlane.xlu1 %3269 }
 0x7a0   : > { %6018 = vrcp.f32 %v3270_v39 }
 0x7a1   : > { %6020 = vrcp.f32 %v3261_v17 }
 0x7a3   : > { %v3279_v14 = vpop.xlane.xlu0 %3278  ;;  %v3264_v43 = vpop.xlane.xlu1 %3263 }
 0x7a4   : > { %6022 = vrcp.f32 %v3264_v43 }
 0x7a5   : > { %6024 = vrcp.f32 %v3279_v14  ;;  %v6017_v58 = vpop.eup %6016 }
 0x7a6   : > { %v3325_v7 = vmul.f32 %v6017_v58, %v7189_v27 }
 0x7a7   : > { %v3273_v20 = vpop.xlane.xlu0 %3272  ;;  %v3282_v60 = vpop.xlane.xlu1 %3281 }
 0x7a8   : > { %6026 = vrcp.f32 %v3282_v60 }
 0x7a9   : > { %6028 = vrcp.f32 %v3273_v20 }
 0x7ab   : > { %v3291_v35 = vpop.xlane.xlu0 %3290  ;;  %v3276_v24 = vpop.xlane.xlu1 %3275 }
 0x7ac   : > { %6030 = vrcp.f32 %v3276_v24 }
 0x7ad   : > { %v6019_v9 = vpop.eup %6018  ;;  %6032 = vrcp.f32 %v3291_v35 }
 0x7ae   : > { %v3326_v18 = vmul.f32 %v6019_v9, %v7201_v50  ;;  %v6021_v32 = vpop.eup %6020 }
 0x7af   : > { %v3294_v37 = vpop.xlane.xlu1 %3293  ;;  %v3285_v57 = vpop.xlane.xlu0 %3284  ;;  %v3323_v39 = vmul.f32 %v6021_v32, %v7195_v23 }
 0x7b0   : > { %v3340_v6 = vpack.c.bf16 %v3326_v18, %v3325_v7  ;;  %6034 = vrcp.f32 %v3294_v37 }
 0x7b1   : > { %v6023_v38 = vpop.eup %6022  ;;  %6036 = vrcp.f32 %v3285_v57 }
 0x7b2   : > { %5671 = vmatmul.mubr.msk.bf16.vlgmr.msra.gmra.mxu1 %vm1107_vm3, %v3340_v6  ;;  %v3324_v14 = vmul.f32 %v6023_v38, %v7205_v13  ;;  %v6025_v27 = vpop.eup %6024 }
 0x7b3   : > { %5681 = vmatpush3.bf16.msra.mxu1 %v3489_v22  ;;  %v3288_v17 = vpop.xlane.xlu1 %3287  ;;  %5682 = vmatprep.mubr.msk.bf16.mxu1 %vm6121_vm1, %v7864_v52  ;;  %v3329_v20 = vmul.f32 %v6025_v27, %v7208_v63 }
 0x7b4   : > { %5692 = vmatprep.subr.bf16.mxu1 %v7864_v52  ;;  %6038 = vrcp.f32 %v3288_v17  ;;  %v3339_v50 = vpack.c.bf16 %v3324_v14, %v3323_v39 }
 0x7b5   : > { %v6027_v43 = vpop.eup %6026 }
 0x7b6   : > { %5665 = vmatmul.mubr.msk.bf16.vlgmr.msra.gmra.mxu0 %vm1107_vm3, %v3339_v50  ;;  %v3330_v22 = vmul.f32 %v6027_v43, %v7215_v33  ;;  %v6029_v60 = vpop.eup %6028 }
 0x7b7   : > { %5675 = vmatpush3.bf16.msra.mxu0 %v7255_v36  ;;  %5676 = vmatprep.mubr.msk.bf16.mxu0 %vm6121_vm1, %v7864_v52  ;;  %v3327_v58 = vmul.f32 %v6029_v60, %v7218_v49 }
 0x7b8   : > { %v3342_v23 = vpack.c.bf16 %v3330_v22, %v3329_v20  ;;  %5686 = vmatprep.subr.bf16.mxu0 %v7864_v52 }
 0x7b9   : > { %v6031_v13 = vpop.eup %6030 }
 0x7ba   : > { %5683 = vmatmul.mubr.msk.bf16.vlgmr.msra.gmra.mxu1 %vm1107_vm3, %v3342_v23  ;;  %v3328_v35 = vmul.f32 %v6031_v13, %v7224_v10  ;;  %v6033_v24 = vpop.eup %6032 }
 0x7bb   : > { %5693 = vmatpush3.bf16.msra.mxu1 %v7263_v47  ;;  %5694 = vmatprep.mubr.msk.bf16.mxu1 %vm6121_vm1, %v7864_v52  ;;  %v3333_v36 = vmul.f32 %v6033_v24, %v7226_v15 }
 0x7bc   : > { %v3341_v63 = vpack.c.bf16 %v3328_v35, %v3327_v58  ;;  %5704 = vmatprep.subr.bf16.mxu1 %v7864_v52 }
 0x7bd   : > { %v6035_v33 = vpop.eup %6034 }
 0x7be   : > { %v3334_v9 = vmul.f32 %v6035_v33, %v7233_v3  ;;  %5677 = vmatmul.mubr.msk.bf16.vlgmr.msra.gmra.mxu0 %vm1107_vm3, %v3341_v63  ;;  %v6037_v7 = vpop.eup %6036 }
 0x7bf   : > { %5687 = vmatpush3.bf16.msra.mxu0 %v7295_v19  ;;  %5688 = vmatprep.mubr.msk.bf16.mxu0 %vm6121_vm1, %v7864_v52  ;;  %v3331_v47 = vmul.f32 %v6037_v7, %v7235_v29  ;;  %v3303_v29 = vpop.xlane.xlu0 %3302  ;;  %v3861_v19 = vpop.permute.xlu1 %3860 }
 0x7c0   : > { %v3344_v49 = vpack.c.bf16 %v3334_v9, %v3333_v36  ;;  %5698 = vmatprep.subr.bf16.mxu0 %v7864_v52  ;;  %6040 = vrcp.f32 %v3303_v29  ;;  %v3866_v20 = vsel %vm730_vm2, %v3861_v19, 0 }
 0x7c1   : > { %v6039_v10 = vpop.eup %6038 }
 0x7c2   : > { %5695 = vmatmul.mubr.msk.bf16.vlgmr.msra.gmra.mxu1 %vm1107_vm3, %v3344_v49  ;;  %v3332_v15 = vmul.f32 %v6039_v10, %v7241_v11 }
 0x7c3   : > { %5705 = vmatpush3.bf16.msra.mxu1 %v7303_v56  ;;  %5706 = vmatprep.mubr.msk.bf16.mxu1 %vm6121_vm1, %v7864_v52  ;;  %v3297_v11 = vpop.xlane.xlu0 %3296 }
 0x7c4   : > { %v3343_v3 = vpack.c.bf16 %v3332_v15, %v3331_v47  ;;  %5716 = vmatprep.subr.bf16.mxu1 %v7864_v52 }
 0x7c6   : > { %5689 = vmatmul.mubr.msk.bf16.vlgmr.msra.gmra.mxu0 %vm1107_vm3, %v3343_v3 }
 0x7c7   : > { %5699 = vmatpush3.bf16.msra.mxu0 %v7301_v21  ;;  %5700 = vmatprep.mubr.msk.bf16.mxu0 %vm6121_vm1, %v7864_v52  ;;  %v3810_v37 = vpop.permute.xlu0 %3809 }
 0x7c8   : > { %5710 = vmatprep.subr.bf16.mxu0 %v7864_v52  ;;  %v3815_v23 = vsel %vm730_vm2, %v3810_v37, 0 }
 0x7cb   : > { %v3808_v6 = vpop.permute.xlu0 %3807 }
 0x7cd   : > { %v6041_v57 = vpop.eup %6040 }
 0x7ce   : > { %v3337_v21 = vmul.f32 %v6041_v57, %v7243_v1 }
 0x7cf   : > { %v3859_v43 = vpop.permute.xlu0 %3858 }
 0x7d3   : > { %v3910_v13 = vpop.permute.xlu0 %3909 }
 0x7d7   : > { %v3961_v58 = vpop.permute.xlu0 %3960 }
 0x7db   : > { %v4012_v33 = vpop.permute.xlu0 %4011 }
 0x7df   : > { %v4063_v7 = vpop.permute.xlu0 %4062 }
 0x7e3   : > { %v4114_v15 = vpop.permute.xlu0 %4113 }
 0x7f0   : > { %v3306_v56 = vpop.xlane.xlu1 %3305 }
 0x7f1   : > { %6042 = vrcp.f32 %v3306_v56 }
 0x7f2   : > { %6044 = vrcp.f32 %v3297_v11 }
 0x7f4   : > { %v3300_v18 = vpop.xlane.xlu1 %3299 }
 0x7f5   : > { %6046 = vrcp.f32 %v3300_v18 }
 0x7f8   : > { %v3912_v32 = vpop.permute.xlu1 %3911 }
 0x7f9   : > { %v3917_v35 = vsel %vm730_vm2, %v3912_v32, 0 }
 0x7fc   : > { %v3963_v14 = vpop.permute.xlu1 %3962 }
 0x7fe   : > { %v6043_v38 = vpop.eup %6042 }
 0x7ff   : > { %v3338_v17 = vmul.f32 %v6043_v38, %v7277_v61  ;;  %v6045_v39 = vpop.eup %6044 }
 0x800   : > { %v3335_v22 = vmul.f32 %v6045_v39, %v7249_v59  ;;  %v4014_v61 = vpop.permute.xlu1 %4013  ;;  %v3968_v59 = vsel %vm730_vm2, %v3963_v14, 0 }
 0x801   : > { %v3346_v27 = vpack.c.bf16 %v3338_v17, %v3337_v21  ;;  %v4019_v36 = vsel %vm730_vm2, %v4014_v61, 0 }
 0x802   : > { %v6047_v50 = vpop.eup %6046 }
 0x803   : > { %5707 = vmatmul.mubr.msk.bf16.vlgmr.msra.gmra.mxu1 %vm1107_vm3, %v3346_v27  ;;  %v3336_v60 = vmul.f32 %v6047_v50, %v7281_v26 }
 0x804   : > { %5717 = vmatpush3.bf16.xpose.msra.mxu1 %v3866_v20  ;;  %5718 = vmatprep.mubr.msk.bf16.mxu1 %vm6121_vm1, %v7864_v52  ;;  %v4065_v26 = vpop.permute.xlu1 %4064 }
 0x805   : > { %v3345_v1 = vpack.c.bf16 %v3336_v60, %v3335_v22  ;;  %5728 = vmatprep.subr.bf16.mxu1 %v7864_v52  ;;  %v4070_v63 = vsel %vm730_vm2, %v4065_v26, 0 }
 0x807   : > { %5701 = vmatmul.mubr.msk.bf16.vlgmr.msra.gmra.mxu0 %vm1107_vm3, %v3345_v1 }
 0x808   : > { %5711 = vmatpush3.bf16.xpose.msra.mxu0 %v3815_v23  ;;  %5712 = vmatprep.mubr.msk.bf16.mxu0 %vm6121_vm1, %v7864_v52  ;;  %v4116_v24 = vpop.permute.xlu1 %4115 }
 0x809   : > { %5722 = vmatprep.subr.bf16.mxu0 %v7864_v52  ;;  %v4121_v10 = vsel %vm730_vm2, %v4116_v24, 0 }
 0x80b   : > { %5719 = vmatmul.mubr.msk.bf16.vlgmr.msra.gmra.mxu1 %vm730_vm2, %v3859_v43 }
 0x80c   : > { %5729 = vmatpush3.bf16.xpose.msra.mxu1 %v3968_v59  ;;  %5730 = vmatprep.mubr.msk.bf16.mxu1 %vm6121_vm1, %v7864_v52  ;;  %v4167_v9 = vpop.permute.xlu1 %4166 }
 0x80d   : > { %5740 = vmatprep.subr.bf16.mxu1 %v7864_v52  ;;  %v4172_v49 = vsel %vm730_vm2, %v4167_v9, 0 }
 0x80f   : > { %5713 = vmatmul.mubr.msk.bf16.vlgmr.msra.gmra.mxu0 %vm730_vm2, %v3808_v6 }
 0x810   : > { %5723 = vmatpush3.bf16.xpose.msra.mxu0 %v3917_v35  ;;  %5724 = vmatprep.mubr.msk.bf16.mxu0 %vm6121_vm1, %v7864_v52  ;;  %v4165_v47 = vpop.permute.xlu1 %4164 }
 0x811   : > { %5734 = vmatprep.subr.bf16.mxu0 %v7864_v52 }
 0x813   : > { %5731 = vmatmul.mubr.msk.bf16.vlgmr.msra.gmra.mxu1 %vm730_vm2, %v3961_v58 }
 0x814   : > { %5741 = vmatpush3.bf16.xpose.msra.mxu1 %v4070_v63  ;;  %5742 = vmatprep.mubr.msk.bf16.mxu1 %vm6121_vm1, %v7864_v52  ;;  %v7429_v63 = vld [vmem:[%s7862_s8 + $0x30] sm:$0xff] }
 0x815   : > { %5752 = vmatprep.subr.bf16.mxu1 %v7864_v52 }
 0x817   : > { %5725 = vmatmul.mubr.msk.bf16.vlgmr.msra.gmra.mxu0 %vm730_vm2, %v3910_v13 }
 0x818   : > { %5735 = vmatpush3.bf16.xpose.msra.mxu0 %v4019_v36  ;;  %5736 = vmatprep.mubr.msk.bf16.mxu0 %vm6121_vm1, %v7864_v52 }
 0x819   : > { %5746 = vmatprep.subr.bf16.mxu0 %v7864_v52 }
 0x81b   : > { %5743 = vmatmul.mubr.msk.bf16.vlgmr.msra.gmra.mxu1 %vm730_vm2, %v4063_v7 }
 0x81c   : > { %5753 = vmatpush3.bf16.xpose.msra.mxu1 %v4172_v49  ;;  %5754 = vmatprep.mubr.msk.bf16.mxu1 %vm6121_vm1, %v7864_v52 }
 0x81d   : > { %5764 = vmatprep.subr.bf16.mxu1 %v7864_v52 }
 0x81f   : > { %5737 = vmatmul.mubr.msk.bf16.vlgmr.msra.gmra.mxu0 %vm730_vm2, %v4012_v33 }
 0x820   : > { %5747 = vmatpush3.bf16.xpose.msra.mxu0 %v4121_v10  ;;  %5748 = vmatprep.mubr.msk.bf16.mxu0 %vm6121_vm1, %v7864_v52 }
 0x821   : > { %5758 = vmatprep.subr.bf16.mxu0 %v7864_v52 }
 0x823   : > { %5755 = vmatmul.mubr.msk.bf16.vlgmr.msra.gmra.mxu1 %vm730_vm2, %v4165_v47 }
 0x824   : > { %5766 = vmatprep.mubr.msk.bf16.mxu1 %vm6121_vm1, %v7864_v52 }
 0x827   : > { %5749 = vmatmul.mubr.msk.bf16.vlgmr.msra.gmra.mxu0 %vm730_vm2, %v4114_v15  ;;  %v7441_v15 = vld [vmem:[%s7862_s8 + $0x38] sm:$0xff] }
 0x828   : > { %5760 = vmatprep.mubr.msk.bf16.mxu0 %vm6121_vm1, %v7864_v52 }
 0x872   : > { %v7396_v3 = vpop.f32.mrf.mxu1 }
 0x874   : > { %v5672_v29 = vpop.f32.mrf.mxu1 }
 0x876   : > { %v7398_v19 = vpop.f32.mrf.mxu1  ;;  %v7400_v11 = vpop.f32.mrf.mxu0 }
 0x878   : > { %v5673_v56 = vpop.f32.mrf.mxu1  ;;  %v5666_v18 = vpop.f32.mrf.mxu0 }
 0x87a   : > { %v7402_v37 = vpop.f32.mrf.mxu0  ;;  %v7404_v32 = vpop.f32.mrf.mxu1 }
 0x87c   : > { %v5667_v57 = vpop.f32.mrf.mxu0  ;;  %v5684_v6 = vpop.f32.mrf.mxu1 }
 0x87e   : > { %v7406_v38 = vpop.f32.mrf.mxu0  ;;  %v7408_v21 = vpop.f32.mrf.mxu1 }
 0x880   : > { %v5678_v17 = vpop.f32.mrf.mxu0  ;;  %v5685_v39 = vpop.f32.mrf.mxu1 }
 0x882   : > { %v7410_v14 = vpop.f32.mrf.mxu0  ;;  %v7412_v27 = vpop.f32.mrf.mxu1 }
 0x884   : > { %v5679_v50 = vpop.f32.mrf.mxu0  ;;  %v5696_v43 = vpop.f32.mrf.mxu1 }
 0x886   : > { %v7414_v20 = vpop.f32.mrf.mxu0  ;;  %v7416_v22 = vpop.f32.mrf.mxu1 }
 0x888   : > { %v5690_v60 = vpop.f32.mrf.mxu0  ;;  %v5697_v1 = vpop.f32.mrf.mxu1 }
 0x88a   : > { %v7418_v61 = vpop.f32.mrf.mxu0 }
 0x88c   : > { %v5691_v23 = vpop.f32.mrf.mxu0 }
 0x8c3   : > { %v7420_v13 = vpop.f32.mrf.mxu1 }
 0x8c4   : > { %7866 = vst [vmem:[#allocation3_spill] sm:$0xff] %v7420_v13 }
 0x8c5   : > { %v5708_v59 = vpop.f32.mrf.mxu1 }
 0x8c7   : > { %v7422_v26 = vpop.f32.mrf.mxu0  ;;  %v7424_v58 = vpop.f32.mrf.mxu1 }
 0x8c8   : > { %7867 = vst [vmem:[#allocation4_spill] sm:$0xff] %v7424_v58 }
 0x8c9   : > { %v5702_v35 = vpop.f32.mrf.mxu0  ;;  %v5709_v24 = vpop.f32.mrf.mxu1 }
 0x8cb   : > { %v7431_v33 = vpop.f32.mrf.mxu0  ;;  %v3902_v36 = vpop.f32.mrf.mxu1 }
 0x8cc   : > { %v7434_v9 = vadd.f32 %v7429_v63, %v3902_v36 }
 0x8cd   : > { %v5703_v7 = vpop.f32.mrf.mxu0  ;;  %v5720_v49 = vpop.f32.mrf.mxu1 }
 0x8ce   : > { %v4221_v10 = vsel %vm1107_vm3, %v7434_v9, -inf }
 0x8cf   : > { %4222 = vmax.xlane.f32.xlu0 %v4221_v10  ;;  %v3851_v47 = vpop.f32.mrf.mxu0  ;;  %v3905_v29 = vpop.f32.mrf.mxu1 }
 0x8d0   : > { %v7444_v56 = vadd.f32 %v7429_v63, %v3851_v47  ;;  %v7447_v6 = vadd.f32 %v7441_v15, %v3905_v29 }
 0x8d1   : > { %v5714_v18 = vpop.f32.mrf.mxu0  ;;  %v5721_v57 = vpop.f32.mrf.mxu1 }
 0x8d2   : > { %v4215_v17 = vsel %vm1107_vm3, %v7444_v56, -inf  ;;  %v4224_v59 = vsel %vm1107_vm3, %v7447_v6, -inf }
 0x8d3   : > { %v4004_v39 = vpop.f32.mrf.mxu1  ;;  %4216 = vmax.xlane.f32.xlu0 %v4215_v17  ;;  %v3854_v50 = vpop.f32.mrf.mxu0 }
 0x8d4   : > { %v7452_v43 = vadd.f32 %v7441_v15, %v3854_v50  ;;  %v7455_v23 = vadd.f32 %v7429_v63, %v4004_v39 }
 0x8d5   : > { %v5715_v60 = vpop.f32.mrf.mxu0  ;;  %v5732_v1 = vpop.f32.mrf.mxu1 }
 0x8d6   : > { %v4218_v35 = vsel %vm1107_vm3, %v7452_v43, -inf  ;;  %v4233_v29 = vsel %vm1107_vm3, %v7455_v23, -inf }
 0x8d7   : > { %v4007_v24 = vpop.f32.mrf.mxu1  ;;  %4225 = vmax.xlane.f32.xlu0 %v4224_v59  ;;  %4219 = vmax.xlane.f32.xlu1 %v4218_v35  ;;  %v3953_v36 = vpop.f32.mrf.mxu0 }
 0x8d8   : > { %v7462_v7 = vadd.f32 %v7441_v15, %v4007_v24  ;;  %v7465_v47 = vadd.f32 %v7429_v63, %v3953_v36 }
 0x8d9   : > { %v5726_v49 = vpop.f32.mrf.mxu0  ;;  %v5733_v10 = vpop.f32.mrf.mxu1 }
 0x8da   : > { %v4236_v18 = vsel %vm1107_vm3, %v7462_v7, -inf  ;;  %v4227_v59 = vsel %vm1107_vm3, %v7465_v47, -inf }
 0x8db   : > { %v4106_v57 = vpop.f32.mrf.mxu1  ;;  %4234 = vmax.xlane.f32.xlu0 %v4233_v29  ;;  %4237 = vmax.xlane.f32.xlu1 %v4236_v18  ;;  %v3956_v17 = vpop.f32.mrf.mxu0 }
 0x8dc   : > { %v7472_v39 = vadd.f32 %v7441_v15, %v3956_v17  ;;  %v7475_v1 = vadd.f32 %v7429_v63, %v4106_v57 }
 0x8dd   : > { %v5727_v50 = vpop.f32.mrf.mxu0  ;;  %v5744_v60 = vpop.f32.mrf.mxu1 }
 0x8de   : > { %v4230_v35 = vsel %vm1107_vm3, %v7472_v39, -inf  ;;  %v4245_v57 = vsel %vm1107_vm3, %v7475_v1, -inf }
 0x8df   : > { %v4109_v24 = vpop.f32.mrf.mxu1  ;;  %4228 = vmax.xlane.f32.xlu0 %v4227_v59  ;;  %4231 = vmax.xlane.f32.xlu1 %v4230_v35  ;;  %v4055_v36 = vpop.f32.mrf.mxu0 }
 0x8e0   : > { %v7482_v49 = vadd.f32 %v7441_v15, %v4109_v24  ;;  %v7485_v18 = vadd.f32 %v7429_v63, %v4055_v36 }
 0x8e1   : > { %v5738_v10 = vpop.f32.mrf.mxu0  ;;  %v5745_v29 = vpop.f32.mrf.mxu1 }
 0x8e2   : > { %v4248_v17 = vsel %vm1107_vm3, %v7482_v49, -inf  ;;  %v4239_v36 = vsel %vm1107_vm3, %v7485_v18, -inf }
 0x8e3   : > { %v4208_v50 = vpop.f32.mrf.mxu1  ;;  %4246 = vmax.xlane.f32.xlu0 %v4245_v57  ;;  %4249 = vmax.xlane.f32.xlu1 %v4248_v17  ;;  %v4058_v60 = vpop.f32.mrf.mxu0 }
 0x8e4   : > { %v7492_v59 = vadd.f32 %v7441_v15, %v4058_v60  ;;  %v7495_v10 = vadd.f32 %v7429_v63, %v4208_v50 }
 0x8e5   : > { %v5739_v35 = vpop.f32.mrf.mxu0  ;;  %v5756_v24 = vpop.f32.mrf.mxu1 }
 0x8e6   : > { %v4242_v29 = vsel %vm1107_vm3, %v7492_v59, -inf  ;;  %v4257_v35 = vsel %vm1107_vm3, %v7495_v10, -inf }
 0x8e7   : > { %v4211_v52 = vpop.f32.mrf.mxu1  ;;  %4240 = vmax.xlane.f32.xlu0 %v4239_v36  ;;  %4243 = vmax.xlane.f32.xlu1 %v4242_v29  ;;  %v4157_v57 = vpop.f32.mrf.mxu0 }
 0x8e8   : > { %v7502_v60 = vadd.f32 %v7429_v63, %v4157_v57 }
 0x8e9   : > { %v5750_v17 = vpop.f32.mrf.mxu0  ;;  %v5757_v58 = vpop.f32.mrf.mxu1 }
 0x8ea   : > { %v4251_v13 = vsel %vm1107_vm3, %v7502_v60, -inf  ;;  %v7519_v58 = vadd.f32 %v7441_v15, %v4211_v52 }
 0x8eb   : > { %4258 = vmax.xlane.f32.xlu0 %v4257_v35  ;;  %v4160_v50 = vpop.f32.mrf.mxu0 }
 0x8ed   : > { %v5751_v24 = vpop.f32.mrf.mxu0 }
 0x8ef   : > { %4252 = vmax.xlane.f32.xlu0 %v4251_v13  ;;  %v7522_v13 = vadd.f32 %v7441_v15, %v4160_v50 }
 0x8f8   : > { %4446 = vrot.lane.b32.xlu1 %v6278_v0, %s6128_s14  ;;  %v4260_v0 = vsel %vm1107_vm3, %v7519_v58, -inf }
 0x8fc   : > { %4493 = vrot.lane.b32.xlu1 %v6310_v34, %s6128_s14  ;;  %v4254_v34 = vsel %vm1107_vm3, %v7522_v13, -inf }
 0x900   : > { %4540 = vrot.lane.b32.xlu1 %v6305_v28, %s6128_s14 }
 0x905   : > { %4399 = vrot.lane.b32.xlu0 %v6281_v4, %s6128_s14 }
 0x909   : > { %4587 = vrot.lane.b32.xlu0 %v6338_v54, %s6128_s14 }
 0x924   : > { %4261 = vmax.xlane.f32.xlu1 %v4260_v0 }
 0x928   : > { %4255 = vmax.xlane.f32.xlu1 %v4254_v34 }
 0x939   : > { %4634 = vrot.lane.b32.xlu1 %v6334_v48, %s6128_s14 }
 0x958   : > { %v4223_v4 = vpop.xlane.xlu0 %4222 }
 0x959   : > { %v4265_v28 = vsub.f32 %v7434_v9, %v4223_v4 }
 0x95b   : > { %v4283_v54 = vmul.f32 1.442695, %v4265_v28 }
 0x95c   : > { %v4217_v52 = vpop.xlane.xlu0 %4216 }
 0x95d   : > { %6048 = vpow2.f32 %v4283_v54  ;;  %v4263_v63 = vsub.f32 %v7444_v56, %v4217_v52 }
 0x95f   : > { %v4279_v15 = vmul.f32 1.442695, %v4263_v63 }
 0x960   : > { %v4226_v36 = vpop.xlane.xlu0 %4225  ;;  %v4220_v29 = vpop.xlane.xlu1 %4219 }
 0x961   : > { %6050 = vpow2.f32 %v4279_v15  ;;  %v4266_v57 = vsub.f32 %v7447_v6, %v4226_v36  ;;  %v4264_v17 = vsub.f32 %v7452_v43, %v4220_v29 }
 0x963   : > { %v4285_v35 = vmul.f32 1.442695, %v4266_v57  ;;  %v4281_v50 = vmul.f32 1.442695, %v4264_v17 }
 0x964   : > { %v4235_v24 = vpop.xlane.xlu0 %4234  ;;  %v4238_v48 = vpop.xlane.xlu1 %4237 }
 0x965   : > { %6052 = vpow2.f32 %v4285_v35  ;;  %v4269_v9 = vsub.f32 %v7455_v23, %v4235_v24  ;;  %v4270_v0 = vsub.f32 %v7462_v7, %v4238_v48 }
 0x966   : > { %6054 = vpow2.f32 %v4281_v50 }
 0x967   : > { %v4291_v34 = vmul.f32 1.442695, %v4269_v9  ;;  %v4293_v56 = vmul.f32 1.442695, %v4270_v0 }
 0x968   : > { %v4229_v4 = vpop.xlane.xlu0 %4228  ;;  %v4232_v28 = vpop.xlane.xlu1 %4231 }
 0x969   : > { %6056 = vpow2.f32 %v4291_v34  ;;  %v4267_v54 = vsub.f32 %v7465_v47, %v4229_v4  ;;  %v4268_v6 = vsub.f32 %v7472_v39, %v4232_v28 }
 0x96a   : > { %v7538_v43 = vpop.eup %6048  ;;  %6058 = vpow2.f32 %v4293_v56 }
 0x96b   : > { %v4287_v52 = vmul.f32 1.442695, %v4267_v54  ;;  %v4289_v63 = vmul.f32 1.442695, %v4268_v6  ;;  %v4317_v23 = vsel %vm1107_vm3, %v7538_v43, 0.0 }
 0x96c   : > { %v4247_v15 = vpop.xlane.xlu0 %4246  ;;  %v4250_v7 = vpop.xlane.xlu1 %4249  ;;  %4318 = vadd.xlane.f32.xlu0 %v4317_v23 }
 0x96d   : > { %6060 = vpow2.f32 %v4287_v52  ;;  %v4273_v36 = vsub.f32 %v7475_v1, %v4247_v15  ;;  %v4274_v29 = vsub.f32 %v7482_v49, %v4250_v7 }
 0x96e   : > { %v7544_v57 = vpop.eup %6050  ;;  %6062 = vpow2.f32 %v4289_v63 }
 0x96f   : > { %v4299_v47 = vmul.f32 1.442695, %v4273_v36  ;;  %v4301_v39 = vmul.f32 1.442695, %v4274_v29  ;;  %v4311_v17 = vsel %vm1107_vm3, %v7544_v57, 0.0 }
 0x970   : > { %v4241_v35 = vpop.xlane.xlu0 %4240  ;;  %v4244_v50 = vpop.xlane.xlu1 %4243  ;;  %4312 = vadd.xlane.f32.xlu0 %v4311_v17 }
 0x971   : > { %6064 = vpow2.f32 %v4299_v47  ;;  %v4271_v24 = vsub.f32 %v7485_v18, %v4241_v35  ;;  %v4272_v48 = vsub.f32 %v7492_v59, %v4244_v50  ;;  %v7868_v59 = vmov 0.0  }
 0x972   : > { %v7550_v9 = vpop.eup %6052  ;;  %6066 = vpow2.f32 %v4301_v39 }
 0x973   : > { %v4295_v1 = vmul.f32 1.442695, %v4271_v24  ;;  %v4297_v49 = vmul.f32 1.442695, %v4272_v48  ;;  %v4320_v0 = vsel %vm1107_vm3, %v7550_v9, 0.0  ;;  %v7554_v34 = vpop.eup %6054 }
 0x974   : > { %v4259_v56 = vpop.xlane.xlu0 %4258  ;;  %v4447_v4 = vpop.permute.xlu1 %4446  ;;  %4321 = vadd.xlane.f32.xlu1 %v4320_v0  ;;  %v4314_v52 = vsel %vm1107_vm3, %v7554_v34, 0.0 }
 0x975   : > { %6068 = vpow2.f32 %v4295_v1  ;;  %v4277_v28 = vsub.f32 %v7495_v10, %v4259_v56  ;;  %5765 = vmatpush3.bf16.msra.mxu1 %v4447_v4 }
 0x976   : > { %v7557_v18 = vpop.eup %6056  ;;  %5776 = vmatprep.subr.bf16.mxu1 %v7868_v59  ;;  %6070 = vpow2.f32 %v4297_v49 }
 0x977   : > { %v4307_v54 = vmul.f32 1.442695, %v4277_v28  ;;  %v4329_v6 = vsel %vm1107_vm3, %v7557_v18, 0.0  ;;  %v7564_v63 = vpop.eup %6058 }
 0x978   : > { %4330 = vadd.xlane.f32.xlu0 %v4329_v6  ;;  %v4253_v23 = vpop.xlane.xlu0 %4252  ;;  %4315 = vadd.xlane.f32.xlu1 %v4314_v52  ;;  %v4332_v29 = vsel %vm1107_vm3, %v7564_v63, 0.0  ;;  %v7604_v6 = vpop.permute.xlu1 %4493 }
 0x979   : > { %6072 = vpow2.f32 %v4307_v54  ;;  %v4275_v10 = vsub.f32 %v7502_v60, %v4253_v23 }
 0x97a   : > { %v7567_v15 = vpop.eup %6060 }
 0x97b   : > { %v4303_v7 = vmul.f32 1.442695, %v4275_v10  ;;  %v4323_v36 = vsel %vm1107_vm3, %v7567_v15, 0.0  ;;  %v7573_v47 = vpop.eup %6062 }
 0x97c   : > { %4324 = vadd.xlane.f32.xlu0 %v4323_v36  ;;  %v4400_v39 = vpop.permute.xlu0 %4399  ;;  %4333 = vadd.xlane.f32.xlu1 %v4332_v29  ;;  %v4326_v35 = vsel %vm1107_vm3, %v7573_v47, 0.0  ;;  %v7608_v52 = vpop.permute.xlu1 %4540 }
 0x97d   : > { %6074 = vpow2.f32 %v4303_v7  ;;  %5759 = vmatpush3.bf16.msra.mxu0 %v4400_v39 }
 0x97e   : > { %v7575_v17 = vpop.eup %6064  ;;  %5770 = vmatprep.subr.bf16.mxu0 %v7868_v59 }
 0x97f   : > { %v4341_v60 = vsel %vm1107_vm3, %v7575_v17, 0.0  ;;  %v7582_v50 = vpop.eup %6066 }
 0x980   : > { %4342 = vadd.xlane.f32.xlu0 %v4341_v60  ;;  %4327 = vadd.xlane.f32.xlu1 %v4326_v35  ;;  %v4344_v1 = vsel %vm1107_vm3, %v7582_v50, 0.0 }
 0x982   : > { %v7584_v24 = vpop.eup %6068 }
 0x983   : > { %v4335_v48 = vsel %vm1107_vm3, %v7584_v24, 0.0  ;;  %v7590_v49 = vpop.eup %6070 }
 0x984   : > { %4336 = vadd.xlane.f32.xlu0 %v4335_v48  ;;  %4345 = vadd.xlane.f32.xlu1 %v4344_v1  ;;  %v4338_v4 = vsel %vm1107_vm3, %v7590_v49, 0.0 }
 0x986   : > { %v7592_v0 = vpop.eup %6072 }
 0x987   : > { %v4353_v56 = vsel %vm1107_vm3, %v7592_v0, 0.0 }
 0x988   : > { %4354 = vadd.xlane.f32.xlu0 %v4353_v56  ;;  %4339 = vadd.xlane.f32.xlu1 %v4338_v4 }
 0x98a   : > { %v7598_v28 = vpop.eup %6074 }
 0x98b   : > { %v4347_v54 = vsel %vm1107_vm3, %v7598_v28, 0.0 }
 0x98c   : > { %4348 = vadd.xlane.f32.xlu0 %v4347_v54 }
 0x9a2   : > { %4681 = vrot.lane.b32.xlu0 %v6370_v16, %s6128_s14 }
 0x9a6   : > { %2687 = vrot.lane.b32.xlu0 %v7055_v30, %s6129_s15 }
 0x9aa   : > { %2691 = vrot.lane.b32.xlu0 %v7051_v31, %s6129_s15 }
 0x9ad   : > { %v4262_v23 = vpop.xlane.xlu1 %4261 }
 0x9ae   : > { %v4278_v10 = vsub.f32 %v7519_v58, %v4262_v23  ;;  %3739 = vrot.lane.b32.xlu0 %v7400_v11, %s6130_s16 }
 0x9b0   : > { %v4309_v7 = vmul.f32 1.442695, %v4278_v10 }
 0x9b1   : > { %v4256_v16 = vpop.xlane.xlu1 %4255 }
 0x9b2   : > { %6076 = vpow2.f32 %v4309_v7  ;;  %v4276_v36 = vsub.f32 %v7522_v13, %v4256_v16  ;;  %3743 = vrot.lane.b32.xlu0 %v7396_v3, %s6130_s16 }
 0x9b4   : > { %v4305_v30 = vmul.f32 1.442695, %v4276_v36 }
 0x9b6   : > { %6078 = vpow2.f32 %v4305_v30  ;;  %2695 = vrot.lane.b32.xlu0 %v7061_v55, %s6129_s15 }
 0x9ba   : > { %2699 = vrot.lane.b32.xlu0 %v7059_v44, %s6129_s15 }
 0x9be   : > { %3747 = vrot.lane.b32.xlu0 %v7406_v38, %s6130_s16 }
 0x9bf   : > { %v7624_v31 = vpop.eup %6076 }
 0x9c0   : > { %v4356_v11 = vsel %vm1107_vm3, %v7624_v31, 0.0 }
 0x9c1   : > { %4357 = vadd.xlane.f32.xlu1 %v4356_v11 }
 0x9c2   : > { %3751 = vrot.lane.b32.xlu0 %v7404_v32, %s6130_s16 }
 0x9c3   : > { %v7630_v3 = vpop.eup %6078 }
 0x9c4   : > { %v4350_v55 = vsel %vm1107_vm3, %v7630_v3, 0.0 }
 0x9c5   : > { %4351 = vadd.xlane.f32.xlu1 %v4350_v55 }
 0x9c6   : > { %2703 = vrot.lane.b32.xlu0 %v7069_v62, %s6129_s15 }
 0x9ca   : > { %2707 = vrot.lane.b32.xlu0 %v7067_v41, %s6129_s15 }
 0x9ce   : > { %3755 = vrot.lane.b32.xlu0 %v7414_v20, %s6130_s16 }
 0x9d2   : > { %3759 = vrot.lane.b32.xlu0 %v7412_v27, %s6130_s16 }
 0x9d6   : > { %2711 = vrot.lane.b32.xlu0 %v7077_v53, %s6129_s15  ;;  %4728 = vrot.lane.b32.xlu1 %v6366_v5, %s6128_s14  ;;  %v7664_v5 = vpop.permute.xlu0 %4587 }
 0x9da   : > { %2715 = vrot.lane.b32.xlu0 %v7075_v8, %s6129_s15  ;;  %2689 = vrot.lane.b32.xlu1 %v7057_v45, %s6129_s15  ;;  %v4635_v45 = vpop.permute.xlu1 %4634 }
 0x9de   : > { %3763 = vrot.lane.b32.xlu0 %v7422_v26, %s6130_s16  ;;  %2693 = vrot.lane.b32.xlu1 %v7053_v51, %s6129_s15 }
 0x9e2   : > { %3741 = vrot.lane.b32.xlu1 %v7402_v37, %s6130_s16 }
 0x9e6   : > { %3745 = vrot.lane.b32.xlu1 %v7398_v19, %s6130_s16 }
 0x9ea   : > { %2697 = vrot.lane.b32.xlu1 %v7065_v46, %s6129_s15 }
 0x9ee   : > { %2701 = vrot.lane.b32.xlu1 %v7063_v12, %s6129_s15 }
 0x9f2   : > { %3749 = vrot.lane.b32.xlu1 %v7410_v14, %s6130_s16 }
 0x9f5   : > { %v4319_v51 = vpop.xlane.xlu0 %4318 }
 0x9f6   : > { %3753 = vrot.lane.b32.xlu1 %v7408_v21, %s6130_s16  ;;  %6080 = vrcp.f32 %v4319_v51 }
 0x9f9   : > { %v4313_v44 = vpop.xlane.xlu0 %4312 }
 0x9fa   : > { %2705 = vrot.lane.b32.xlu1 %v7073_v2, %s6129_s15 }
 0x9fd   : > { %v4322_v41 = vpop.xlane.xlu1 %4321 }
 0x9fe   : > { %6082 = vrcp.f32 %v4322_v41  ;;  %2709 = vrot.lane.b32.xlu1 %v7071_v42, %s6129_s15 }
 0x9ff   : > { %6084 = vrcp.f32 %v4313_v44 }
 0xa01   : > { %v4331_v12 = vpop.xlane.xlu0 %4330  ;;  %v4316_v46 = vpop.xlane.xlu1 %4315 }
 0xa02   : > { %3757 = vrot.lane.b32.xlu1 %v7418_v61, %s6130_s16  ;;  %6086 = vrcp.f32 %v4316_v46 }
 0xa03   : > { %6088 = vrcp.f32 %v4331_v12  ;;  %v6081_v2 = vpop.eup %6080 }
 0xa04   : > { %v4377_v37 = vmul.f32 %v6081_v2, %v7538_v43 }
 0xa05   : > { %v4325_v62 = vpop.xlane.xlu0 %4324  ;;  %v4334_v8 = vpop.xlane.xlu1 %4333 }
 0xa06   : > { %3761 = vrot.lane.b32.xlu1 %v7416_v22, %s6130_s16  ;;  %6090 = vrcp.f32 %v4334_v8 }
 0xa07   : > { %6092 = vrcp.f32 %v4325_v62 }
 0xa09   : > { %v4343_v53 = vpop.xlane.xlu0 %4342  ;;  %v4328_v19 = vpop.xlane.xlu1 %4327 }
 0xa0a   : > { %2713 = vrot.lane.b32.xlu1 %v7086_v40, %s6129_s15  ;;  %6094 = vrcp.f32 %v4328_v19 }
 0xa0b   : > { %v6083_v42 = vpop.eup %6082  ;;  %6096 = vrcp.f32 %v4343_v53 }
 0xa0c   : > { %v4378_v32 = vmul.f32 %v6083_v42, %v7550_v9  ;;  %v6085_v14 = vpop.eup %6084 }
 0xa0d   : > { %v4337_v38 = vpop.xlane.xlu0 %4336  ;;  %v4346_v21 = vpop.xlane.xlu1 %4345  ;;  %v4375_v40 = vmul.f32 %v6085_v14, %v7544_v57 }
 0xa0e   : > { %v4392_v27 = vpack.c.bf16 %v4378_v32, %v4377_v37  ;;  %2717 = vrot.lane.b32.xlu1 %v7079_v25, %s6129_s15  ;;  %6098 = vrcp.f32 %v4346_v21 }
 0xa0f   : > { %v6087_v20 = vpop.eup %6086  ;;  %6100 = vrcp.f32 %v4337_v38 }
 0xa10   : > { %5767 = vmatmul.mubr.msk.bf16.vlgmr.msra.gmra.mxu1 %vm1107_vm3, %v4392_v27  ;;  %v4376_v22 = vmul.f32 %v6087_v20, %v7554_v34  ;;  %v6089_v58 = vpop.eup %6088 }
 0xa11   : > { %5777 = vmatpush3.bf16.msra.mxu1 %v7608_v52  ;;  %v7686_v61 = vpop.xlane.xlu0 %4354  ;;  %v4340_v26 = vpop.xlane.xlu1 %4339  ;;  %5778 = vmatprep.mubr.msk.bf16.mxu1 %vm6121_vm1, %v7868_v59  ;;  %v4381_v43 = vmul.f32 %v6089_v58, %v7557_v18 }
 0xa12   : > { %3765 = vrot.lane.b32.xlu1 %v7431_v33, %s6130_s16  ;;  %5788 = vmatprep.subr.bf16.mxu1 %v7868_v59  ;;  %v4391_v25 = vpack.c.bf16 %v4376_v22, %v4375_v40  ;;  %6102 = vrcp.f32 %v4340_v26 }
 0xa13   : > { %v6091_v13 = vpop.eup %6090  ;;  %6104 = vrcp.f32 %v7686_v61 }
 0xa14   : > { %v4382_v57 = vmul.f32 %v6091_v13, %v7564_v63  ;;  %5761 = vmatmul.mubr.msk.bf16.vlgmr.msra.gmra.mxu0 %vm1107_vm3, %v4391_v25  ;;  %v6093_v34 = vpop.eup %6092  ;;  %v5854_v13 = vld [vmem:[%s7860_s6 + $0x8] sm:$0xff]  }
 0xa15   : > { %v4349_v9 = vpop.xlane.xlu0 %4348  ;;  %5771 = vmatpush3.bf16.msra.mxu0 %v7604_v6  ;;  %5772 = vmatprep.mubr.msk.bf16.mxu0 %vm6121_vm1, %v7868_v59  ;;  %v4379_v39 = vmul.f32 %v6093_v34, %v7567_v15 }
 0xa16   : > { %v4394_v29 = vpack.c.bf16 %v4382_v57, %v4381_v43  ;;  %5782 = vmatprep.subr.bf16.mxu0 %v7868_v59  ;;  %v5855_v57 = vld [vmem:[%s7860_s6] sm:$0xff]  }
 0xa17   : > { %v6095_v33 = vpop.eup %6094 }
 0xa18   : > { %v4380_v60 = vmul.f32 %v6095_v33, %v7573_v47  ;;  %5779 = vmatmul.mubr.msk.bf16.vlgmr.msra.gmra.mxu1 %vm1107_vm3, %v4394_v29  ;;  %v6097_v63 = vpop.eup %6096 }
 0xa19   : > { %v4682_v18 = vpop.permute.xlu0 %4681  ;;  %5789 = vmatpush3.bf16.msra.mxu1 %v4635_v45  ;;  %5790 = vmatprep.mubr.msk.bf16.mxu1 %vm6121_vm1, %v7868_v59  ;;  %v4385_v1 = vmul.f32 %v6097_v63, %v7575_v17 }
 0xa1a   : > { %v4393_v35 = vpack.c.bf16 %v4380_v60, %v4379_v39  ;;  %5800 = vmatprep.subr.bf16.mxu1 %v7868_v59 }
 0xa1b   : > { %v6099_v48 = vpop.eup %6098 }
 0xa1c   : > { %v4386_v56 = vmul.f32 %v6099_v48, %v7582_v50  ;;  %5773 = vmatmul.mubr.msk.bf16.vlgmr.msra.gmra.mxu0 %vm1107_vm3, %v4393_v35  ;;  %v6101_v47 = vpop.eup %6100 }
 0xa1d   : > { %v2688_v15 = vpop.permute.xlu0 %2687  ;;  %5783 = vmatpush3.bf16.msra.mxu0 %v7664_v5  ;;  %5784 = vmatprep.mubr.msk.bf16.mxu0 %vm6121_vm1, %v7868_v59  ;;  %v4383_v6 = vmul.f32 %v6101_v47, %v7584_v24 }
 0xa1e   : > { %2736 = vst.msk [vmem:[#allocation2] sm:$0xff] %vm2735_vm4, %v2688_v15  ;;  %v4396_v4 = vpack.c.bf16 %v4386_v56, %v4385_v1  ;;  %5794 = vmatprep.subr.bf16.mxu0 %v7868_v59 }
 0xa1f   : > { %v6103_v54 = vpop.eup %6102 }
 0xa20   : > { %v4384_v17 = vmul.f32 %v6103_v54, %v7590_v49  ;;  %5791 = vmatmul.mubr.msk.bf16.vlgmr.msra.gmra.mxu1 %vm1107_vm3, %v4396_v4  ;;  %v6105_v12 = vpop.eup %6104 }
 0xa21   : > { %v2692_v50 = vpop.permute.xlu0 %2691  ;;  %5802 = vmatprep.mubr.msk.bf16.mxu1 %vm6121_vm1, %v7868_v59  ;;  %v4389_v8 = vmul.f32 %v6105_v12, %v7592_v0 }
 0xa22   : > { %2738 = vst.msk [vmem:[#allocation2 + $0x10] sm:$0xff] %vm2735_vm4, %v2692_v50  ;;  %v4395_v52 = vpack.c.bf16 %v4384_v17, %v4383_v6 }
 0xa24   : > { %5785 = vmatmul.mubr.msk.bf16.vlgmr.msra.gmra.mxu0 %vm1107_vm3, %v4395_v52 }
 0xa25   : > { %v3740_v23 = vpop.permute.xlu0 %3739  ;;  %5795 = vmatpush3.bf16.msra.mxu0 %v4682_v18  ;;  %5796 = vmatprep.mubr.msk.bf16.mxu0 %vm6121_vm1, %v7868_v59 }
 0xa26   : > { %3788 = vst.msk [vmem:[#allocation2] sm:$0xff] %vm3787_vm5, %v3740_v23  ;;  %5806 = vmatprep.subr.bf16.mxu0 %v5854_v13 }
 0xa29   : > { %v3744_v24 = vpop.permute.xlu0 %3743 }
 0xa2a   : > { %3790 = vst.msk [vmem:[#allocation2 + $0x10] sm:$0xff] %vm3787_vm5, %v3744_v24 }
 0xa2d   : > { %v2696_v49 = vpop.permute.xlu0 %2695 }
 0xa2e   : > { %2740 = vst.msk [vmem:[#allocation2 + $0x20] sm:$0xff] %vm2735_vm4, %v2696_v49  ;;  %v7869_v49 = vld [vmem:[#allocation3_spill] sm:$0xff] }
 0xa31   : > { %v2700_v10 = vpop.permute.xlu0 %2699 }
 0xa32   : > { %2742 = vst.msk [vmem:[#allocation2 + $0x30] sm:$0xff] %vm2735_vm4, %v2700_v10 }
 0xa35   : > { %v3748_v7 = vpop.permute.xlu0 %3747 }
 0xa36   : > { %3792 = vst.msk [vmem:[#allocation2 + $0x20] sm:$0xff] %vm3787_vm5, %v3748_v7  ;;  %v7870_v7 = vld [vmem:[#allocation4_spill] sm:$0xff] }
 0xa39   : > { %v3752_v16 = vpop.permute.xlu0 %3751 }
 0xa3a   : > { %3794 = vst.msk [vmem:[#allocation2 + $0x30] sm:$0xff] %vm3787_vm5, %v3752_v16 }
 0xa3d   : > { %v2704_v36 = vpop.permute.xlu0 %2703 }
 0xa3e   : > { %2744 = vst.msk [vmem:[#allocation2 + $0x40] sm:$0xff] %vm2735_vm4, %v2704_v36 }
 0xa41   : > { %v2708_v30 = vpop.permute.xlu0 %2707 }
 0xa42   : > { %2746 = vst.msk [vmem:[#allocation2 + $0x50] sm:$0xff] %vm2735_vm4, %v2708_v30 }
 0xa45   : > { %v3756_v59 = vpop.permute.xlu0 %3755 }
 0xa46   : > { %3796 = vst.msk [vmem:[#allocation2 + $0x40] sm:$0xff] %vm3787_vm5, %v3756_v59 }
 0xa49   : > { %v3760_v11 = vpop.permute.xlu0 %3759 }
 0xa4a   : > { %3798 = vst.msk [vmem:[#allocation2 + $0x50] sm:$0xff] %vm3787_vm5, %v3760_v11  ;;  %v4358_v55 = vpop.xlane.xlu1 %4357 }
 0xa4b   : > { %6106 = vrcp.f32 %v4358_v55 }
 0xa4c   : > { %6108 = vrcp.f32 %v4349_v9 }
 0xa4d   : > { %v2712_v5 = vpop.permute.xlu0 %2711 }
 0xa4e   : > { %2748 = vst.msk [vmem:[#allocation2 + $0x60] sm:$0xff] %vm2735_vm4, %v2712_v5  ;;  %v4352_v51 = vpop.xlane.xlu1 %4351 }
 0xa4f   : > { %6110 = vrcp.f32 %v4352_v51 }
 0xa51   : > { %v2716_v45 = vpop.permute.xlu0 %2715 }
 0xa52   : > { %2750 = vst.msk [vmem:[#allocation2 + $0x70] sm:$0xff] %vm2735_vm4, %v2716_v45  ;;  %v4729_v44 = vpop.permute.xlu1 %4728 }
 0xa53   : > { %5801 = vmatpush3.bf16.msra.mxu1 %v4729_v44 }
 0xa55   : > { %v3764_v41 = vpop.permute.xlu0 %3763 }
 0xa56   : > { %3800 = vst.msk [vmem:[#allocation2 + $0x60] sm:$0xff] %vm3787_vm5, %v3764_v41  ;;  %v2690_v46 = vpop.permute.xlu1 %2689 }
 0xa57   : > { %2737 = vst.msk [vmem:[#allocation2 + $0x8] sm:$0xff] %vm2735_vm4, %v2690_v46 }
 0xa58   : > { %v6107_v62 = vpop.eup %6106 }
 0xa59   : > { %v4390_v2 = vmul.f32 %v6107_v62, %v7624_v31  ;;  %v6109_v53 = vpop.eup %6108 }
 0xa5a   : > { %v2694_v19 = vpop.permute.xlu1 %2693  ;;  %v4387_v32 = vmul.f32 %v6109_v53, %v7598_v28 }
 0xa5b   : > { %v4398_v42 = vpack.c.bf16 %v4390_v2, %v4389_v8  ;;  %2739 = vst.msk [vmem:[#allocation2 + $0x18] sm:$0xff] %vm2735_vm4, %v2694_v19 }
 0xa5c   : > { %v6111_v37 = vpop.eup %6110 }
 0xa5d   : > { %v4388_v38 = vmul.f32 %v6111_v37, %v7630_v3  ;;  %5803 = vmatmul.mubr.msk.bf16.vlgmr.msra.gmra.mxu1 %vm1107_vm3, %v4398_v42 }
 0xa5e   : > { %v3742_v21 = vpop.permute.xlu1 %3741 }
 0xa5f   : > { %v4397_v14 = vpack.c.bf16 %v4388_v38, %v4387_v32  ;;  %3789 = vst.msk [vmem:[#allocation2 + $0x8] sm:$0xff] %vm3787_vm5, %v3742_v21 }
 0xa61   : > { %5797 = vmatmul.mubr.msk.bf16.vlgmr.msra.gmra.mxu0 %vm1107_vm3, %v4397_v14 }
 0xa62   : > { %v3746_v0 = vpop.permute.xlu1 %3745  ;;  %5807 = vmatpush3.bf16.msra.mxu0 %v5854_v13 }
 0xa63   : > { %3791 = vst.msk [vmem:[#allocation2 + $0x18] sm:$0xff] %vm3787_vm5, %v3746_v0  ;;  %5808 = vmatprep.subr.bf16.mxu0 %v5855_v57 }
 0xa66   : > { %v2698_v31 = vpop.permute.xlu1 %2697  ;;  %5809 = vmatpush3.bf16.msra.mxu0 %v5855_v57 }
 0xa67   : > { %2741 = vst.msk [vmem:[#allocation2 + $0x28] sm:$0xff] %vm2735_vm4, %v2698_v31 }
 0xa6a   : > { %v2702_v27 = vpop.permute.xlu1 %2701 }
 0xa6b   : > { %2743 = vst.msk [vmem:[#allocation2 + $0x38] sm:$0xff] %vm2735_vm4, %v2702_v27 }
 0xa6e   : > { %v3750_v28 = vpop.permute.xlu1 %3749 }
 0xa6f   : > { %3793 = vst.msk [vmem:[#allocation2 + $0x28] sm:$0xff] %vm3787_vm5, %v3750_v28 }
 0xa72   : > { %v3754_v3 = vpop.permute.xlu1 %3753 }
 0xa73   : > { %3795 = vst.msk [vmem:[#allocation2 + $0x38] sm:$0xff] %vm3787_vm5, %v3754_v3 }
 0xa76   : > { %v2706_v20 = vpop.permute.xlu1 %2705 }
 0xa77   : > { %2745 = vst.msk [vmem:[#allocation2 + $0x48] sm:$0xff] %vm2735_vm4, %v2706_v20 }
 0xa7a   : > { %v2710_v40 = vpop.permute.xlu1 %2709 }
 0xa7b   : > { %2747 = vst.msk [vmem:[#allocation2 + $0x58] sm:$0xff] %vm2735_vm4, %v2710_v40 }
 0xa7e   : > { %v3758_v22 = vpop.permute.xlu1 %3757 }
 0xa7f   : > { %3797 = vst.msk [vmem:[#allocation2 + $0x48] sm:$0xff] %vm3787_vm5, %v3758_v22 }
 0xa82   : > { %v3762_v61 = vpop.permute.xlu1 %3761 }
 0xa83   : > { %3799 = vst.msk [vmem:[#allocation2 + $0x58] sm:$0xff] %vm3787_vm5, %v3762_v61 }
 0xa86   : > { %v2714_v26 = vpop.permute.xlu1 %2713 }
 0xa87   : > { %2749 = vst.msk [vmem:[#allocation2 + $0x68] sm:$0xff] %vm2735_vm4, %v2714_v26 }
 0xa8a   : > { %v2718_v58 = vpop.permute.xlu1 %2717 }
 0xa8b   : > { %2751 = vst.msk [vmem:[#allocation2 + $0x78] sm:$0xff] %vm2735_vm4, %v2718_v58 }
 0xa8e   : > { %v3766_v25 = vpop.permute.xlu1 %3765 }
 0xa8f   : > { %3801 = vst.msk [vmem:[#allocation2 + $0x68] sm:$0xff] %vm3787_vm5, %v3766_v25 }
 0xad0   : > { %v4486_v43 = vpop.f32.mrf.mxu1 }
 0xad1   : > { %4795 = vrot.lane.b32.xlu0 %v4486_v43, %s6131_s20 }
 0xad2   : > { %v5768_v9 = vpop.f32.mrf.mxu1 }
 0xad4   : > { %v4489_v34 = vpop.f32.mrf.mxu1  ;;  %v4439_v29 = vpop.f32.mrf.mxu0 }
 0xad5   : > { %4797 = vrot.lane.b32.xlu1 %v4489_v34, %s6131_s20  ;;  %4791 = vrot.lane.b32.xlu0 %v4439_v29, %s6131_s20 }
 0xad6   : > { %v5769_v33 = vpop.f32.mrf.mxu1  ;;  %v5762_v39 = vpop.f32.mrf.mxu0 }
 0xad8   : > { %v4442_v60 = vpop.f32.mrf.mxu0  ;;  %v4580_v18 = vpop.f32.mrf.mxu1 }
 0xad9   : > { %4803 = vrot.lane.b32.xlu0 %v4580_v18, %s6131_s20  ;;  %4793 = vrot.lane.b32.xlu1 %v4442_v60, %s6131_s20 }
 0xada   : > { %v5763_v63 = vpop.f32.mrf.mxu0  ;;  %v5780_v35 = vpop.f32.mrf.mxu1 }
 0xadc   : > { %v4533_v48 = vpop.f32.mrf.mxu0  ;;  %v4583_v1 = vpop.f32.mrf.mxu1 }
 0xadd   : > { %4805 = vrot.lane.b32.xlu1 %v4583_v1, %s6131_s20  ;;  %4799 = vrot.lane.b32.xlu0 %v4533_v48, %s6131_s20 }
 0xade   : > { %v5774_v56 = vpop.f32.mrf.mxu0  ;;  %v5781_v15 = vpop.f32.mrf.mxu1 }
 0xadf   : > { %v5211_v56 = vld [vmem:[%s7861_s7] ss:$0 sm:$0xff] }
 0xae0   : > { %v4536_v47 = vpop.f32.mrf.mxu0  ;;  %v4674_v4 = vpop.f32.mrf.mxu1 }
 0xae1   : > { %4811 = vrot.lane.b32.xlu0 %v4674_v4, %s6131_s20  ;;  %4801 = vrot.lane.b32.xlu1 %v4536_v47, %s6131_s20 }
 0xae2   : > { %v5775_v54 = vpop.f32.mrf.mxu0  ;;  %v5792_v6 = vpop.f32.mrf.mxu1 }
 0xae4   : > { %v4627_v17 = vpop.f32.mrf.mxu0  ;;  %v4677_v50 = vpop.f32.mrf.mxu1 }
 0xae5   : > { %4813 = vrot.lane.b32.xlu1 %v4677_v50, %s6131_s20  ;;  %4807 = vrot.lane.b32.xlu0 %v4627_v17, %s6131_s20 }
 0xae6   : > { %v5786_v52 = vpop.f32.mrf.mxu0  ;;  %v5793_v23 = vpop.f32.mrf.mxu1 }
 0xae8   : > { %v4630_v24 = vpop.f32.mrf.mxu0 }
 0xae9   : > { %3767 = vrot.lane.b32.xlu0 %v7869_v49, %s6130_s16  ;;  %4809 = vrot.lane.b32.xlu1 %v4630_v24, %s6131_s20 }
 0xaea   : > { %v5787_v10 = vpop.f32.mrf.mxu0 }
 0xaed   : > { %3769 = vrot.lane.b32.xlu1 %v7870_v7, %s6130_s16 }
 0xb1d   : > { %v4768_v16 = vpop.f32.mrf.mxu1 }
 0xb1f   : > { %v5804_v36 = vpop.f32.mrf.mxu1 }
 0xb21   : > { %v4721_v30 = vpop.f32.mrf.mxu0  ;;  %v4771_v59 = vpop.f32.mrf.mxu1 }
 0xb22   : > { %4815 = vrot.lane.b32.xlu0 %v4721_v30, %s6131_s20 }
 0xb23   : > { %v5798_v11 = vpop.f32.mrf.mxu0  ;;  %v5805_v55 = vpop.f32.mrf.mxu1 }
 0xb25   : > { %v4724_v5 = vpop.f32.mrf.mxu0 }
 0xb26   : > { %4819 = vrot.lane.b32.xlu0 %v4768_v16, %s6131_s20  ;;  %4817 = vrot.lane.b32.xlu1 %v4724_v5, %s6131_s20 }
 0xb27   : > { %v5799_v51 = vpop.f32.mrf.mxu0 }
 0xb2a   : > { %4821 = vrot.lane.b32.xlu1 %v4771_v59, %s6131_s20 }
 0xb43   : > { %v4796_v45 = vpop.permute.xlu0 %4795 }
 0xb44   : > { %4842 = vst.msk [vmem:[#allocation2 + $0x10] sm:$0xff] %vm4839_vm6, %v4796_v45 }
 0xb47   : > { %v4798_v44 = vpop.permute.xlu1 %4797  ;;  %v4792_v41 = vpop.permute.xlu0 %4791 }
 0xb48   : > { %4843 = vst.msk [vmem:[#allocation2 + $0x18] sm:$0xff] %vm4839_vm6, %v4798_v44  ;;  %4840 = vst.msk [vmem:[#allocation2] sm:$0xff] %vm4839_vm6, %v4792_v41 }
 0xb4b   : > { %v4804_v12 = vpop.permute.xlu0 %4803  ;;  %v4794_v46 = vpop.permute.xlu1 %4793  ;;  %v4858_v38 = vld [vmem:[#allocation2 + $0x10] sm:$0xff] }
 0xb4c   : > { %4846 = vst.msk [vmem:[#allocation2 + $0x30] sm:$0xff] %vm4839_vm6, %v4804_v12  ;;  %4841 = vst.msk [vmem:[#allocation2 + $0x8] sm:$0xff] %vm4839_vm6, %v4794_v46 }
 0xb4f   : > { %v4806_v62 = vpop.permute.xlu1 %4805  ;;  %v4800_v8 = vpop.permute.xlu0 %4799  ;;  %v4859_v2 = vld [vmem:[#allocation2 + $0x18] sm:$0xff]  ;;  %v4856_v42 = vld [vmem:[#allocation2] sm:$0xff] }
 0xb50   : > { %4847 = vst.msk [vmem:[#allocation2 + $0x38] sm:$0xff] %vm4839_vm6, %v4806_v62  ;;  %4844 = vst.msk [vmem:[#allocation2 + $0x20] sm:$0xff] %vm4839_vm6, %v4800_v8  ;;  %v4873_v21 = vpack.c.bf16 %v4859_v2, %v4858_v38 }
 0xb53   : > { %v4812_v53 = vpop.permute.xlu0 %4811  ;;  %v4802_v19 = vpop.permute.xlu1 %4801  ;;  %v4857_v37 = vld [vmem:[#allocation2 + $0x8] sm:$0xff]  ;;  %v4862_v22 = vld [vmem:[#allocation2 + $0x30] sm:$0xff] }
 0xb54   : > { %4850 = vst.msk [vmem:[#allocation2 + $0x50] sm:$0xff] %vm4839_vm6, %v4812_v53  ;;  %4845 = vst.msk [vmem:[#allocation2 + $0x28] sm:$0xff] %vm4839_vm6, %v4802_v19  ;;  %v4872_v32 = vpack.c.bf16 %v4857_v37, %v4856_v42 }
 0xb56   : > { %5810 = vmatprep.mubr.msk.bf16.mxu0 %vm430_vm0, %v4872_v32 }
 0xb57   : > { %5811 = vmatmul.mubr.msk.bf16.vlgmr.msra.gmra.mxu0 %vm430_vm0, %v4873_v21  ;;  %v4814_v14 = vpop.permute.xlu1 %4813  ;;  %v4808_v0 = vpop.permute.xlu0 %4807  ;;  %v4863_v31 = vld [vmem:[#allocation2 + $0x38] sm:$0xff]  ;;  %v4860_v3 = vld [vmem:[#allocation2 + $0x20] sm:$0xff] }
 0xb58   : > { %4851 = vst.msk [vmem:[#allocation2 + $0x58] sm:$0xff] %vm4839_vm6, %v4814_v14  ;;  %4848 = vst.msk [vmem:[#allocation2 + $0x40] sm:$0xff] %vm4839_vm6, %v4808_v0  ;;  %v4875_v61 = vpack.c.bf16 %v4863_v31, %v4862_v22 }
 0xb5b   : > { %v3768_v27 = vpop.permute.xlu0 %3767  ;;  %v4810_v28 = vpop.permute.xlu1 %4809  ;;  %v4861_v20 = vld [vmem:[#allocation2 + $0x28] sm:$0xff]  ;;  %v4866_v57 = vld [vmem:[#allocation2 + $0x50] sm:$0xff] }
 0xb5c   : > { %3802 = vst.msk [vmem:[#allocation2 + $0x70] sm:$0xff] %vm3787_vm5, %v3768_v27  ;;  %v4874_v40 = vpack.c.bf16 %v4861_v20, %v4860_v3 }
 0xb5d   : > { %4849 = vst.msk [vmem:[#allocation2 + $0x48] sm:$0xff] %vm4839_vm6, %v4810_v28 }
 0xb5e   : > { %5814 = vmatprep.mubr.msk.bf16.mxu0 %vm430_vm0, %v4874_v40 }
 0xb5f   : > { %5815 = vmatmul.mubr.msk.bf16.gmra.mxu0 %vm430_vm0, %v4875_v61  ;;  %v3770_v26 = vpop.permute.xlu1 %3769  ;;  %v4867_v58 = vld [vmem:[#allocation2 + $0x58] sm:$0xff]  ;;  %v4864_v25 = vld [vmem:[#allocation2 + $0x40] sm:$0xff] }
 0xb60   : > { %3803 = vst.msk [vmem:[#allocation2 + $0x78] sm:$0xff] %vm3787_vm5, %v3770_v26  ;;  %v4877_v9 = vpack.c.bf16 %v4867_v58, %v4866_v57 }
 0xb64   : > { %v4865_v13 = vld [vmem:[#allocation2 + $0x48] sm:$0xff] }
 0xb65   : > { %v4876_v43 = vpack.c.bf16 %v4865_v13, %v4864_v25 }
 0xb67   : > { %5818 = vmatprep.mubr.msk.bf16.mxu0 %vm430_vm0, %v4876_v43 }
 0xb68   : > { %5819 = vmatmul.mubr.msk.bf16.gmra.mxu0 %vm430_vm0, %v4877_v9 }
 0xb94   : > { %v4816_v34 = vpop.permute.xlu0 %4815 }
 0xb95   : > { %4852 = vst.msk [vmem:[#allocation2 + $0x60] sm:$0xff] %vm4839_vm6, %v4816_v34 }
 0xb98   : > { %v4820_v29 = vpop.permute.xlu0 %4819  ;;  %v4818_v33 = vpop.permute.xlu1 %4817 }
 0xb99   : > { %4854 = vst.msk [vmem:[#allocation2 + $0x70] sm:$0xff] %vm4839_vm6, %v4820_v29  ;;  %4853 = vst.msk [vmem:[#allocation2 + $0x68] sm:$0xff] %vm4839_vm6, %v4818_v33 }
 0xb9c   : > { %v4822_v39 = vpop.permute.xlu1 %4821  ;;  %v4868_v60 = vld [vmem:[#allocation2 + $0x60] sm:$0xff] }
 0xb9d   : > { %4855 = vst.msk [vmem:[#allocation2 + $0x78] sm:$0xff] %vm4839_vm6, %v4822_v39 }
 0xba0   : > { %v4869_v18 = vld [vmem:[#allocation2 + $0x68] sm:$0xff]  ;;  %v4870_v35 = vld [vmem:[#allocation2 + $0x70] sm:$0xff] }
 0xba1   : > { %v4878_v63 = vpack.c.bf16 %v4869_v18, %v4868_v60 }
 0xba3   : > { %5822 = vmatprep.mubr.msk.bf16.mxu0 %vm430_vm0, %v4878_v63 }
 0xba4   : > { %v4871_v48 = vld [vmem:[#allocation2 + $0x78] sm:$0xff] }
 0xba5   : > { %v4879_v1 = vpack.c.bf16 %v4871_v48, %v4870_v35 }
 0xba7   : > { %5823 = vmatmul.mubr.msk.bf16.gmra.mxu0 %vm430_vm0, %v4879_v1 }
 0xc17   : > { %v5812_v15 = vpop.f32.mrf.mxu0 }
 0xc18   : > { %v4970_v47 = vadd.f32 %v5812_v15, %v5211_v56 }
 0xc19   : > { %v4961_v4 = vpop.f32.mrf.mxu0 }
 0xc1a   : > { %5026 = vst.msk [vmem:[%s7817_s27 + $0x10] sm:$0xff] %vm430_vm0, %v4970_v47  ;;  %v4962_v54 = vadd.f32 %v5211_v56, %v4961_v4 }
 0xc1b   : > { %v5813_v6 = vpop.f32.mrf.mxu0 }
 0xc1c   : > { %5024 = vst.msk [vmem:[%s7817_s27] sm:$0xff] %vm430_vm0, %v4962_v54  ;;  %v4973_v17 = vadd.f32 %v5813_v6, %v5211_v56 }
 0xc1d   : > { %v4964_v50 = vpop.f32.mrf.mxu0 }
 0xc1e   : > { %5027 = vst.msk [vmem:[%s7817_s27 + $0x18] sm:$0xff] %vm430_vm0, %v4973_v17  ;;  %v4965_v52 = vadd.f32 %v5211_v56, %v4964_v50 }
 0xc1f   : > { %v5816_v23 = vpop.f32.mrf.mxu0 }
 0xc20   : > { %5025 = vst.msk [vmem:[%s7817_s27 + $0x8] sm:$0xff] %vm430_vm0, %v4965_v52  ;;  %v4986_v24 = vadd.f32 %v5816_v23, %v5211_v56 }
 0xc21   : > { %v4977_v49 = vpop.f32.mrf.mxu0 }
 0xc22   : > { %5030 = vst.msk [vmem:[%s7817_s27 + $0x30] sm:$0xff] %vm430_vm0, %v4986_v24  ;;  %v4978_v10 = vadd.f32 %v5211_v56, %v4977_v49 }
 0xc23   : > { %v5817_v7 = vpop.f32.mrf.mxu0 }
 0xc24   : > { %5028 = vst.msk [vmem:[%s7817_s27 + $0x20] sm:$0xff] %vm430_vm0, %v4978_v10  ;;  %v4989_v16 = vadd.f32 %v5817_v7, %v5211_v56 }
 0xc25   : > { %v4980_v36 = vpop.f32.mrf.mxu0 }
 0xc26   : > { %5031 = vst.msk [vmem:[%s7817_s27 + $0x38] sm:$0xff] %vm430_vm0, %v4989_v16  ;;  %v4981_v30 = vadd.f32 %v5211_v56, %v4980_v36 }
 0xc28   : > { %v5820_v59 = vpop.f32.mrf.mxu0  ;;  %5029 = vst.msk [vmem:[%s7817_s27 + $0x28] sm:$0xff] %vm430_vm0, %v4981_v30 }
 0xc29   : > { %v5002_v11 = vadd.f32 %v5820_v59, %v5211_v56 }
 0xc2a   : > { %v4993_v55 = vpop.f32.mrf.mxu0 }
 0xc2b   : > { %5034 = vst.msk [vmem:[%s7817_s27 + $0x50] sm:$0xff] %vm430_vm0, %v5002_v11  ;;  %v4994_v5 = vadd.f32 %v5211_v56, %v4993_v55 }
 0xc2c   : > { %v5821_v51 = vpop.f32.mrf.mxu0 }
 0xc2d   : > { %5032 = vst.msk [vmem:[%s7817_s27 + $0x40] sm:$0xff] %vm430_vm0, %v4994_v5  ;;  %v5005_v45 = vadd.f32 %v5821_v51, %v5211_v56 }
 0xc2e   : > { %v4996_v44 = vpop.f32.mrf.mxu0 }
 0xc2f   : > { %5035 = vst.msk [vmem:[%s7817_s27 + $0x58] sm:$0xff] %vm430_vm0, %v5005_v45  ;;  %v4997_v41 = vadd.f32 %v5211_v56, %v4996_v44 }
 0xc31   : > { %5033 = vst.msk [vmem:[%s7817_s27 + $0x48] sm:$0xff] %vm430_vm0, %v4997_v41 }
 0xc67   : > { %v5824_v12 = vpop.f32.mrf.mxu0 }
 0xc68   : > { %v5018_v46 = vadd.f32 %v5824_v12, %v5211_v56 }
 0xc69   : > { %v5009_v62 = vpop.f32.mrf.mxu0 }
 0xc6a   : > { %5038 = vst.msk [vmem:[%s7817_s27 + $0x70] sm:$0xff] %vm430_vm0, %v5018_v46  ;;  %v5010_v8 = vadd.f32 %v5211_v56, %v5009_v62 }
 0xc6b   : > { %v5825_v2 = vpop.f32.mrf.mxu0 }
 0xc6c   : > { %5036 = vst.msk [vmem:[%s7817_s27 + $0x60] sm:$0xff] %vm430_vm0, %v5010_v8  ;;  %v5021_v53 = vadd.f32 %v5825_v2, %v5211_v56 }
 0xc6d   : > { %v5012_v19 = vpop.f32.mrf.mxu0 }
 0xc6e   : > { %5039 = vst.msk [vmem:[%s7817_s27 + $0x78] sm:$0xff] %vm430_vm0, %v5021_v53  ;;  %v5013_v42 = vadd.f32 %v5211_v56, %v5012_v19 }
 0xc70   : > { %5037 = vst.msk [vmem:[%s7817_s27 + $0x68] sm:$0xff] %vm430_vm0, %v5013_v42 }
 0xc71 PF: > { %s19_s30 = sadd.s32 1, %s6118_s30  }
 0xc72   : > { %p16_p4 = scmp.ge.s32.totalorder %s19_s30, 4  }
 0xc74   :  { %18 = sbr.rel (!%p16_p4) target bundleno = 1 (0x1), region = 92 }

</bundles_post_ra>
